<compile_context>
chip_gen: v5e
topology: v5e:2x2
jax: 0.10.0
libtpu: 0.0.40
codegen_flags: <defaults>
</compile_context>

<pallas_src>
import math
import functools

import numpy as np
import jax
import jax.numpy as jnp
from jax import lax
from jax.experimental import pallas as pl
from jax.experimental.pallas import tpu as pltpu

# ------------------------- model hyper-parameters (args) -------------------------
D_MODEL = 32          # args.d_model
N_HEAD = 4            # args.nhead
D_K = D_MODEL // N_HEAD
D_FF = 64             # args.d_ff
LN_EPS = 1e-6         # args.LN_eps

# mask handling modes (static, chosen at trace time)
MASK_NONE, MASK_CAUSAL, MASK_ARRAY = 0, 1, 2
_NEG_BIG = -1e30      # large finite negative instead of -inf (avoids NaN rows)


# ============================ fused decoder-layer kernel ============================

def _decoder_layer_kernel(*refs, B, Sq, Skv, H, Dk, D, eps, self_mode, cross_mode):
    refs = list(refs)
    out_ref = refs.pop()                      # single output ref (B*Sq, D)
    it = iter(refs)
    x_ref = next(it); enc_ref = next(it)
    ln1_g = next(it); ln1_b = next(it)
    wq1 = next(it); bq1 = next(it); wk1 = next(it); bk1 = next(it)
    wo1 = next(it); bo1 = next(it)
    ln2_g = next(it); ln2_b = next(it)
    wq2 = next(it); bq2 = next(it); wk2 = next(it); bk2 = next(it)
    wo2 = next(it); bo2 = next(it)
    ln3_g = next(it); ln3_b = next(it)
    ff_w1 = next(it); ff_b1 = next(it); ff_w2 = next(it); ff_b2 = next(it)
    self_mask_ref = next(it) if self_mode == MASK_ARRAY else None
    cross_mask_ref = next(it) if cross_mode == MASK_ARRAY else None

    inv_scale = 1.0 / math.sqrt(Dk)

    def causal_ok(sk):
        rows = lax.broadcasted_iota(jnp.int32, (Sq, sk), 0)
        cols = lax.broadcasted_iota(jnp.int32, (Sq, sk), 1)
        return rows >= cols                   # True = keep, False = mask out

    def layer_norm(t, g_ref, b_ref):
        # Bug-for-bug with the reference: unbiased std (ddof=1), divide by (sigma + eps).
        mean = jnp.mean(t, axis=-1, keepdims=True)
        cen = t - mean
        var = jnp.sum(cen * cen, axis=-1, keepdims=True) * (1.0 / (D - 1))
        sigma = jnp.sqrt(var)
        return g_ref[...] * (cen / (sigma + eps)) + b_ref[...]

    def mha(b, q_in, kv_in, sk, wq, bq, wk, bk, wo, bo, mode, mask_ref):
        # All-head projections in one MXU matmul each.
        q = jnp.dot(q_in, wq[...], preferred_element_type=jnp.float32) + bq[...]
        # Reference uses w_k for V (bug) and key == value here -> K and V identical.
        kv = jnp.dot(kv_in, wk[...], preferred_element_type=jnp.float32) + bk[...]
        wo_full = wo[...]
        ok = causal_ok(sk) if mode == MASK_CAUSAL else None

        acc = jnp.zeros((Sq, D), jnp.float32)
        for h in range(H):                    # static unroll; no grid-step overhead
            lo = h * Dk
            q_h = q[:, lo:lo + Dk]            # (Sq, Dk) static lane slice
            k_h = kv[:, lo:lo + Dk]           # (sk, Dk)
            # q @ k^T without materializing a transpose: contract last axes.
            s = lax.dot_general(q_h, k_h, (((1,), (1,)), ((), ())),
                                preferred_element_type=jnp.float32) * inv_scale
            if mode == MASK_CAUSAL:
                s = jnp.where(ok, s, _NEG_BIG)
            elif mode == MASK_ARRAY:
                m = mask_ref[pl.ds((b * H + h) * Sq, Sq), :]
                s = jnp.where(m != 0, s, _NEG_BIG)
            s = s - jnp.max(s, axis=-1, keepdims=True)
            p = jnp.exp(s)
            p = p / jnp.sum(p, axis=-1, keepdims=True)   # softmax; dropout = identity
            o_h = jnp.dot(p, k_h, preferred_element_type=jnp.float32)  # V == K
            # Fold the head-merge + output projection: accumulate o_h @ W_o[rows of h].
            acc = acc + jnp.dot(o_h, wo_full[lo:lo + Dk, :],
                                preferred_element_type=jnp.float32)
        return acc + bo[...]

    for b in range(B):                        # static unroll over batch
        xb = x_ref[pl.ds(b * Sq, Sq), :]      # (Sq, D)
        encb = enc_ref[pl.ds(b * Skv, Skv), :]

        # residual 1: x + SelfAttn(LN1(x), LN1(x), LN1(x), tgt_mask)
        h1 = layer_norm(xb, ln1_g, ln1_b)
        xb = xb + mha(b, h1, h1, Sq, wq1, bq1, wk1, bk1, wo1, bo1,
                      self_mode, self_mask_ref)

        # residual 2: x + CrossAttn(LN2(x), encoder_out, encoder_out, src_mask)
        h2 = layer_norm(xb, ln2_g, ln2_b)
        xb = xb + mha(b, h2, encb, Skv, wq2, bq2, wk2, bk2, wo2, bo2,
                      cross_mode, cross_mask_ref)

        # residual 3: x + FeedForward(LN3(x))
        h3 = layer_norm(xb, ln3_g, ln3_b)
        ff = jnp.dot(h3, ff_w1[...], preferred_element_type=jnp.float32) + ff_b1[...]
        ff = jnp.maximum(ff, 0.0)             # ReLU; dropout = identity (eval)
        ff = jnp.dot(ff, ff_w2[...], preferred_element_type=jnp.float32) + ff_b2[...]
        xb = xb + ff

        out_ref[pl.ds(b * Sq, Sq), :] = xb


# ================================ host-side wrapper ================================

def _prepare_mask(mask, B, H, Sq, Sk):
    """Classify a PyTorch-style attention mask (0 = masked out)."""
    if mask is None:
        return MASK_NONE, None
    try:
        arr = np.asarray(mask)                # fails for traced values
    except Exception:
        arr = None
    if arr is not None and Sq == Sk:
        try:
            full = np.broadcast_to(arr, (B, H, Sq, Sk)) != 0
            causal = np.broadcast_to(np.tril(np.ones((Sq, Sk), dtype=bool)),
                                     (B, H, Sq, Sk))
            if np.array_equal(full, causal):
                return MASK_CAUSAL, None      # regenerate in-kernel via iota (no DMA)
        except ValueError:
            pass
    m = (jnp.broadcast_to(jnp.asarray(mask), (B, H, Sq, Sk)) != 0).astype(jnp.int32)
    return MASK_ARRAY, m.reshape(B * H * Sq, Sk)


@functools.partial(jax.jit, static_argnames=("self_mode", "cross_mode"))
def _decoder_layer_call(params, x, encoder_out, self_mask, cross_mask, *,
                        self_mode, cross_mode):
    B, Sq, D = x.shape
    Skv = encoder_out.shape[1]
    H, Dk = N_HEAD, D // N_HEAD
    p = params

    def b2(v):                                # biases / LN params as (1, n) VMEM slabs
        return v.reshape(1, -1).astype(jnp.float32)

    inputs = [
        x.reshape(B * Sq, D).astype(jnp.float32),
        encoder_out.reshape(B * Skv, D).astype(jnp.float32),
        b2(p["ln1"]["gamma"]), b2(p["ln1"]["beta"]),
        p["mha1"]["w_q"], b2(p["mha1"]["b_q"]),
        p["mha1"]["w_k"], b2(p["mha1"]["b_k"]),
        p["mha1"]["w_o"], b2(p["mha1"]["b_o"]),
        b2(p["ln2"]["gamma"]), b2(p["ln2"]["beta"]),
        p["mha2"]["w_q"], b2(p["mha2"]["b_q"]),
        p["mha2"]["w_k"], b2(p["mha2"]["b_k"]),
        p["mha2"]["w_o"], b2(p["mha2"]["b_o"]),
        b2(p["ln3"]["gamma"]), b2(p["ln3"]["beta"]),
        p["ff"]["w1"], b2(p["ff"]["b1"]),
        p["ff"]["w2"], b2(p["ff"]["b2"]),
    ]
    if self_mode == MASK_ARRAY:
        inputs.append(self_mask)
    if cross_mode == MASK_ARRAY:
        inputs.append(cross_mask)

    kern = functools.partial(
        _decoder_layer_kernel, B=B, Sq=Sq, Skv=Skv, H=H, Dk=Dk, D=D,
        eps=LN_EPS, self_mode=self_mode, cross_mode=cross_mode)

    in_specs = [pl.BlockSpec(a.shape, lambda i, nd=a.ndim: (0,) * nd) for a in inputs]

    out = pl.pallas_call(
        kern,
        out_shape=jax.ShapeDtypeStruct((B * Sq, D), jnp.float32),
        grid=(1,),                            # single grid point; everything fits VMEM
        in_specs=in_specs,
        out_specs=pl.BlockSpec((B * Sq, D), lambda i: (0, 0)),
        compiler_params=pltpu.CompilerParams(dimension_semantics=("arbitrary",)),
    )(*inputs)
    return out.reshape(B, Sq, D)


def decoder_layer_forward(params, x, encoder_out, tgt_mask=None, src_mask=None):
    B, Sq, _ = x.shape
    Skv = encoder_out.shape[1]
    self_mode, self_mask = _prepare_mask(tgt_mask, B, N_HEAD, Sq, Sq)
    cross_mode, cross_mask = _prepare_mask(src_mask, B, N_HEAD, Sq, Skv)
    return _decoder_layer_call(params, x, encoder_out, self_mask, cross_mask,
                               self_mode=self_mode, cross_mode=cross_mode)


# ======================= pure-JAX reference (correctness check) =======================

def _ref_layernorm(x, gamma, beta, eps=LN_EPS):
    mean = jnp.mean(x, axis=-1, keepdims=True)
    sigma = jnp.std(x, axis=-1, keepdims=True, ddof=1)
    return gamma * (x - mean) / (sigma + eps) + beta


def _ref_mha(p, q_in, k_in, v_in, mask):
    b, sq, d = q_in.shape
    sk = k_in.shape[1]
    q = q_in @ p["w_q"] + p["b_q"]
    k = k_in @ p["w_k"] + p["b_k"]
    v = v_in @ p["w_k"] + p["b_k"]      # same w_k-for-V bug as the reference module
    q = q.reshape(b, sq, N_HEAD, D_K).transpose(0, 2, 1, 3)
    k = k.reshape(b, sk, N_HEAD, D_K).transpose(0, 2, 1, 3)
    v = v.reshape(b, sk, N_HEAD, D_K).transpose(0, 2, 1, 3)
    s = q @ jnp.swapaxes(k, -1, -2) / math.sqrt(D_K)
    if mask is not None:
        s = jnp.where(mask == 0, -jnp.inf, s)
    a = jax.nn.softmax(s, axis=-1)
    o = (a @ v).transpose(0, 2, 1, 3).reshape(b, sq, d)
    return o @ p["w_o"] + p["b_o"]


def _ref_decoder_layer(params, x, enc, tgt_mask, src_mask):
    h = _ref_layernorm(x, params["ln1"]["gamma"], params["ln1"]["beta"])
    x = x + _ref_mha(params["mha1"], h, h, h, tgt_mask)
    h = _ref_layernorm(x, params["ln2"]["gamma"], params["ln2"]["beta"])
    x = x + _ref_mha(params["mha2"], h, enc, enc, src_mask)
    h = _ref_layernorm(x, params["ln3"]["gamma"], params["ln3"]["beta"])
    ff = jnp.maximum(h @ params["ff"]["w1"] + params["ff"]["b1"], 0.0)
    ff = ff @ params["ff"]["w2"] + params["ff"]["b2"]
    return x + ff


# ================================== parameters ==================================

def _init_linear(key, din, dout):
    k1, k2 = jax.random.split(key)
    bound = 1.0 / math.sqrt(din)
    w = jax.random.uniform(k1, (din, dout), jnp.float32, -bound, bound)
    b = jax.random.uniform(k2, (dout,), jnp.float32, -bound, bound)
    return w, b


def init_params(key):
    keys = jax.random.split(key, 16)
    def mha(ks):
        wq, bq = _init_linear(ks[0], D_MODEL, D_MODEL)
        wk, bk = _init_linear(ks[1], D_MODEL, D_MODEL)
        wv, bv = _init_linear(ks[2], D_MODEL, D_MODEL)   # allocated but unused (w_k bug)
        wo, bo = _init_linear(ks[3], D_MODEL, D_MODEL)
        return {"w_q": wq, "b_q": bq, "w_k": wk, "b_k": bk,
                "w_v": wv, "b_v": bv, "w_o": wo, "b_o": bo}
    w1, b1 = _init_linear(keys[8], D_MODEL, D_FF)
    w2, b2 = _init_linear(keys[9], D_FF, D_MODEL)
    ln = lambda: {"gamma": jnp.ones((D_MODEL,), jnp.float32),
                  "beta": jnp.zeros((D_MODEL,), jnp.float32)}
    return {"mha1": mha(keys[0:4]), "mha2": mha(keys[4:8]),
            "ff": {"w1": w1, "b1": b1, "w2": w2, "b2": b2},
            "ln1": ln(), "ln2": ln(), "ln3": ln()}


# ===================================== main =====================================

if __name__ == "__main__":
    B, S = 2, 8
    root = jax.random.PRNGKey(0)
    kp, kx, ke = jax.random.split(root, 3)

    params = init_params(kp)
    x = jax.random.normal(kx, (B, S, D_MODEL), jnp.float32)
    encoder_out = jax.random.normal(ke, (B, S, D_MODEL), jnp.float32)
    tgt_mask = jnp.tril(jnp.ones((S, S), jnp.float32)).reshape(1, 1, S, S)
    src_mask = None

    out = decoder_layer_forward(params, x, encoder_out, tgt_mask, src_mask)
    out = jax.block_until_ready(out)

    ref = _ref_decoder_layer(params, x, encoder_out, tgt_mask, src_mask)
    assert out.shape == (B, S, D_MODEL), out.shape
    err = float(jnp.max(jnp.abs(out - ref)))
    assert jnp.allclose(out, ref, atol=1e-3, rtol=1e-3), f"max abs err = {err}"

    print("KERNEL_OK")
</pallas_src>

<mosaic_0001>
module attributes {stable_mosaic.version = 11 : i64} {
  func.func @_decoder_layer_kernel(%arg0: i32, %arg1: memref<16x32xf32, #tpu.memory_space<vmem>>, %arg2: memref<16x32xf32, #tpu.memory_space<vmem>>, %arg3: memref<1x32xf32, #tpu.memory_space<vmem>>, %arg4: memref<1x32xf32, #tpu.memory_space<vmem>>, %arg5: memref<32x32xf32, #tpu.memory_space<vmem>>, %arg6: memref<1x32xf32, #tpu.memory_space<vmem>>, %arg7: memref<32x32xf32, #tpu.memory_space<vmem>>, %arg8: memref<1x32xf32, #tpu.memory_space<vmem>>, %arg9: memref<32x32xf32, #tpu.memory_space<vmem>>, %arg10: memref<1x32xf32, #tpu.memory_space<vmem>>, %arg11: memref<1x32xf32, #tpu.memory_space<vmem>>, %arg12: memref<1x32xf32, #tpu.memory_space<vmem>>, %arg13: memref<32x32xf32, #tpu.memory_space<vmem>>, %arg14: memref<1x32xf32, #tpu.memory_space<vmem>>, %arg15: memref<32x32xf32, #tpu.memory_space<vmem>>, %arg16: memref<1x32xf32, #tpu.memory_space<vmem>>, %arg17: memref<32x32xf32, #tpu.memory_space<vmem>>, %arg18: memref<1x32xf32, #tpu.memory_space<vmem>>, %arg19: memref<1x32xf32, #tpu.memory_space<vmem>>, %arg20: memref<1x32xf32, #tpu.memory_space<vmem>>, %arg21: memref<32x64xf32, #tpu.memory_space<vmem>>, %arg22: memref<1x64xf32, #tpu.memory_space<vmem>>, %arg23: memref<64x32xf32, #tpu.memory_space<vmem>>, %arg24: memref<1x32xf32, #tpu.memory_space<vmem>>, %arg25: memref<16x32xf32, #tpu.memory_space<vmem>>) attributes {dimension_semantics = [#tpu.dimension_semantics<arbitrary>], iteration_bounds = array<i64: 1>, scalar_prefetch = 0 : i64, scratch_operands = 0 : i64, tpu.core_type = #tpu.core_type<tc>, window_params = [{pipeline_mode = #tpu.pipeline_mode<synchronous>, transform_indices = @transform_0, window_bounds = array<i64: 16, 32>}, {pipeline_mode = #tpu.pipeline_mode<synchronous>, transform_indices = @transform_1, window_bounds = array<i64: 16, 32>}, {pipeline_mode = #tpu.pipeline_mode<synchronous>, transform_indices = @transform_2, window_bounds = array<i64: 1, 32>}, {pipeline_mode = #tpu.pipeline_mode<synchronous>, transform_indices = @transform_3, window_bounds = array<i64: 1, 32>}, {pipeline_mode = #tpu.pipeline_mode<synchronous>, transform_indices = @transform_4, window_bounds = array<i64: 32, 32>}, {pipeline_mode = #tpu.pipeline_mode<synchronous>, transform_indices = @transform_5, window_bounds = array<i64: 1, 32>}, {pipeline_mode = #tpu.pipeline_mode<synchronous>, transform_indices = @transform_6, window_bounds = array<i64: 32, 32>}, {pipeline_mode = #tpu.pipeline_mode<synchronous>, transform_indices = @transform_7, window_bounds = array<i64: 1, 32>}, {pipeline_mode = #tpu.pipeline_mode<synchronous>, transform_indices = @transform_8, window_bounds = array<i64: 32, 32>}, {pipeline_mode = #tpu.pipeline_mode<synchronous>, transform_indices = @transform_9, window_bounds = array<i64: 1, 32>}, {pipeline_mode = #tpu.pipeline_mode<synchronous>, transform_indices = @transform_10, window_bounds = array<i64: 1, 32>}, {pipeline_mode = #tpu.pipeline_mode<synchronous>, transform_indices = @transform_11, window_bounds = array<i64: 1, 32>}, {pipeline_mode = #tpu.pipeline_mode<synchronous>, transform_indices = @transform_12, window_bounds = array<i64: 32, 32>}, {pipeline_mode = #tpu.pipeline_mode<synchronous>, transform_indices = @transform_13, window_bounds = array<i64: 1, 32>}, {pipeline_mode = #tpu.pipeline_mode<synchronous>, transform_indices = @transform_14, window_bounds = array<i64: 32, 32>}, {pipeline_mode = #tpu.pipeline_mode<synchronous>, transform_indices = @transform_15, window_bounds = array<i64: 1, 32>}, {pipeline_mode = #tpu.pipeline_mode<synchronous>, transform_indices = @transform_16, window_bounds = array<i64: 32, 32>}, {pipeline_mode = #tpu.pipeline_mode<synchronous>, transform_indices = @transform_17, window_bounds = array<i64: 1, 32>}, {pipeline_mode = #tpu.pipeline_mode<synchronous>, transform_indices = @transform_18, window_bounds = array<i64: 1, 32>}, {pipeline_mode = #tpu.pipeline_mode<synchronous>, transform_indices = @transform_19, window_bounds = array<i64: 1, 32>}, {pipeline_mode = #tpu.pipeline_mode<synchronous>, transform_indices = @transform_20, window_bounds = array<i64: 32, 64>}, {pipeline_mode = #tpu.pipeline_mode<synchronous>, transform_indices = @transform_21, window_bounds = array<i64: 1, 64>}, {pipeline_mode = #tpu.pipeline_mode<synchronous>, transform_indices = @transform_22, window_bounds = array<i64: 64, 32>}, {pipeline_mode = #tpu.pipeline_mode<synchronous>, transform_indices = @transform_23, window_bounds = array<i64: 1, 32>}, {pipeline_mode = #tpu.pipeline_mode<synchronous>, transform_indices = @transform_24, window_bounds = array<i64: 16, 32>}]} {
    %c0 = arith.constant 0 : index
    %c0_0 = arith.constant 0 : index
    %0 = vector.load %arg1[%c0, %c0_0] : memref<16x32xf32, #tpu.memory_space<vmem>>, vector<8x32xf32>
    %c0_1 = arith.constant 0 : index
    %c0_2 = arith.constant 0 : index
    %1 = vector.load %arg2[%c0_1, %c0_2] : memref<16x32xf32, #tpu.memory_space<vmem>>, vector<8x32xf32>
    %cst = arith.constant dense<0.000000e+00> : vector<8xf32>
    %2 = vector.multi_reduction <add>, %0, %cst [1] : vector<8x32xf32> to vector<8xf32>
    %3 = vector.shape_cast %2 : vector<8xf32> to vector<8x1xf32>
    %cst_3 = arith.constant 3.200000e+01 : f32
    %4 = vector.broadcast %cst_3 : f32 to vector<8x1xf32>
    %5 = arith.divf %3, %4 : vector<8x1xf32>
    %6 = vector.broadcast %5 : vector<8x1xf32> to vector<8x32xf32>
    %7 = arith.subf %0, %6 : vector<8x32xf32>
    %8 = arith.mulf %7, %7 : vector<8x32xf32>
    %cst_4 = arith.constant dense<0.000000e+00> : vector<8xf32>
    %9 = vector.multi_reduction <add>, %8, %cst_4 [1] : vector<8x32xf32> to vector<8xf32>
    %10 = vector.shape_cast %9 : vector<8xf32> to vector<8x1xf32>
    %cst_5 = arith.constant 0.0322580636 : f32
    %11 = vector.broadcast %cst_5 : f32 to vector<8x1xf32>
    %12 = arith.mulf %10, %11 : vector<8x1xf32>
    %13 = math.sqrt %12 : vector<8x1xf32>
    %c0_6 = arith.constant 0 : index
    %c0_7 = arith.constant 0 : index
    %14 = vector.load %arg3[%c0_6, %c0_7] : memref<1x32xf32, #tpu.memory_space<vmem>>, vector<1x32xf32>
    %cst_8 = arith.constant 9.99999997E-7 : f32
    %15 = vector.broadcast %cst_8 : f32 to vector<8x1xf32>
    %16 = arith.addf %13, %15 : vector<8x1xf32>
    %17 = vector.broadcast %16 : vector<8x1xf32> to vector<8x32xf32>
    %18 = arith.divf %7, %17 : vector<8x32xf32>
    %19 = vector.broadcast %14 : vector<1x32xf32> to vector<8x32xf32>
    %20 = arith.mulf %19, %18 : vector<8x32xf32>
    %c0_9 = arith.constant 0 : index
    %c0_10 = arith.constant 0 : index
    %21 = vector.load %arg4[%c0_9, %c0_10] : memref<1x32xf32, #tpu.memory_space<vmem>>, vector<1x32xf32>
    %22 = vector.broadcast %21 : vector<1x32xf32> to vector<8x32xf32>
    %23 = arith.addf %20, %22 : vector<8x32xf32>
    %c0_11 = arith.constant 0 : index
    %c0_12 = arith.constant 0 : index
    %24 = vector.load %arg5[%c0_11, %c0_12] : memref<32x32xf32, #tpu.memory_space<vmem>>, vector<32x32xf32>
    %cst_13 = arith.constant dense<0.000000e+00> : vector<8x32xf32>
    %25 = tpu.matmul %23, %24, %cst_13 {dimension_numbers = #tpu.dot_dimension_numbers<[1], [0], [0], [1], [0, 0, 1, 1], [], []>} : vector<8x32xf32>, vector<32x32xf32>, vector<8x32xf32> -> vector<8x32xf32>
    %c0_14 = arith.constant 0 : index
    %c0_15 = arith.constant 0 : index
    %26 = vector.load %arg6[%c0_14, %c0_15] : memref<1x32xf32, #tpu.memory_space<vmem>>, vector<1x32xf32>
    %27 = vector.broadcast %26 : vector<1x32xf32> to vector<8x32xf32>
    %28 = arith.addf %25, %27 : vector<8x32xf32>
    %c0_16 = arith.constant 0 : index
    %c0_17 = arith.constant 0 : index
    %29 = vector.load %arg7[%c0_16, %c0_17] : memref<32x32xf32, #tpu.memory_space<vmem>>, vector<32x32xf32>
    %cst_18 = arith.constant dense<0.000000e+00> : vector<8x32xf32>
    %30 = tpu.matmul %23, %29, %cst_18 {dimension_numbers = #tpu.dot_dimension_numbers<[1], [0], [0], [1], [0, 0, 1, 1], [], []>} : vector<8x32xf32>, vector<32x32xf32>, vector<8x32xf32> -> vector<8x32xf32>
    %c0_19 = arith.constant 0 : index
    %c0_20 = arith.constant 0 : index
    %31 = vector.load %arg8[%c0_19, %c0_20] : memref<1x32xf32, #tpu.memory_space<vmem>>, vector<1x32xf32>
    %32 = vector.broadcast %31 : vector<1x32xf32> to vector<8x32xf32>
    %33 = arith.addf %30, %32 : vector<8x32xf32>
    %c0_21 = arith.constant 0 : index
    %c0_22 = arith.constant 0 : index
    %34 = vector.load %arg9[%c0_21, %c0_22] : memref<32x32xf32, #tpu.memory_space<vmem>>, vector<32x32xf32>
    %35 = tpu.iota {dimensions = array<i32: 0>} : vector<8x8xi32>
    %36 = tpu.iota {dimensions = array<i32: 1>} : vector<8x8xi32>
    %37 = arith.cmpi sge, %35, %36 : vector<8x8xi32>
    %cst_23 = arith.constant 0.000000e+00 : f32
    %38 = vector.broadcast %cst_23 : f32 to vector<8x32xf32>
    %39 = vector.extract_strided_slice %28 {offsets = [0, 0], sizes = [8, 8], strides = [1, 1]} : vector<8x32xf32> to vector<8x8xf32>
    %40 = vector.extract_strided_slice %33 {offsets = [0, 0], sizes = [8, 8], strides = [1, 1]} : vector<8x32xf32> to vector<8x8xf32>
    %cst_24 = arith.constant dense<0.000000e+00> : vector<8x8xf32>
    %41 = tpu.matmul %39, %40, %cst_24 {dimension_numbers = #tpu.dot_dimension_numbers<[1], [1], [0], [0], [0, 0, 1, 0], [], []>} : vector<8x8xf32>, vector<8x8xf32>, vector<8x8xf32> -> vector<8x8xf32>
    %cst_25 = arith.constant 0.353553385 : f32
    %42 = vector.broadcast %cst_25 : f32 to vector<8x8xf32>
    %43 = arith.mulf %41, %42 : vector<8x8xf32>
    %cst_26 = arith.constant -1.000000e+30 : f32
    %44 = vector.broadcast %cst_26 : f32 to vector<8x8xf32>
    %45 = arith.select %37, %43, %44 : vector<8x8xi1>, vector<8x8xf32>
    %cst_27 = arith.constant dense<0xFF800000> : vector<8xf32>
    %46 = vector.multi_reduction <maximumf>, %45, %cst_27 [1] : vector<8x8xf32> to vector<8xf32>
    %47 = vector.shape_cast %46 : vector<8xf32> to vector<8x1xf32>
    %48 = vector.broadcast %47 : vector<8x1xf32> to vector<8x8xf32>
    %49 = arith.subf %45, %48 : vector<8x8xf32>
    %50 = math.exp %49 : vector<8x8xf32>
    %cst_28 = arith.constant dense<0.000000e+00> : vector<8xf32>
    %51 = vector.multi_reduction <add>, %50, %cst_28 [1] : vector<8x8xf32> to vector<8xf32>
    %52 = vector.shape_cast %51 : vector<8xf32> to vector<8x1xf32>
    %53 = vector.broadcast %52 : vector<8x1xf32> to vector<8x8xf32>
    %54 = arith.divf %50, %53 : vector<8x8xf32>
    %cst_29 = arith.constant dense<0.000000e+00> : vector<8x8xf32>
    %55 = tpu.matmul %54, %40, %cst_29 {dimension_numbers = #tpu.dot_dimension_numbers<[1], [0], [0], [1], [0, 0, 1, 1], [], []>} : vector<8x8xf32>, vector<8x8xf32>, vector<8x8xf32> -> vector<8x8xf32>
    %56 = vector.extract_strided_slice %34 {offsets = [0, 0], sizes = [8, 32], strides = [1, 1]} : vector<32x32xf32> to vector<8x32xf32>
    %cst_30 = arith.constant dense<0.000000e+00> : vector<8x32xf32>
    %57 = tpu.matmul %55, %56, %cst_30 {dimension_numbers = #tpu.dot_dimension_numbers<[1], [0], [0], [1], [0, 0, 1, 1], [], []>} : vector<8x8xf32>, vector<8x32xf32>, vector<8x32xf32> -> vector<8x32xf32>
    %58 = arith.addf %38, %57 : vector<8x32xf32>
    %59 = vector.extract_strided_slice %28 {offsets = [0, 8], sizes = [8, 8], strides = [1, 1]} : vector<8x32xf32> to vector<8x8xf32>
    %60 = vector.extract_strided_slice %33 {offsets = [0, 8], sizes = [8, 8], strides = [1, 1]} : vector<8x32xf32> to vector<8x8xf32>
    %cst_31 = arith.constant dense<0.000000e+00> : vector<8x8xf32>
    %61 = tpu.matmul %59, %60, %cst_31 {dimension_numbers = #tpu.dot_dimension_numbers<[1], [1], [0], [0], [0, 0, 1, 0], [], []>} : vector<8x8xf32>, vector<8x8xf32>, vector<8x8xf32> -> vector<8x8xf32>
    %cst_32 = arith.constant 0.353553385 : f32
    %62 = vector.broadcast %cst_32 : f32 to vector<8x8xf32>
    %63 = arith.mulf %61, %62 : vector<8x8xf32>
    %cst_33 = arith.constant -1.000000e+30 : f32
    %64 = vector.broadcast %cst_33 : f32 to vector<8x8xf32>
    %65 = arith.select %37, %63, %64 : vector<8x8xi1>, vector<8x8xf32>
    %cst_34 = arith.constant dense<0xFF800000> : vector<8xf32>
    %66 = vector.multi_reduction <maximumf>, %65, %cst_34 [1] : vector<8x8xf32> to vector<8xf32>
    %67 = vector.shape_cast %66 : vector<8xf32> to vector<8x1xf32>
    %68 = vector.broadcast %67 : vector<8x1xf32> to vector<8x8xf32>
    %69 = arith.subf %65, %68 : vector<8x8xf32>
    %70 = math.exp %69 : vector<8x8xf32>
    %cst_35 = arith.constant dense<0.000000e+00> : vector<8xf32>
    %71 = vector.multi_reduction <add>, %70, %cst_35 [1] : vector<8x8xf32> to vector<8xf32>
    %72 = vector.shape_cast %71 : vector<8xf32> to vector<8x1xf32>
    %73 = vector.broadcast %72 : vector<8x1xf32> to vector<8x8xf32>
    %74 = arith.divf %70, %73 : vector<8x8xf32>
    %cst_36 = arith.constant dense<0.000000e+00> : vector<8x8xf32>
    %75 = tpu.matmul %74, %60, %cst_36 {dimension_numbers = #tpu.dot_dimension_numbers<[1], [0], [0], [1], [0, 0, 1, 1], [], []>} : vector<8x8xf32>, vector<8x8xf32>, vector<8x8xf32> -> vector<8x8xf32>
    %76 = vector.extract_strided_slice %34 {offsets = [8, 0], sizes = [8, 32], strides = [1, 1]} : vector<32x32xf32> to vector<8x32xf32>
    %cst_37 = arith.constant dense<0.000000e+00> : vector<8x32xf32>
    %77 = tpu.matmul %75, %76, %cst_37 {dimension_numbers = #tpu.dot_dimension_numbers<[1], [0], [0], [1], [0, 0, 1, 1], [], []>} : vector<8x8xf32>, vector<8x32xf32>, vector<8x32xf32> -> vector<8x32xf32>
    %78 = arith.addf %58, %77 : vector<8x32xf32>
    %79 = vector.extract_strided_slice %28 {offsets = [0, 16], sizes = [8, 8], strides = [1, 1]} : vector<8x32xf32> to vector<8x8xf32>
    %80 = vector.extract_strided_slice %33 {offsets = [0, 16], sizes = [8, 8], strides = [1, 1]} : vector<8x32xf32> to vector<8x8xf32>
    %cst_38 = arith.constant dense<0.000000e+00> : vector<8x8xf32>
    %81 = tpu.matmul %79, %80, %cst_38 {dimension_numbers = #tpu.dot_dimension_numbers<[1], [1], [0], [0], [0, 0, 1, 0], [], []>} : vector<8x8xf32>, vector<8x8xf32>, vector<8x8xf32> -> vector<8x8xf32>
    %cst_39 = arith.constant 0.353553385 : f32
    %82 = vector.broadcast %cst_39 : f32 to vector<8x8xf32>
    %83 = arith.mulf %81, %82 : vector<8x8xf32>
    %cst_40 = arith.constant -1.000000e+30 : f32
    %84 = vector.broadcast %cst_40 : f32 to vector<8x8xf32>
    %85 = arith.select %37, %83, %84 : vector<8x8xi1>, vector<8x8xf32>
    %cst_41 = arith.constant dense<0xFF800000> : vector<8xf32>
    %86 = vector.multi_reduction <maximumf>, %85, %cst_41 [1] : vector<8x8xf32> to vector<8xf32>
    %87 = vector.shape_cast %86 : vector<8xf32> to vector<8x1xf32>
    %88 = vector.broadcast %87 : vector<8x1xf32> to vector<8x8xf32>
    %89 = arith.subf %85, %88 : vector<8x8xf32>
    %90 = math.exp %89 : vector<8x8xf32>
    %cst_42 = arith.constant dense<0.000000e+00> : vector<8xf32>
    %91 = vector.multi_reduction <add>, %90, %cst_42 [1] : vector<8x8xf32> to vector<8xf32>
    %92 = vector.shape_cast %91 : vector<8xf32> to vector<8x1xf32>
    %93 = vector.broadcast %92 : vector<8x1xf32> to vector<8x8xf32>
    %94 = arith.divf %90, %93 : vector<8x8xf32>
    %cst_43 = arith.constant dense<0.000000e+00> : vector<8x8xf32>
    %95 = tpu.matmul %94, %80, %cst_43 {dimension_numbers = #tpu.dot_dimension_numbers<[1], [0], [0], [1], [0, 0, 1, 1], [], []>} : vector<8x8xf32>, vector<8x8xf32>, vector<8x8xf32> -> vector<8x8xf32>
    %96 = vector.extract_strided_slice %34 {offsets = [16, 0], sizes = [8, 32], strides = [1, 1]} : vector<32x32xf32> to vector<8x32xf32>
    %cst_44 = arith.constant dense<0.000000e+00> : vector<8x32xf32>
    %97 = tpu.matmul %95, %96, %cst_44 {dimension_numbers = #tpu.dot_dimension_numbers<[1], [0], [0], [1], [0, 0, 1, 1], [], []>} : vector<8x8xf32>, vector<8x32xf32>, vector<8x32xf32> -> vector<8x32xf32>
    %98 = arith.addf %78, %97 : vector<8x32xf32>
    %99 = vector.extract_strided_slice %28 {offsets = [0, 24], sizes = [8, 8], strides = [1, 1]} : vector<8x32xf32> to vector<8x8xf32>
    %100 = vector.extract_strided_slice %33 {offsets = [0, 24], sizes = [8, 8], strides = [1, 1]} : vector<8x32xf32> to vector<8x8xf32>
    %cst_45 = arith.constant dense<0.000000e+00> : vector<8x8xf32>
    %101 = tpu.matmul %99, %100, %cst_45 {dimension_numbers = #tpu.dot_dimension_numbers<[1], [1], [0], [0], [0, 0, 1, 0], [], []>} : vector<8x8xf32>, vector<8x8xf32>, vector<8x8xf32> -> vector<8x8xf32>
    %cst_46 = arith.constant 0.353553385 : f32
    %102 = vector.broadcast %cst_46 : f32 to vector<8x8xf32>
    %103 = arith.mulf %101, %102 : vector<8x8xf32>
    %cst_47 = arith.constant -1.000000e+30 : f32
    %104 = vector.broadcast %cst_47 : f32 to vector<8x8xf32>
    %105 = arith.select %37, %103, %104 : vector<8x8xi1>, vector<8x8xf32>
    %cst_48 = arith.constant dense<0xFF800000> : vector<8xf32>
    %106 = vector.multi_reduction <maximumf>, %105, %cst_48 [1] : vector<8x8xf32> to vector<8xf32>
    %107 = vector.shape_cast %106 : vector<8xf32> to vector<8x1xf32>
    %108 = vector.broadcast %107 : vector<8x1xf32> to vector<8x8xf32>
    %109 = arith.subf %105, %108 : vector<8x8xf32>
    %110 = math.exp %109 : vector<8x8xf32>
    %cst_49 = arith.constant dense<0.000000e+00> : vector<8xf32>
    %111 = vector.multi_reduction <add>, %110, %cst_49 [1] : vector<8x8xf32> to vector<8xf32>
    %112 = vector.shape_cast %111 : vector<8xf32> to vector<8x1xf32>
    %113 = vector.broadcast %112 : vector<8x1xf32> to vector<8x8xf32>
    %114 = arith.divf %110, %113 : vector<8x8xf32>
    %cst_50 = arith.constant dense<0.000000e+00> : vector<8x8xf32>
    %115 = tpu.matmul %114, %100, %cst_50 {dimension_numbers = #tpu.dot_dimension_numbers<[1], [0], [0], [1], [0, 0, 1, 1], [], []>} : vector<8x8xf32>, vector<8x8xf32>, vector<8x8xf32> -> vector<8x8xf32>
    %116 = vector.extract_strided_slice %34 {offsets = [24, 0], sizes = [8, 32], strides = [1, 1]} : vector<32x32xf32> to vector<8x32xf32>
    %cst_51 = arith.constant dense<0.000000e+00> : vector<8x32xf32>
    %117 = tpu.matmul %115, %116, %cst_51 {dimension_numbers = #tpu.dot_dimension_numbers<[1], [0], [0], [1], [0, 0, 1, 1], [], []>} : vector<8x8xf32>, vector<8x32xf32>, vector<8x32xf32> -> vector<8x32xf32>
    %118 = arith.addf %98, %117 : vector<8x32xf32>
    %c0_52 = arith.constant 0 : index
    %c0_53 = arith.constant 0 : index
    %119 = vector.load %arg10[%c0_52, %c0_53] : memref<1x32xf32, #tpu.memory_space<vmem>>, vector<1x32xf32>
    %120 = vector.broadcast %119 : vector<1x32xf32> to vector<8x32xf32>
    %121 = arith.addf %118, %120 : vector<8x32xf32>
    %122 = arith.addf %0, %121 : vector<8x32xf32>
    %cst_54 = arith.constant dense<0.000000e+00> : vector<8xf32>
    %123 = vector.multi_reduction <add>, %122, %cst_54 [1] : vector<8x32xf32> to vector<8xf32>
    %124 = vector.shape_cast %123 : vector<8xf32> to vector<8x1xf32>
    %cst_55 = arith.constant 3.200000e+01 : f32
    %125 = vector.broadcast %cst_55 : f32 to vector<8x1xf32>
    %126 = arith.divf %124, %125 : vector<8x1xf32>
    %127 = vector.broadcast %126 : vector<8x1xf32> to vector<8x32xf32>
    %128 = arith.subf %122, %127 : vector<8x32xf32>
    %129 = arith.mulf %128, %128 : vector<8x32xf32>
    %cst_56 = arith.constant dense<0.000000e+00> : vector<8xf32>
    %130 = vector.multi_reduction <add>, %129, %cst_56 [1] : vector<8x32xf32> to vector<8xf32>
    %131 = vector.shape_cast %130 : vector<8xf32> to vector<8x1xf32>
    %cst_57 = arith.constant 0.0322580636 : f32
    %132 = vector.broadcast %cst_57 : f32 to vector<8x1xf32>
    %133 = arith.mulf %131, %132 : vector<8x1xf32>
    %134 = math.sqrt %133 : vector<8x1xf32>
    %c0_58 = arith.constant 0 : index
    %c0_59 = arith.constant 0 : index
    %135 = vector.load %arg11[%c0_58, %c0_59] : memref<1x32xf32, #tpu.memory_space<vmem>>, vector<1x32xf32>
    %cst_60 = arith.constant 9.99999997E-7 : f32
    %136 = vector.broadcast %cst_60 : f32 to vector<8x1xf32>
    %137 = arith.addf %134, %136 : vector<8x1xf32>
    %138 = vector.broadcast %137 : vector<8x1xf32> to vector<8x32xf32>
    %139 = arith.divf %128, %138 : vector<8x32xf32>
    %140 = vector.broadcast %135 : vector<1x32xf32> to vector<8x32xf32>
    %141 = arith.mulf %140, %139 : vector<8x32xf32>
    %c0_61 = arith.constant 0 : index
    %c0_62 = arith.constant 0 : index
    %142 = vector.load %arg12[%c0_61, %c0_62] : memref<1x32xf32, #tpu.memory_space<vmem>>, vector<1x32xf32>
    %143 = vector.broadcast %142 : vector<1x32xf32> to vector<8x32xf32>
    %144 = arith.addf %141, %143 : vector<8x32xf32>
    %c0_63 = arith.constant 0 : index
    %c0_64 = arith.constant 0 : index
    %145 = vector.load %arg13[%c0_63, %c0_64] : memref<32x32xf32, #tpu.memory_space<vmem>>, vector<32x32xf32>
    %cst_65 = arith.constant dense<0.000000e+00> : vector<8x32xf32>
    %146 = tpu.matmul %144, %145, %cst_65 {dimension_numbers = #tpu.dot_dimension_numbers<[1], [0], [0], [1], [0, 0, 1, 1], [], []>} : vector<8x32xf32>, vector<32x32xf32>, vector<8x32xf32> -> vector<8x32xf32>
    %c0_66 = arith.constant 0 : index
    %c0_67 = arith.constant 0 : index
    %147 = vector.load %arg14[%c0_66, %c0_67] : memref<1x32xf32, #tpu.memory_space<vmem>>, vector<1x32xf32>
    %148 = vector.broadcast %147 : vector<1x32xf32> to vector<8x32xf32>
    %149 = arith.addf %146, %148 : vector<8x32xf32>
    %c0_68 = arith.constant 0 : index
    %c0_69 = arith.constant 0 : index
    %150 = vector.load %arg15[%c0_68, %c0_69] : memref<32x32xf32, #tpu.memory_space<vmem>>, vector<32x32xf32>
    %cst_70 = arith.constant dense<0.000000e+00> : vector<8x32xf32>
    %151 = tpu.matmul %1, %150, %cst_70 {dimension_numbers = #tpu.dot_dimension_numbers<[1], [0], [0], [1], [0, 0, 1, 1], [], []>} : vector<8x32xf32>, vector<32x32xf32>, vector<8x32xf32> -> vector<8x32xf32>
    %c0_71 = arith.constant 0 : index
    %c0_72 = arith.constant 0 : index
    %152 = vector.load %arg16[%c0_71, %c0_72] : memref<1x32xf32, #tpu.memory_space<vmem>>, vector<1x32xf32>
    %153 = vector.broadcast %152 : vector<1x32xf32> to vector<8x32xf32>
    %154 = arith.addf %151, %153 : vector<8x32xf32>
    %c0_73 = arith.constant 0 : index
    %c0_74 = arith.constant 0 : index
    %155 = vector.load %arg17[%c0_73, %c0_74] : memref<32x32xf32, #tpu.memory_space<vmem>>, vector<32x32xf32>
    %cst_75 = arith.constant 0.000000e+00 : f32
    %156 = vector.broadcast %cst_75 : f32 to vector<8x32xf32>
    %157 = vector.extract_strided_slice %149 {offsets = [0, 0], sizes = [8, 8], strides = [1, 1]} : vector<8x32xf32> to vector<8x8xf32>
    %158 = vector.extract_strided_slice %154 {offsets = [0, 0], sizes = [8, 8], strides = [1, 1]} : vector<8x32xf32> to vector<8x8xf32>
    %cst_76 = arith.constant dense<0.000000e+00> : vector<8x8xf32>
    %159 = tpu.matmul %157, %158, %cst_76 {dimension_numbers = #tpu.dot_dimension_numbers<[1], [1], [0], [0], [0, 0, 1, 0], [], []>} : vector<8x8xf32>, vector<8x8xf32>, vector<8x8xf32> -> vector<8x8xf32>
    %cst_77 = arith.constant 0.353553385 : f32
    %160 = vector.broadcast %cst_77 : f32 to vector<8x8xf32>
    %161 = arith.mulf %159, %160 : vector<8x8xf32>
    %cst_78 = arith.constant dense<0xFF800000> : vector<8xf32>
    %162 = vector.multi_reduction <maximumf>, %161, %cst_78 [1] : vector<8x8xf32> to vector<8xf32>
    %163 = vector.shape_cast %162 : vector<8xf32> to vector<8x1xf32>
    %164 = vector.broadcast %163 : vector<8x1xf32> to vector<8x8xf32>
    %165 = arith.subf %161, %164 : vector<8x8xf32>
    %166 = math.exp %165 : vector<8x8xf32>
    %cst_79 = arith.constant dense<0.000000e+00> : vector<8xf32>
    %167 = vector.multi_reduction <add>, %166, %cst_79 [1] : vector<8x8xf32> to vector<8xf32>
    %168 = vector.shape_cast %167 : vector<8xf32> to vector<8x1xf32>
    %169 = vector.broadcast %168 : vector<8x1xf32> to vector<8x8xf32>
    %170 = arith.divf %166, %169 : vector<8x8xf32>
    %cst_80 = arith.constant dense<0.000000e+00> : vector<8x8xf32>
    %171 = tpu.matmul %170, %158, %cst_80 {dimension_numbers = #tpu.dot_dimension_numbers<[1], [0], [0], [1], [0, 0, 1, 1], [], []>} : vector<8x8xf32>, vector<8x8xf32>, vector<8x8xf32> -> vector<8x8xf32>
    %172 = vector.extract_strided_slice %155 {offsets = [0, 0], sizes = [8, 32], strides = [1, 1]} : vector<32x32xf32> to vector<8x32xf32>
    %cst_81 = arith.constant dense<0.000000e+00> : vector<8x32xf32>
    %173 = tpu.matmul %171, %172, %cst_81 {dimension_numbers = #tpu.dot_dimension_numbers<[1], [0], [0], [1], [0, 0, 1, 1], [], []>} : vector<8x8xf32>, vector<8x32xf32>, vector<8x32xf32> -> vector<8x32xf32>
    %174 = arith.addf %156, %173 : vector<8x32xf32>
    %175 = vector.extract_strided_slice %149 {offsets = [0, 8], sizes = [8, 8], strides = [1, 1]} : vector<8x32xf32> to vector<8x8xf32>
    %176 = vector.extract_strided_slice %154 {offsets = [0, 8], sizes = [8, 8], strides = [1, 1]} : vector<8x32xf32> to vector<8x8xf32>
    %cst_82 = arith.constant dense<0.000000e+00> : vector<8x8xf32>
    %177 = tpu.matmul %175, %176, %cst_82 {dimension_numbers = #tpu.dot_dimension_numbers<[1], [1], [0], [0], [0, 0, 1, 0], [], []>} : vector<8x8xf32>, vector<8x8xf32>, vector<8x8xf32> -> vector<8x8xf32>
    %cst_83 = arith.constant 0.353553385 : f32
    %178 = vector.broadcast %cst_83 : f32 to vector<8x8xf32>
    %179 = arith.mulf %177, %178 : vector<8x8xf32>
    %cst_84 = arith.constant dense<0xFF800000> : vector<8xf32>
    %180 = vector.multi_reduction <maximumf>, %179, %cst_84 [1] : vector<8x8xf32> to vector<8xf32>
    %181 = vector.shape_cast %180 : vector<8xf32> to vector<8x1xf32>
    %182 = vector.broadcast %181 : vector<8x1xf32> to vector<8x8xf32>
    %183 = arith.subf %179, %182 : vector<8x8xf32>
    %184 = math.exp %183 : vector<8x8xf32>
    %cst_85 = arith.constant dense<0.000000e+00> : vector<8xf32>
    %185 = vector.multi_reduction <add>, %184, %cst_85 [1] : vector<8x8xf32> to vector<8xf32>
    %186 = vector.shape_cast %185 : vector<8xf32> to vector<8x1xf32>
    %187 = vector.broadcast %186 : vector<8x1xf32> to vector<8x8xf32>
    %188 = arith.divf %184, %187 : vector<8x8xf32>
    %cst_86 = arith.constant dense<0.000000e+00> : vector<8x8xf32>
    %189 = tpu.matmul %188, %176, %cst_86 {dimension_numbers = #tpu.dot_dimension_numbers<[1], [0], [0], [1], [0, 0, 1, 1], [], []>} : vector<8x8xf32>, vector<8x8xf32>, vector<8x8xf32> -> vector<8x8xf32>
    %190 = vector.extract_strided_slice %155 {offsets = [8, 0], sizes = [8, 32], strides = [1, 1]} : vector<32x32xf32> to vector<8x32xf32>
    %cst_87 = arith.constant dense<0.000000e+00> : vector<8x32xf32>
    %191 = tpu.matmul %189, %190, %cst_87 {dimension_numbers = #tpu.dot_dimension_numbers<[1], [0], [0], [1], [0, 0, 1, 1], [], []>} : vector<8x8xf32>, vector<8x32xf32>, vector<8x32xf32> -> vector<8x32xf32>
    %192 = arith.addf %174, %191 : vector<8x32xf32>
    %193 = vector.extract_strided_slice %149 {offsets = [0, 16], sizes = [8, 8], strides = [1, 1]} : vector<8x32xf32> to vector<8x8xf32>
    %194 = vector.extract_strided_slice %154 {offsets = [0, 16], sizes = [8, 8], strides = [1, 1]} : vector<8x32xf32> to vector<8x8xf32>
    %cst_88 = arith.constant dense<0.000000e+00> : vector<8x8xf32>
    %195 = tpu.matmul %193, %194, %cst_88 {dimension_numbers = #tpu.dot_dimension_numbers<[1], [1], [0], [0], [0, 0, 1, 0], [], []>} : vector<8x8xf32>, vector<8x8xf32>, vector<8x8xf32> -> vector<8x8xf32>
    %cst_89 = arith.constant 0.353553385 : f32
    %196 = vector.broadcast %cst_89 : f32 to vector<8x8xf32>
    %197 = arith.mulf %195, %196 : vector<8x8xf32>
    %cst_90 = arith.constant dense<0xFF800000> : vector<8xf32>
    %198 = vector.multi_reduction <maximumf>, %197, %cst_90 [1] : vector<8x8xf32> to vector<8xf32>
    %199 = vector.shape_cast %198 : vector<8xf32> to vector<8x1xf32>
    %200 = vector.broadcast %199 : vector<8x1xf32> to vector<8x8xf32>
    %201 = arith.subf %197, %200 : vector<8x8xf32>
    %202 = math.exp %201 : vector<8x8xf32>
    %cst_91 = arith.constant dense<0.000000e+00> : vector<8xf32>
    %203 = vector.multi_reduction <add>, %202, %cst_91 [1] : vector<8x8xf32> to vector<8xf32>
    %204 = vector.shape_cast %203 : vector<8xf32> to vector<8x1xf32>
    %205 = vector.broadcast %204 : vector<8x1xf32> to vector<8x8xf32>
    %206 = arith.divf %202, %205 : vector<8x8xf32>
    %cst_92 = arith.constant dense<0.000000e+00> : vector<8x8xf32>
    %207 = tpu.matmul %206, %194, %cst_92 {dimension_numbers = #tpu.dot_dimension_numbers<[1], [0], [0], [1], [0, 0, 1, 1], [], []>} : vector<8x8xf32>, vector<8x8xf32>, vector<8x8xf32> -> vector<8x8xf32>
    %208 = vector.extract_strided_slice %155 {offsets = [16, 0], sizes = [8, 32], strides = [1, 1]} : vector<32x32xf32> to vector<8x32xf32>
    %cst_93 = arith.constant dense<0.000000e+00> : vector<8x32xf32>
    %209 = tpu.matmul %207, %208, %cst_93 {dimension_numbers = #tpu.dot_dimension_numbers<[1], [0], [0], [1], [0, 0, 1, 1], [], []>} : vector<8x8xf32>, vector<8x32xf32>, vector<8x32xf32> -> vector<8x32xf32>
    %210 = arith.addf %192, %209 : vector<8x32xf32>
    %211 = vector.extract_strided_slice %149 {offsets = [0, 24], sizes = [8, 8], strides = [1, 1]} : vector<8x32xf32> to vector<8x8xf32>
    %212 = vector.extract_strided_slice %154 {offsets = [0, 24], sizes = [8, 8], strides = [1, 1]} : vector<8x32xf32> to vector<8x8xf32>
    %cst_94 = arith.constant dense<0.000000e+00> : vector<8x8xf32>
    %213 = tpu.matmul %211, %212, %cst_94 {dimension_numbers = #tpu.dot_dimension_numbers<[1], [1], [0], [0], [0, 0, 1, 0], [], []>} : vector<8x8xf32>, vector<8x8xf32>, vector<8x8xf32> -> vector<8x8xf32>
    %cst_95 = arith.constant 0.353553385 : f32
    %214 = vector.broadcast %cst_95 : f32 to vector<8x8xf32>
    %215 = arith.mulf %213, %214 : vector<8x8xf32>
    %cst_96 = arith.constant dense<0xFF800000> : vector<8xf32>
    %216 = vector.multi_reduction <maximumf>, %215, %cst_96 [1] : vector<8x8xf32> to vector<8xf32>
    %217 = vector.shape_cast %216 : vector<8xf32> to vector<8x1xf32>
    %218 = vector.broadcast %217 : vector<8x1xf32> to vector<8x8xf32>
    %219 = arith.subf %215, %218 : vector<8x8xf32>
    %220 = math.exp %219 : vector<8x8xf32>
    %cst_97 = arith.constant dense<0.000000e+00> : vector<8xf32>
    %221 = vector.multi_reduction <add>, %220, %cst_97 [1] : vector<8x8xf32> to vector<8xf32>
    %222 = vector.shape_cast %221 : vector<8xf32> to vector<8x1xf32>
    %223 = vector.broadcast %222 : vector<8x1xf32> to vector<8x8xf32>
    %224 = arith.divf %220, %223 : vector<8x8xf32>
    %cst_98 = arith.constant dense<0.000000e+00> : vector<8x8xf32>
    %225 = tpu.matmul %224, %212, %cst_98 {dimension_numbers = #tpu.dot_dimension_numbers<[1], [0], [0], [1], [0, 0, 1, 1], [], []>} : vector<8x8xf32>, vector<8x8xf32>, vector<8x8xf32> -> vector<8x8xf32>
    %226 = vector.extract_strided_slice %155 {offsets = [24, 0], sizes = [8, 32], strides = [1, 1]} : vector<32x32xf32> to vector<8x32xf32>
    %cst_99 = arith.constant dense<0.000000e+00> : vector<8x32xf32>
    %227 = tpu.matmul %225, %226, %cst_99 {dimension_numbers = #tpu.dot_dimension_numbers<[1], [0], [0], [1], [0, 0, 1, 1], [], []>} : vector<8x8xf32>, vector<8x32xf32>, vector<8x32xf32> -> vector<8x32xf32>
    %228 = arith.addf %210, %227 : vector<8x32xf32>
    %c0_100 = arith.constant 0 : index
    %c0_101 = arith.constant 0 : index
    %229 = vector.load %arg18[%c0_100, %c0_101] : memref<1x32xf32, #tpu.memory_space<vmem>>, vector<1x32xf32>
    %230 = vector.broadcast %229 : vector<1x32xf32> to vector<8x32xf32>
    %231 = arith.addf %228, %230 : vector<8x32xf32>
    %232 = arith.addf %122, %231 : vector<8x32xf32>
    %cst_102 = arith.constant dense<0.000000e+00> : vector<8xf32>
    %233 = vector.multi_reduction <add>, %232, %cst_102 [1] : vector<8x32xf32> to vector<8xf32>
    %234 = vector.shape_cast %233 : vector<8xf32> to vector<8x1xf32>
    %cst_103 = arith.constant 3.200000e+01 : f32
    %235 = vector.broadcast %cst_103 : f32 to vector<8x1xf32>
    %236 = arith.divf %234, %235 : vector<8x1xf32>
    %237 = vector.broadcast %236 : vector<8x1xf32> to vector<8x32xf32>
    %238 = arith.subf %232, %237 : vector<8x32xf32>
    %239 = arith.mulf %238, %238 : vector<8x32xf32>
    %cst_104 = arith.constant dense<0.000000e+00> : vector<8xf32>
    %240 = vector.multi_reduction <add>, %239, %cst_104 [1] : vector<8x32xf32> to vector<8xf32>
    %241 = vector.shape_cast %240 : vector<8xf32> to vector<8x1xf32>
    %cst_105 = arith.constant 0.0322580636 : f32
    %242 = vector.broadcast %cst_105 : f32 to vector<8x1xf32>
    %243 = arith.mulf %241, %242 : vector<8x1xf32>
    %244 = math.sqrt %243 : vector<8x1xf32>
    %c0_106 = arith.constant 0 : index
    %c0_107 = arith.constant 0 : index
    %245 = vector.load %arg19[%c0_106, %c0_107] : memref<1x32xf32, #tpu.memory_space<vmem>>, vector<1x32xf32>
    %cst_108 = arith.constant 9.99999997E-7 : f32
    %246 = vector.broadcast %cst_108 : f32 to vector<8x1xf32>
    %247 = arith.addf %244, %246 : vector<8x1xf32>
    %248 = vector.broadcast %247 : vector<8x1xf32> to vector<8x32xf32>
    %249 = arith.divf %238, %248 : vector<8x32xf32>
    %250 = vector.broadcast %245 : vector<1x32xf32> to vector<8x32xf32>
    %251 = arith.mulf %250, %249 : vector<8x32xf32>
    %c0_109 = arith.constant 0 : index
    %c0_110 = arith.constant 0 : index
    %252 = vector.load %arg20[%c0_109, %c0_110] : memref<1x32xf32, #tpu.memory_space<vmem>>, vector<1x32xf32>
    %253 = vector.broadcast %252 : vector<1x32xf32> to vector<8x32xf32>
    %254 = arith.addf %251, %253 : vector<8x32xf32>
    %c0_111 = arith.constant 0 : index
    %c0_112 = arith.constant 0 : index
    %255 = vector.load %arg21[%c0_111, %c0_112] : memref<32x64xf32, #tpu.memory_space<vmem>>, vector<32x64xf32>
    %cst_113 = arith.constant dense<0.000000e+00> : vector<8x64xf32>
    %256 = tpu.matmul %254, %255, %cst_113 {dimension_numbers = #tpu.dot_dimension_numbers<[1], [0], [0], [1], [0, 0, 1, 1], [], []>} : vector<8x32xf32>, vector<32x64xf32>, vector<8x64xf32> -> vector<8x64xf32>
    %c0_114 = arith.constant 0 : index
    %c0_115 = arith.constant 0 : index
    %257 = vector.load %arg22[%c0_114, %c0_115] : memref<1x64xf32, #tpu.memory_space<vmem>>, vector<1x64xf32>
    %258 = vector.broadcast %257 : vector<1x64xf32> to vector<8x64xf32>
    %259 = arith.addf %256, %258 : vector<8x64xf32>
    %cst_116 = arith.constant 0.000000e+00 : f32
    %260 = vector.broadcast %cst_116 : f32 to vector<8x64xf32>
    %261 = arith.maximumf %259, %260 : vector<8x64xf32>
    %c0_117 = arith.constant 0 : index
    %c0_118 = arith.constant 0 : index
    %262 = vector.load %arg23[%c0_117, %c0_118] : memref<64x32xf32, #tpu.memory_space<vmem>>, vector<64x32xf32>
    %cst_119 = arith.constant dense<0.000000e+00> : vector<8x32xf32>
    %263 = tpu.matmul %261, %262, %cst_119 {dimension_numbers = #tpu.dot_dimension_numbers<[1], [0], [0], [1], [0, 0, 1, 1], [], []>} : vector<8x64xf32>, vector<64x32xf32>, vector<8x32xf32> -> vector<8x32xf32>
    %c0_120 = arith.constant 0 : index
    %c0_121 = arith.constant 0 : index
    %264 = vector.load %arg24[%c0_120, %c0_121] : memref<1x32xf32, #tpu.memory_space<vmem>>, vector<1x32xf32>
    %265 = vector.broadcast %264 : vector<1x32xf32> to vector<8x32xf32>
    %266 = arith.addf %263, %265 : vector<8x32xf32>
    %267 = arith.addf %232, %266 : vector<8x32xf32>
    %c0_122 = arith.constant 0 : index
    %c0_123 = arith.constant 0 : index
    %268 = vector.load %arg25[%c0_122, %c0_123] : memref<16x32xf32, #tpu.memory_space<vmem>>, vector<8x32xf32>
    tpu.vector_store %arg25[%c0_122, %c0_123], %267 {strides = array<i32>} : memref<16x32xf32, #tpu.memory_space<vmem>>, vector<8x32xf32>,
    %c8 = arith.constant 8 : index
    %c0_124 = arith.constant 0 : index
    %269 = vector.load %arg1[%c8, %c0_124] : memref<16x32xf32, #tpu.memory_space<vmem>>, vector<8x32xf32>
    %c8_125 = arith.constant 8 : index
    %c0_126 = arith.constant 0 : index
    %270 = vector.load %arg2[%c8_125, %c0_126] : memref<16x32xf32, #tpu.memory_space<vmem>>, vector<8x32xf32>
    %cst_127 = arith.constant dense<0.000000e+00> : vector<8xf32>
    %271 = vector.multi_reduction <add>, %269, %cst_127 [1] : vector<8x32xf32> to vector<8xf32>
    %272 = vector.shape_cast %271 : vector<8xf32> to vector<8x1xf32>
    %cst_128 = arith.constant 3.200000e+01 : f32
    %273 = vector.broadcast %cst_128 : f32 to vector<8x1xf32>
    %274 = arith.divf %272, %273 : vector<8x1xf32>
    %275 = vector.broadcast %274 : vector<8x1xf32> to vector<8x32xf32>
    %276 = arith.subf %269, %275 : vector<8x32xf32>
    %277 = arith.mulf %276, %276 : vector<8x32xf32>
    %cst_129 = arith.constant dense<0.000000e+00> : vector<8xf32>
    %278 = vector.multi_reduction <add>, %277, %cst_129 [1] : vector<8x32xf32> to vector<8xf32>
    %279 = vector.shape_cast %278 : vector<8xf32> to vector<8x1xf32>
    %cst_130 = arith.constant 0.0322580636 : f32
    %280 = vector.broadcast %cst_130 : f32 to vector<8x1xf32>
    %281 = arith.mulf %279, %280 : vector<8x1xf32>
    %282 = math.sqrt %281 : vector<8x1xf32>
    %c0_131 = arith.constant 0 : index
    %c0_132 = arith.constant 0 : index
    %283 = vector.load %arg3[%c0_131, %c0_132] : memref<1x32xf32, #tpu.memory_space<vmem>>, vector<1x32xf32>
    %cst_133 = arith.constant 9.99999997E-7 : f32
    %284 = vector.broadcast %cst_133 : f32 to vector<8x1xf32>
    %285 = arith.addf %282, %284 : vector<8x1xf32>
    %286 = vector.broadcast %285 : vector<8x1xf32> to vector<8x32xf32>
    %287 = arith.divf %276, %286 : vector<8x32xf32>
    %288 = vector.broadcast %283 : vector<1x32xf32> to vector<8x32xf32>
    %289 = arith.mulf %288, %287 : vector<8x32xf32>
    %c0_134 = arith.constant 0 : index
    %c0_135 = arith.constant 0 : index
    %290 = vector.load %arg4[%c0_134, %c0_135] : memref<1x32xf32, #tpu.memory_space<vmem>>, vector<1x32xf32>
    %291 = vector.broadcast %290 : vector<1x32xf32> to vector<8x32xf32>
    %292 = arith.addf %289, %291 : vector<8x32xf32>
    %c0_136 = arith.constant 0 : index
    %c0_137 = arith.constant 0 : index
    %293 = vector.load %arg5[%c0_136, %c0_137] : memref<32x32xf32, #tpu.memory_space<vmem>>, vector<32x32xf32>
    %cst_138 = arith.constant dense<0.000000e+00> : vector<8x32xf32>
    %294 = tpu.matmul %292, %293, %cst_138 {dimension_numbers = #tpu.dot_dimension_numbers<[1], [0], [0], [1], [0, 0, 1, 1], [], []>} : vector<8x32xf32>, vector<32x32xf32>, vector<8x32xf32> -> vector<8x32xf32>
    %c0_139 = arith.constant 0 : index
    %c0_140 = arith.constant 0 : index
    %295 = vector.load %arg6[%c0_139, %c0_140] : memref<1x32xf32, #tpu.memory_space<vmem>>, vector<1x32xf32>
    %296 = vector.broadcast %295 : vector<1x32xf32> to vector<8x32xf32>
    %297 = arith.addf %294, %296 : vector<8x32xf32>
    %c0_141 = arith.constant 0 : index
    %c0_142 = arith.constant 0 : index
    %298 = vector.load %arg7[%c0_141, %c0_142] : memref<32x32xf32, #tpu.memory_space<vmem>>, vector<32x32xf32>
    %cst_143 = arith.constant dense<0.000000e+00> : vector<8x32xf32>
    %299 = tpu.matmul %292, %298, %cst_143 {dimension_numbers = #tpu.dot_dimension_numbers<[1], [0], [0], [1], [0, 0, 1, 1], [], []>} : vector<8x32xf32>, vector<32x32xf32>, vector<8x32xf32> -> vector<8x32xf32>
    %c0_144 = arith.constant 0 : index
    %c0_145 = arith.constant 0 : index
    %300 = vector.load %arg8[%c0_144, %c0_145] : memref<1x32xf32, #tpu.memory_space<vmem>>, vector<1x32xf32>
    %301 = vector.broadcast %300 : vector<1x32xf32> to vector<8x32xf32>
    %302 = arith.addf %299, %301 : vector<8x32xf32>
    %c0_146 = arith.constant 0 : index
    %c0_147 = arith.constant 0 : index
    %303 = vector.load %arg9[%c0_146, %c0_147] : memref<32x32xf32, #tpu.memory_space<vmem>>, vector<32x32xf32>
    %304 = tpu.iota {dimensions = array<i32: 0>} : vector<8x8xi32>
    %305 = tpu.iota {dimensions = array<i32: 1>} : vector<8x8xi32>
    %306 = arith.cmpi sge, %304, %305 : vector<8x8xi32>
    %cst_148 = arith.constant 0.000000e+00 : f32
    %307 = vector.broadcast %cst_148 : f32 to vector<8x32xf32>
    %308 = vector.extract_strided_slice %297 {offsets = [0, 0], sizes = [8, 8], strides = [1, 1]} : vector<8x32xf32> to vector<8x8xf32>
    %309 = vector.extract_strided_slice %302 {offsets = [0, 0], sizes = [8, 8], strides = [1, 1]} : vector<8x32xf32> to vector<8x8xf32>
    %cst_149 = arith.constant dense<0.000000e+00> : vector<8x8xf32>
    %310 = tpu.matmul %308, %309, %cst_149 {dimension_numbers = #tpu.dot_dimension_numbers<[1], [1], [0], [0], [0, 0, 1, 0], [], []>} : vector<8x8xf32>, vector<8x8xf32>, vector<8x8xf32> -> vector<8x8xf32>
    %cst_150 = arith.constant 0.353553385 : f32
    %311 = vector.broadcast %cst_150 : f32 to vector<8x8xf32>
    %312 = arith.mulf %310, %311 : vector<8x8xf32>
    %cst_151 = arith.constant -1.000000e+30 : f32
    %313 = vector.broadcast %cst_151 : f32 to vector<8x8xf32>
    %314 = arith.select %306, %312, %313 : vector<8x8xi1>, vector<8x8xf32>
    %cst_152 = arith.constant dense<0xFF800000> : vector<8xf32>
    %315 = vector.multi_reduction <maximumf>, %314, %cst_152 [1] : vector<8x8xf32> to vector<8xf32>
    %316 = vector.shape_cast %315 : vector<8xf32> to vector<8x1xf32>
    %317 = vector.broadcast %316 : vector<8x1xf32> to vector<8x8xf32>
    %318 = arith.subf %314, %317 : vector<8x8xf32>
    %319 = math.exp %318 : vector<8x8xf32>
    %cst_153 = arith.constant dense<0.000000e+00> : vector<8xf32>
    %320 = vector.multi_reduction <add>, %319, %cst_153 [1] : vector<8x8xf32> to vector<8xf32>
    %321 = vector.shape_cast %320 : vector<8xf32> to vector<8x1xf32>
    %322 = vector.broadcast %321 : vector<8x1xf32> to vector<8x8xf32>
    %323 = arith.divf %319, %322 : vector<8x8xf32>
    %cst_154 = arith.constant dense<0.000000e+00> : vector<8x8xf32>
    %324 = tpu.matmul %323, %309, %cst_154 {dimension_numbers = #tpu.dot_dimension_numbers<[1], [0], [0], [1], [0, 0, 1, 1], [], []>} : vector<8x8xf32>, vector<8x8xf32>, vector<8x8xf32> -> vector<8x8xf32>
    %325 = vector.extract_strided_slice %303 {offsets = [0, 0], sizes = [8, 32], strides = [1, 1]} : vector<32x32xf32> to vector<8x32xf32>
    %cst_155 = arith.constant dense<0.000000e+00> : vector<8x32xf32>
    %326 = tpu.matmul %324, %325, %cst_155 {dimension_numbers = #tpu.dot_dimension_numbers<[1], [0], [0], [1], [0, 0, 1, 1], [], []>} : vector<8x8xf32>, vector<8x32xf32>, vector<8x32xf32> -> vector<8x32xf32>
    %327 = arith.addf %307, %326 : vector<8x32xf32>
    %328 = vector.extract_strided_slice %297 {offsets = [0, 8], sizes = [8, 8], strides = [1, 1]} : vector<8x32xf32> to vector<8x8xf32>
    %329 = vector.extract_strided_slice %302 {offsets = [0, 8], sizes = [8, 8], strides = [1, 1]} : vector<8x32xf32> to vector<8x8xf32>
    %cst_156 = arith.constant dense<0.000000e+00> : vector<8x8xf32>
    %330 = tpu.matmul %328, %329, %cst_156 {dimension_numbers = #tpu.dot_dimension_numbers<[1], [1], [0], [0], [0, 0, 1, 0], [], []>} : vector<8x8xf32>, vector<8x8xf32>, vector<8x8xf32> -> vector<8x8xf32>
    %cst_157 = arith.constant 0.353553385 : f32
    %331 = vector.broadcast %cst_157 : f32 to vector<8x8xf32>
    %332 = arith.mulf %330, %331 : vector<8x8xf32>
    %cst_158 = arith.constant -1.000000e+30 : f32
    %333 = vector.broadcast %cst_158 : f32 to vector<8x8xf32>
    %334 = arith.select %306, %332, %333 : vector<8x8xi1>, vector<8x8xf32>
    %cst_159 = arith.constant dense<0xFF800000> : vector<8xf32>
    %335 = vector.multi_reduction <maximumf>, %334, %cst_159 [1] : vector<8x8xf32> to vector<8xf32>
    %336 = vector.shape_cast %335 : vector<8xf32> to vector<8x1xf32>
    %337 = vector.broadcast %336 : vector<8x1xf32> to vector<8x8xf32>
    %338 = arith.subf %334, %337 : vector<8x8xf32>
    %339 = math.exp %338 : vector<8x8xf32>
    %cst_160 = arith.constant dense<0.000000e+00> : vector<8xf32>
    %340 = vector.multi_reduction <add>, %339, %cst_160 [1] : vector<8x8xf32> to vector<8xf32>
    %341 = vector.shape_cast %340 : vector<8xf32> to vector<8x1xf32>
    %342 = vector.broadcast %341 : vector<8x1xf32> to vector<8x8xf32>
    %343 = arith.divf %339, %342 : vector<8x8xf32>
    %cst_161 = arith.constant dense<0.000000e+00> : vector<8x8xf32>
    %344 = tpu.matmul %343, %329, %cst_161 {dimension_numbers = #tpu.dot_dimension_numbers<[1], [0], [0], [1], [0, 0, 1, 1], [], []>} : vector<8x8xf32>, vector<8x8xf32>, vector<8x8xf32> -> vector<8x8xf32>
    %345 = vector.extract_strided_slice %303 {offsets = [8, 0], sizes = [8, 32], strides = [1, 1]} : vector<32x32xf32> to vector<8x32xf32>
    %cst_162 = arith.constant dense<0.000000e+00> : vector<8x32xf32>
    %346 = tpu.matmul %344, %345, %cst_162 {dimension_numbers = #tpu.dot_dimension_numbers<[1], [0], [0], [1], [0, 0, 1, 1], [], []>} : vector<8x8xf32>, vector<8x32xf32>, vector<8x32xf32> -> vector<8x32xf32>
    %347 = arith.addf %327, %346 : vector<8x32xf32>
    %348 = vector.extract_strided_slice %297 {offsets = [0, 16], sizes = [8, 8], strides = [1, 1]} : vector<8x32xf32> to vector<8x8xf32>
    %349 = vector.extract_strided_slice %302 {offsets = [0, 16], sizes = [8, 8], strides = [1, 1]} : vector<8x32xf32> to vector<8x8xf32>
    %cst_163 = arith.constant dense<0.000000e+00> : vector<8x8xf32>
    %350 = tpu.matmul %348, %349, %cst_163 {dimension_numbers = #tpu.dot_dimension_numbers<[1], [1], [0], [0], [0, 0, 1, 0], [], []>} : vector<8x8xf32>, vector<8x8xf32>, vector<8x8xf32> -> vector<8x8xf32>
    %cst_164 = arith.constant 0.353553385 : f32
    %351 = vector.broadcast %cst_164 : f32 to vector<8x8xf32>
    %352 = arith.mulf %350, %351 : vector<8x8xf32>
    %cst_165 = arith.constant -1.000000e+30 : f32
    %353 = vector.broadcast %cst_165 : f32 to vector<8x8xf32>
    %354 = arith.select %306, %352, %353 : vector<8x8xi1>, vector<8x8xf32>
    %cst_166 = arith.constant dense<0xFF800000> : vector<8xf32>
    %355 = vector.multi_reduction <maximumf>, %354, %cst_166 [1] : vector<8x8xf32> to vector<8xf32>
    %356 = vector.shape_cast %355 : vector<8xf32> to vector<8x1xf32>
    %357 = vector.broadcast %356 : vector<8x1xf32> to vector<8x8xf32>
    %358 = arith.subf %354, %357 : vector<8x8xf32>
    %359 = math.exp %358 : vector<8x8xf32>
    %cst_167 = arith.constant dense<0.000000e+00> : vector<8xf32>
    %360 = vector.multi_reduction <add>, %359, %cst_167 [1] : vector<8x8xf32> to vector<8xf32>
    %361 = vector.shape_cast %360 : vector<8xf32> to vector<8x1xf32>
    %362 = vector.broadcast %361 : vector<8x1xf32> to vector<8x8xf32>
    %363 = arith.divf %359, %362 : vector<8x8xf32>
    %cst_168 = arith.constant dense<0.000000e+00> : vector<8x8xf32>
    %364 = tpu.matmul %363, %349, %cst_168 {dimension_numbers = #tpu.dot_dimension_numbers<[1], [0], [0], [1], [0, 0, 1, 1], [], []>} : vector<8x8xf32>, vector<8x8xf32>, vector<8x8xf32> -> vector<8x8xf32>
    %365 = vector.extract_strided_slice %303 {offsets = [16, 0], sizes = [8, 32], strides = [1, 1]} : vector<32x32xf32> to vector<8x32xf32>
    %cst_169 = arith.constant dense<0.000000e+00> : vector<8x32xf32>
    %366 = tpu.matmul %364, %365, %cst_169 {dimension_numbers = #tpu.dot_dimension_numbers<[1], [0], [0], [1], [0, 0, 1, 1], [], []>} : vector<8x8xf32>, vector<8x32xf32>, vector<8x32xf32> -> vector<8x32xf32>
    %367 = arith.addf %347, %366 : vector<8x32xf32>
    %368 = vector.extract_strided_slice %297 {offsets = [0, 24], sizes = [8, 8], strides = [1, 1]} : vector<8x32xf32> to vector<8x8xf32>
    %369 = vector.extract_strided_slice %302 {offsets = [0, 24], sizes = [8, 8], strides = [1, 1]} : vector<8x32xf32> to vector<8x8xf32>
    %cst_170 = arith.constant dense<0.000000e+00> : vector<8x8xf32>
    %370 = tpu.matmul %368, %369, %cst_170 {dimension_numbers = #tpu.dot_dimension_numbers<[1], [1], [0], [0], [0, 0, 1, 0], [], []>} : vector<8x8xf32>, vector<8x8xf32>, vector<8x8xf32> -> vector<8x8xf32>
    %cst_171 = arith.constant 0.353553385 : f32
    %371 = vector.broadcast %cst_171 : f32 to vector<8x8xf32>
    %372 = arith.mulf %370, %371 : vector<8x8xf32>
    %cst_172 = arith.constant -1.000000e+30 : f32
    %373 = vector.broadcast %cst_172 : f32 to vector<8x8xf32>
    %374 = arith.select %306, %372, %373 : vector<8x8xi1>, vector<8x8xf32>
    %cst_173 = arith.constant dense<0xFF800000> : vector<8xf32>
    %375 = vector.multi_reduction <maximumf>, %374, %cst_173 [1] : vector<8x8xf32> to vector<8xf32>
    %376 = vector.shape_cast %375 : vector<8xf32> to vector<8x1xf32>
    %377 = vector.broadcast %376 : vector<8x1xf32> to vector<8x8xf32>
    %378 = arith.subf %374, %377 : vector<8x8xf32>
    %379 = math.exp %378 : vector<8x8xf32>
    %cst_174 = arith.constant dense<0.000000e+00> : vector<8xf32>
    %380 = vector.multi_reduction <add>, %379, %cst_174 [1] : vector<8x8xf32> to vector<8xf32>
    %381 = vector.shape_cast %380 : vector<8xf32> to vector<8x1xf32>
    %382 = vector.broadcast %381 : vector<8x1xf32> to vector<8x8xf32>
    %383 = arith.divf %379, %382 : vector<8x8xf32>
    %cst_175 = arith.constant dense<0.000000e+00> : vector<8x8xf32>
    %384 = tpu.matmul %383, %369, %cst_175 {dimension_numbers = #tpu.dot_dimension_numbers<[1], [0], [0], [1], [0, 0, 1, 1], [], []>} : vector<8x8xf32>, vector<8x8xf32>, vector<8x8xf32> -> vector<8x8xf32>
    %385 = vector.extract_strided_slice %303 {offsets = [24, 0], sizes = [8, 32], strides = [1, 1]} : vector<32x32xf32> to vector<8x32xf32>
    %cst_176 = arith.constant dense<0.000000e+00> : vector<8x32xf32>
    %386 = tpu.matmul %384, %385, %cst_176 {dimension_numbers = #tpu.dot_dimension_numbers<[1], [0], [0], [1], [0, 0, 1, 1], [], []>} : vector<8x8xf32>, vector<8x32xf32>, vector<8x32xf32> -> vector<8x32xf32>
    %387 = arith.addf %367, %386 : vector<8x32xf32>
    %c0_177 = arith.constant 0 : index
    %c0_178 = arith.constant 0 : index
    %388 = vector.load %arg10[%c0_177, %c0_178] : memref<1x32xf32, #tpu.memory_space<vmem>>, vector<1x32xf32>
    %389 = vector.broadcast %388 : vector<1x32xf32> to vector<8x32xf32>
    %390 = arith.addf %387, %389 : vector<8x32xf32>
    %391 = arith.addf %269, %390 : vector<8x32xf32>
    %cst_179 = arith.constant dense<0.000000e+00> : vector<8xf32>
    %392 = vector.multi_reduction <add>, %391, %cst_179 [1] : vector<8x32xf32> to vector<8xf32>
    %393 = vector.shape_cast %392 : vector<8xf32> to vector<8x1xf32>
    %cst_180 = arith.constant 3.200000e+01 : f32
    %394 = vector.broadcast %cst_180 : f32 to vector<8x1xf32>
    %395 = arith.divf %393, %394 : vector<8x1xf32>
    %396 = vector.broadcast %395 : vector<8x1xf32> to vector<8x32xf32>
    %397 = arith.subf %391, %396 : vector<8x32xf32>
    %398 = arith.mulf %397, %397 : vector<8x32xf32>
    %cst_181 = arith.constant dense<0.000000e+00> : vector<8xf32>
    %399 = vector.multi_reduction <add>, %398, %cst_181 [1] : vector<8x32xf32> to vector<8xf32>
    %400 = vector.shape_cast %399 : vector<8xf32> to vector<8x1xf32>
    %cst_182 = arith.constant 0.0322580636 : f32
    %401 = vector.broadcast %cst_182 : f32 to vector<8x1xf32>
    %402 = arith.mulf %400, %401 : vector<8x1xf32>
    %403 = math.sqrt %402 : vector<8x1xf32>
    %c0_183 = arith.constant 0 : index
    %c0_184 = arith.constant 0 : index
    %404 = vector.load %arg11[%c0_183, %c0_184] : memref<1x32xf32, #tpu.memory_space<vmem>>, vector<1x32xf32>
    %cst_185 = arith.constant 9.99999997E-7 : f32
    %405 = vector.broadcast %cst_185 : f32 to vector<8x1xf32>
    %406 = arith.addf %403, %405 : vector<8x1xf32>
    %407 = vector.broadcast %406 : vector<8x1xf32> to vector<8x32xf32>
    %408 = arith.divf %397, %407 : vector<8x32xf32>
    %409 = vector.broadcast %404 : vector<1x32xf32> to vector<8x32xf32>
    %410 = arith.mulf %409, %408 : vector<8x32xf32>
    %c0_186 = arith.constant 0 : index
    %c0_187 = arith.constant 0 : index
    %411 = vector.load %arg12[%c0_186, %c0_187] : memref<1x32xf32, #tpu.memory_space<vmem>>, vector<1x32xf32>
    %412 = vector.broadcast %411 : vector<1x32xf32> to vector<8x32xf32>
    %413 = arith.addf %410, %412 : vector<8x32xf32>
    %c0_188 = arith.constant 0 : index
    %c0_189 = arith.constant 0 : index
    %414 = vector.load %arg13[%c0_188, %c0_189] : memref<32x32xf32, #tpu.memory_space<vmem>>, vector<32x32xf32>
    %cst_190 = arith.constant dense<0.000000e+00> : vector<8x32xf32>
    %415 = tpu.matmul %413, %414, %cst_190 {dimension_numbers = #tpu.dot_dimension_numbers<[1], [0], [0], [1], [0, 0, 1, 1], [], []>} : vector<8x32xf32>, vector<32x32xf32>, vector<8x32xf32> -> vector<8x32xf32>
    %c0_191 = arith.constant 0 : index
    %c0_192 = arith.constant 0 : index
    %416 = vector.load %arg14[%c0_191, %c0_192] : memref<1x32xf32, #tpu.memory_space<vmem>>, vector<1x32xf32>
    %417 = vector.broadcast %416 : vector<1x32xf32> to vector<8x32xf32>
    %418 = arith.addf %415, %417 : vector<8x32xf32>
    %c0_193 = arith.constant 0 : index
    %c0_194 = arith.constant 0 : index
    %419 = vector.load %arg15[%c0_193, %c0_194] : memref<32x32xf32, #tpu.memory_space<vmem>>, vector<32x32xf32>
    %cst_195 = arith.constant dense<0.000000e+00> : vector<8x32xf32>
    %420 = tpu.matmul %270, %419, %cst_195 {dimension_numbers = #tpu.dot_dimension_numbers<[1], [0], [0], [1], [0, 0, 1, 1], [], []>} : vector<8x32xf32>, vector<32x32xf32>, vector<8x32xf32> -> vector<8x32xf32>
    %c0_196 = arith.constant 0 : index
    %c0_197 = arith.constant 0 : index
    %421 = vector.load %arg16[%c0_196, %c0_197] : memref<1x32xf32, #tpu.memory_space<vmem>>, vector<1x32xf32>
    %422 = vector.broadcast %421 : vector<1x32xf32> to vector<8x32xf32>
    %423 = arith.addf %420, %422 : vector<8x32xf32>
    %c0_198 = arith.constant 0 : index
    %c0_199 = arith.constant 0 : index
    %424 = vector.load %arg17[%c0_198, %c0_199] : memref<32x32xf32, #tpu.memory_space<vmem>>, vector<32x32xf32>
    %cst_200 = arith.constant 0.000000e+00 : f32
    %425 = vector.broadcast %cst_200 : f32 to vector<8x32xf32>
    %426 = vector.extract_strided_slice %418 {offsets = [0, 0], sizes = [8, 8], strides = [1, 1]} : vector<8x32xf32> to vector<8x8xf32>
    %427 = vector.extract_strided_slice %423 {offsets = [0, 0], sizes = [8, 8], strides = [1, 1]} : vector<8x32xf32> to vector<8x8xf32>
    %cst_201 = arith.constant dense<0.000000e+00> : vector<8x8xf32>
    %428 = tpu.matmul %426, %427, %cst_201 {dimension_numbers = #tpu.dot_dimension_numbers<[1], [1], [0], [0], [0, 0, 1, 0], [], []>} : vector<8x8xf32>, vector<8x8xf32>, vector<8x8xf32> -> vector<8x8xf32>
    %cst_202 = arith.constant 0.353553385 : f32
    %429 = vector.broadcast %cst_202 : f32 to vector<8x8xf32>
    %430 = arith.mulf %428, %429 : vector<8x8xf32>
    %cst_203 = arith.constant dense<0xFF800000> : vector<8xf32>
    %431 = vector.multi_reduction <maximumf>, %430, %cst_203 [1] : vector<8x8xf32> to vector<8xf32>
    %432 = vector.shape_cast %431 : vector<8xf32> to vector<8x1xf32>
    %433 = vector.broadcast %432 : vector<8x1xf32> to vector<8x8xf32>
    %434 = arith.subf %430, %433 : vector<8x8xf32>
    %435 = math.exp %434 : vector<8x8xf32>
    %cst_204 = arith.constant dense<0.000000e+00> : vector<8xf32>
    %436 = vector.multi_reduction <add>, %435, %cst_204 [1] : vector<8x8xf32> to vector<8xf32>
    %437 = vector.shape_cast %436 : vector<8xf32> to vector<8x1xf32>
    %438 = vector.broadcast %437 : vector<8x1xf32> to vector<8x8xf32>
    %439 = arith.divf %435, %438 : vector<8x8xf32>
    %cst_205 = arith.constant dense<0.000000e+00> : vector<8x8xf32>
    %440 = tpu.matmul %439, %427, %cst_205 {dimension_numbers = #tpu.dot_dimension_numbers<[1], [0], [0], [1], [0, 0, 1, 1], [], []>} : vector<8x8xf32>, vector<8x8xf32>, vector<8x8xf32> -> vector<8x8xf32>
    %441 = vector.extract_strided_slice %424 {offsets = [0, 0], sizes = [8, 32], strides = [1, 1]} : vector<32x32xf32> to vector<8x32xf32>
    %cst_206 = arith.constant dense<0.000000e+00> : vector<8x32xf32>
    %442 = tpu.matmul %440, %441, %cst_206 {dimension_numbers = #tpu.dot_dimension_numbers<[1], [0], [0], [1], [0, 0, 1, 1], [], []>} : vector<8x8xf32>, vector<8x32xf32>, vector<8x32xf32> -> vector<8x32xf32>
    %443 = arith.addf %425, %442 : vector<8x32xf32>
    %444 = vector.extract_strided_slice %418 {offsets = [0, 8], sizes = [8, 8], strides = [1, 1]} : vector<8x32xf32> to vector<8x8xf32>
    %445 = vector.extract_strided_slice %423 {offsets = [0, 8], sizes = [8, 8], strides = [1, 1]} : vector<8x32xf32> to vector<8x8xf32>
    %cst_207 = arith.constant dense<0.000000e+00> : vector<8x8xf32>
    %446 = tpu.matmul %444, %445, %cst_207 {dimension_numbers = #tpu.dot_dimension_numbers<[1], [1], [0], [0], [0, 0, 1, 0], [], []>} : vector<8x8xf32>, vector<8x8xf32>, vector<8x8xf32> -> vector<8x8xf32>
    %cst_208 = arith.constant 0.353553385 : f32
    %447 = vector.broadcast %cst_208 : f32 to vector<8x8xf32>
    %448 = arith.mulf %446, %447 : vector<8x8xf32>
    %cst_209 = arith.constant dense<0xFF800000> : vector<8xf32>
    %449 = vector.multi_reduction <maximumf>, %448, %cst_209 [1] : vector<8x8xf32> to vector<8xf32>
    %450 = vector.shape_cast %449 : vector<8xf32> to vector<8x1xf32>
    %451 = vector.broadcast %450 : vector<8x1xf32> to vector<8x8xf32>
    %452 = arith.subf %448, %451 : vector<8x8xf32>
    %453 = math.exp %452 : vector<8x8xf32>
    %cst_210 = arith.constant dense<0.000000e+00> : vector<8xf32>
    %454 = vector.multi_reduction <add>, %453, %cst_210 [1] : vector<8x8xf32> to vector<8xf32>
    %455 = vector.shape_cast %454 : vector<8xf32> to vector<8x1xf32>
    %456 = vector.broadcast %455 : vector<8x1xf32> to vector<8x8xf32>
    %457 = arith.divf %453, %456 : vector<8x8xf32>
    %cst_211 = arith.constant dense<0.000000e+00> : vector<8x8xf32>
    %458 = tpu.matmul %457, %445, %cst_211 {dimension_numbers = #tpu.dot_dimension_numbers<[1], [0], [0], [1], [0, 0, 1, 1], [], []>} : vector<8x8xf32>, vector<8x8xf32>, vector<8x8xf32> -> vector<8x8xf32>
    %459 = vector.extract_strided_slice %424 {offsets = [8, 0], sizes = [8, 32], strides = [1, 1]} : vector<32x32xf32> to vector<8x32xf32>
    %cst_212 = arith.constant dense<0.000000e+00> : vector<8x32xf32>
    %460 = tpu.matmul %458, %459, %cst_212 {dimension_numbers = #tpu.dot_dimension_numbers<[1], [0], [0], [1], [0, 0, 1, 1], [], []>} : vector<8x8xf32>, vector<8x32xf32>, vector<8x32xf32> -> vector<8x32xf32>
    %461 = arith.addf %443, %460 : vector<8x32xf32>
    %462 = vector.extract_strided_slice %418 {offsets = [0, 16], sizes = [8, 8], strides = [1, 1]} : vector<8x32xf32> to vector<8x8xf32>
    %463 = vector.extract_strided_slice %423 {offsets = [0, 16], sizes = [8, 8], strides = [1, 1]} : vector<8x32xf32> to vector<8x8xf32>
    %cst_213 = arith.constant dense<0.000000e+00> : vector<8x8xf32>
    %464 = tpu.matmul %462, %463, %cst_213 {dimension_numbers = #tpu.dot_dimension_numbers<[1], [1], [0], [0], [0, 0, 1, 0], [], []>} : vector<8x8xf32>, vector<8x8xf32>, vector<8x8xf32> -> vector<8x8xf32>
    %cst_214 = arith.constant 0.353553385 : f32
    %465 = vector.broadcast %cst_214 : f32 to vector<8x8xf32>
    %466 = arith.mulf %464, %465 : vector<8x8xf32>
    %cst_215 = arith.constant dense<0xFF800000> : vector<8xf32>
    %467 = vector.multi_reduction <maximumf>, %466, %cst_215 [1] : vector<8x8xf32> to vector<8xf32>
    %468 = vector.shape_cast %467 : vector<8xf32> to vector<8x1xf32>
    %469 = vector.broadcast %468 : vector<8x1xf32> to vector<8x8xf32>
    %470 = arith.subf %466, %469 : vector<8x8xf32>
    %471 = math.exp %470 : vector<8x8xf32>
    %cst_216 = arith.constant dense<0.000000e+00> : vector<8xf32>
    %472 = vector.multi_reduction <add>, %471, %cst_216 [1] : vector<8x8xf32> to vector<8xf32>
    %473 = vector.shape_cast %472 : vector<8xf32> to vector<8x1xf32>
    %474 = vector.broadcast %473 : vector<8x1xf32> to vector<8x8xf32>
    %475 = arith.divf %471, %474 : vector<8x8xf32>
    %cst_217 = arith.constant dense<0.000000e+00> : vector<8x8xf32>
    %476 = tpu.matmul %475, %463, %cst_217 {dimension_numbers = #tpu.dot_dimension_numbers<[1], [0], [0], [1], [0, 0, 1, 1], [], []>} : vector<8x8xf32>, vector<8x8xf32>, vector<8x8xf32> -> vector<8x8xf32>
    %477 = vector.extract_strided_slice %424 {offsets = [16, 0], sizes = [8, 32], strides = [1, 1]} : vector<32x32xf32> to vector<8x32xf32>
    %cst_218 = arith.constant dense<0.000000e+00> : vector<8x32xf32>
    %478 = tpu.matmul %476, %477, %cst_218 {dimension_numbers = #tpu.dot_dimension_numbers<[1], [0], [0], [1], [0, 0, 1, 1], [], []>} : vector<8x8xf32>, vector<8x32xf32>, vector<8x32xf32> -> vector<8x32xf32>
    %479 = arith.addf %461, %478 : vector<8x32xf32>
    %480 = vector.extract_strided_slice %418 {offsets = [0, 24], sizes = [8, 8], strides = [1, 1]} : vector<8x32xf32> to vector<8x8xf32>
    %481 = vector.extract_strided_slice %423 {offsets = [0, 24], sizes = [8, 8], strides = [1, 1]} : vector<8x32xf32> to vector<8x8xf32>
    %cst_219 = arith.constant dense<0.000000e+00> : vector<8x8xf32>
    %482 = tpu.matmul %480, %481, %cst_219 {dimension_numbers = #tpu.dot_dimension_numbers<[1], [1], [0], [0], [0, 0, 1, 0], [], []>} : vector<8x8xf32>, vector<8x8xf32>, vector<8x8xf32> -> vector<8x8xf32>
    %cst_220 = arith.constant 0.353553385 : f32
    %483 = vector.broadcast %cst_220 : f32 to vector<8x8xf32>
    %484 = arith.mulf %482, %483 : vector<8x8xf32>
    %cst_221 = arith.constant dense<0xFF800000> : vector<8xf32>
    %485 = vector.multi_reduction <maximumf>, %484, %cst_221 [1] : vector<8x8xf32> to vector<8xf32>
    %486 = vector.shape_cast %485 : vector<8xf32> to vector<8x1xf32>
    %487 = vector.broadcast %486 : vector<8x1xf32> to vector<8x8xf32>
    %488 = arith.subf %484, %487 : vector<8x8xf32>
    %489 = math.exp %488 : vector<8x8xf32>
    %cst_222 = arith.constant dense<0.000000e+00> : vector<8xf32>
    %490 = vector.multi_reduction <add>, %489, %cst_222 [1] : vector<8x8xf32> to vector<8xf32>
    %491 = vector.shape_cast %490 : vector<8xf32> to vector<8x1xf32>
    %492 = vector.broadcast %491 : vector<8x1xf32> to vector<8x8xf32>
    %493 = arith.divf %489, %492 : vector<8x8xf32>
    %cst_223 = arith.constant dense<0.000000e+00> : vector<8x8xf32>
    %494 = tpu.matmul %493, %481, %cst_223 {dimension_numbers = #tpu.dot_dimension_numbers<[1], [0], [0], [1], [0, 0, 1, 1], [], []>} : vector<8x8xf32>, vector<8x8xf32>, vector<8x8xf32> -> vector<8x8xf32>
    %495 = vector.extract_strided_slice %424 {offsets = [24, 0], sizes = [8, 32], strides = [1, 1]} : vector<32x32xf32> to vector<8x32xf32>
    %cst_224 = arith.constant dense<0.000000e+00> : vector<8x32xf32>
    %496 = tpu.matmul %494, %495, %cst_224 {dimension_numbers = #tpu.dot_dimension_numbers<[1], [0], [0], [1], [0, 0, 1, 1], [], []>} : vector<8x8xf32>, vector<8x32xf32>, vector<8x32xf32> -> vector<8x32xf32>
    %497 = arith.addf %479, %496 : vector<8x32xf32>
    %c0_225 = arith.constant 0 : index
    %c0_226 = arith.constant 0 : index
    %498 = vector.load %arg18[%c0_225, %c0_226] : memref<1x32xf32, #tpu.memory_space<vmem>>, vector<1x32xf32>
    %499 = vector.broadcast %498 : vector<1x32xf32> to vector<8x32xf32>
    %500 = arith.addf %497, %499 : vector<8x32xf32>
    %501 = arith.addf %391, %500 : vector<8x32xf32>
    %cst_227 = arith.constant dense<0.000000e+00> : vector<8xf32>
    %502 = vector.multi_reduction <add>, %501, %cst_227 [1] : vector<8x32xf32> to vector<8xf32>
    %503 = vector.shape_cast %502 : vector<8xf32> to vector<8x1xf32>
    %cst_228 = arith.constant 3.200000e+01 : f32
    %504 = vector.broadcast %cst_228 : f32 to vector<8x1xf32>
    %505 = arith.divf %503, %504 : vector<8x1xf32>
    %506 = vector.broadcast %505 : vector<8x1xf32> to vector<8x32xf32>
    %507 = arith.subf %501, %506 : vector<8x32xf32>
    %508 = arith.mulf %507, %507 : vector<8x32xf32>
    %cst_229 = arith.constant dense<0.000000e+00> : vector<8xf32>
    %509 = vector.multi_reduction <add>, %508, %cst_229 [1] : vector<8x32xf32> to vector<8xf32>
    %510 = vector.shape_cast %509 : vector<8xf32> to vector<8x1xf32>
    %cst_230 = arith.constant 0.0322580636 : f32
    %511 = vector.broadcast %cst_230 : f32 to vector<8x1xf32>
    %512 = arith.mulf %510, %511 : vector<8x1xf32>
    %513 = math.sqrt %512 : vector<8x1xf32>
    %c0_231 = arith.constant 0 : index
    %c0_232 = arith.constant 0 : index
    %514 = vector.load %arg19[%c0_231, %c0_232] : memref<1x32xf32, #tpu.memory_space<vmem>>, vector<1x32xf32>
    %cst_233 = arith.constant 9.99999997E-7 : f32
    %515 = vector.broadcast %cst_233 : f32 to vector<8x1xf32>
    %516 = arith.addf %513, %515 : vector<8x1xf32>
    %517 = vector.broadcast %516 : vector<8x1xf32> to vector<8x32xf32>
    %518 = arith.divf %507, %517 : vector<8x32xf32>
    %519 = vector.broadcast %514 : vector<1x32xf32> to vector<8x32xf32>
    %520 = arith.mulf %519, %518 : vector<8x32xf32>
    %c0_234 = arith.constant 0 : index
    %c0_235 = arith.constant 0 : index
    %521 = vector.load %arg20[%c0_234, %c0_235] : memref<1x32xf32, #tpu.memory_space<vmem>>, vector<1x32xf32>
    %522 = vector.broadcast %521 : vector<1x32xf32> to vector<8x32xf32>
    %523 = arith.addf %520, %522 : vector<8x32xf32>
    %c0_236 = arith.constant 0 : index
    %c0_237 = arith.constant 0 : index
    %524 = vector.load %arg21[%c0_236, %c0_237] : memref<32x64xf32, #tpu.memory_space<vmem>>, vector<32x64xf32>
    %cst_238 = arith.constant dense<0.000000e+00> : vector<8x64xf32>
    %525 = tpu.matmul %523, %524, %cst_238 {dimension_numbers = #tpu.dot_dimension_numbers<[1], [0], [0], [1], [0, 0, 1, 1], [], []>} : vector<8x32xf32>, vector<32x64xf32>, vector<8x64xf32> -> vector<8x64xf32>
    %c0_239 = arith.constant 0 : index
    %c0_240 = arith.constant 0 : index
    %526 = vector.load %arg22[%c0_239, %c0_240] : memref<1x64xf32, #tpu.memory_space<vmem>>, vector<1x64xf32>
    %527 = vector.broadcast %526 : vector<1x64xf32> to vector<8x64xf32>
    %528 = arith.addf %525, %527 : vector<8x64xf32>
    %cst_241 = arith.constant 0.000000e+00 : f32
    %529 = vector.broadcast %cst_241 : f32 to vector<8x64xf32>
    %530 = arith.maximumf %528, %529 : vector<8x64xf32>
    %c0_242 = arith.constant 0 : index
    %c0_243 = arith.constant 0 : index
    %531 = vector.load %arg23[%c0_242, %c0_243] : memref<64x32xf32, #tpu.memory_space<vmem>>, vector<64x32xf32>
    %cst_244 = arith.constant dense<0.000000e+00> : vector<8x32xf32>
    %532 = tpu.matmul %530, %531, %cst_244 {dimension_numbers = #tpu.dot_dimension_numbers<[1], [0], [0], [1], [0, 0, 1, 1], [], []>} : vector<8x64xf32>, vector<64x32xf32>, vector<8x32xf32> -> vector<8x32xf32>
    %c0_245 = arith.constant 0 : index
    %c0_246 = arith.constant 0 : index
    %533 = vector.load %arg24[%c0_245, %c0_246] : memref<1x32xf32, #tpu.memory_space<vmem>>, vector<1x32xf32>
    %534 = vector.broadcast %533 : vector<1x32xf32> to vector<8x32xf32>
    %535 = arith.addf %532, %534 : vector<8x32xf32>
    %536 = arith.addf %501, %535 : vector<8x32xf32>
    %c8_247 = arith.constant 8 : index
    %c0_248 = arith.constant 0 : index
    %537 = vector.load %arg25[%c8_247, %c0_248] : memref<16x32xf32, #tpu.memory_space<vmem>>, vector<8x32xf32>
    tpu.vector_store %arg25[%c8_247, %c0_248], %536 {strides = array<i32>} : memref<16x32xf32, #tpu.memory_space<vmem>>, vector<8x32xf32>,
    return
  }
  func.func @transform_0(%arg0: i32) -> (i32, i32) {
    %c0_i32 = arith.constant 0 : i32
    %c0_i32_0 = arith.constant 0 : i32
    %c0_i32_1 = arith.constant 0 : i32
    return %c0_i32, %c0_i32_0 : i32, i32
  }
  func.func @transform_1(%arg0: i32) -> (i32, i32) {
    %c0_i32 = arith.constant 0 : i32
    %c0_i32_0 = arith.constant 0 : i32
    %c0_i32_1 = arith.constant 0 : i32
    return %c0_i32, %c0_i32_0 : i32, i32
  }
  func.func @transform_2(%arg0: i32) -> (i32, i32) {
    %c0_i32 = arith.constant 0 : i32
    %c0_i32_0 = arith.constant 0 : i32
    %c0_i32_1 = arith.constant 0 : i32
    return %c0_i32, %c0_i32_0 : i32, i32
  }
  func.func @transform_3(%arg0: i32) -> (i32, i32) {
    %c0_i32 = arith.constant 0 : i32
    %c0_i32_0 = arith.constant 0 : i32
    %c0_i32_1 = arith.constant 0 : i32
    return %c0_i32, %c0_i32_0 : i32, i32
  }
  func.func @transform_4(%arg0: i32) -> (i32, i32) {
    %c0_i32 = arith.constant 0 : i32
    %c0_i32_0 = arith.constant 0 : i32
    %c0_i32_1 = arith.constant 0 : i32
    return %c0_i32, %c0_i32_0 : i32, i32
  }
  func.func @transform_5(%arg0: i32) -> (i32, i32) {
    %c0_i32 = arith.constant 0 : i32
    %c0_i32_0 = arith.constant 0 : i32
    %c0_i32_1 = arith.constant 0 : i32
    return %c0_i32, %c0_i32_0 : i32, i32
  }
  func.func @transform_6(%arg0: i32) -> (i32, i32) {
    %c0_i32 = arith.constant 0 : i32
    %c0_i32_0 = arith.constant 0 : i32
    %c0_i32_1 = arith.constant 0 : i32
    return %c0_i32, %c0_i32_0 : i32, i32
  }
  func.func @transform_7(%arg0: i32) -> (i32, i32) {
    %c0_i32 = arith.constant 0 : i32
    %c0_i32_0 = arith.constant 0 : i32
    %c0_i32_1 = arith.constant 0 : i32
    return %c0_i32, %c0_i32_0 : i32, i32
  }
  func.func @transform_8(%arg0: i32) -> (i32, i32) {
    %c0_i32 = arith.constant 0 : i32
    %c0_i32_0 = arith.constant 0 : i32
    %c0_i32_1 = arith.constant 0 : i32
    return %c0_i32, %c0_i32_0 : i32, i32
  }
  func.func @transform_9(%arg0: i32) -> (i32, i32) {
    %c0_i32 = arith.constant 0 : i32
    %c0_i32_0 = arith.constant 0 : i32
    %c0_i32_1 = arith.constant 0 : i32
    return %c0_i32, %c0_i32_0 : i32, i32
  }
  func.func @transform_10(%arg0: i32) -> (i32, i32) {
    %c0_i32 = arith.constant 0 : i32
    %c0_i32_0 = arith.constant 0 : i32
    %c0_i32_1 = arith.constant 0 : i32
    return %c0_i32, %c0_i32_0 : i32, i32
  }
  func.func @transform_11(%arg0: i32) -> (i32, i32) {
    %c0_i32 = arith.constant 0 : i32
    %c0_i32_0 = arith.constant 0 : i32
    %c0_i32_1 = arith.constant 0 : i32
    return %c0_i32, %c0_i32_0 : i32, i32
  }
  func.func @transform_12(%arg0: i32) -> (i32, i32) {
    %c0_i32 = arith.constant 0 : i32
    %c0_i32_0 = arith.constant 0 : i32
    %c0_i32_1 = arith.constant 0 : i32
    return %c0_i32, %c0_i32_0 : i32, i32
  }
  func.func @transform_13(%arg0: i32) -> (i32, i32) {
    %c0_i32 = arith.constant 0 : i32
    %c0_i32_0 = arith.constant 0 : i32
    %c0_i32_1 = arith.constant 0 : i32
    return %c0_i32, %c0_i32_0 : i32, i32
  }
  func.func @transform_14(%arg0: i32) -> (i32, i32) {
    %c0_i32 = arith.constant 0 : i32
    %c0_i32_0 = arith.constant 0 : i32
    %c0_i32_1 = arith.constant 0 : i32
    return %c0_i32, %c0_i32_0 : i32, i32
  }
  func.func @transform_15(%arg0: i32) -> (i32, i32) {
    %c0_i32 = arith.constant 0 : i32
    %c0_i32_0 = arith.constant 0 : i32
    %c0_i32_1 = arith.constant 0 : i32
    return %c0_i32, %c0_i32_0 : i32, i32
  }
  func.func @transform_16(%arg0: i32) -> (i32, i32) {
    %c0_i32 = arith.constant 0 : i32
    %c0_i32_0 = arith.constant 0 : i32
    %c0_i32_1 = arith.constant 0 : i32
    return %c0_i32, %c0_i32_0 : i32, i32
  }
  func.func @transform_17(%arg0: i32) -> (i32, i32) {
    %c0_i32 = arith.constant 0 : i32
    %c0_i32_0 = arith.constant 0 : i32
    %c0_i32_1 = arith.constant 0 : i32
    return %c0_i32, %c0_i32_0 : i32, i32
  }
  func.func @transform_18(%arg0: i32) -> (i32, i32) {
    %c0_i32 = arith.constant 0 : i32
    %c0_i32_0 = arith.constant 0 : i32
    %c0_i32_1 = arith.constant 0 : i32
    return %c0_i32, %c0_i32_0 : i32, i32
  }
  func.func @transform_19(%arg0: i32) -> (i32, i32) {
    %c0_i32 = arith.constant 0 : i32
    %c0_i32_0 = arith.constant 0 : i32
    %c0_i32_1 = arith.constant 0 : i32
    return %c0_i32, %c0_i32_0 : i32, i32
  }
  func.func @transform_20(%arg0: i32) -> (i32, i32) {
    %c0_i32 = arith.constant 0 : i32
    %c0_i32_0 = arith.constant 0 : i32
    %c0_i32_1 = arith.constant 0 : i32
    return %c0_i32, %c0_i32_0 : i32, i32
  }
  func.func @transform_21(%arg0: i32) -> (i32, i32) {
    %c0_i32 = arith.constant 0 : i32
    %c0_i32_0 = arith.constant 0 : i32
    %c0_i32_1 = arith.constant 0 : i32
    return %c0_i32, %c0_i32_0 : i32, i32
  }
  func.func @transform_22(%arg0: i32) -> (i32, i32) {
    %c0_i32 = arith.constant 0 : i32
    %c0_i32_0 = arith.constant 0 : i32
    %c0_i32_1 = arith.constant 0 : i32
    return %c0_i32, %c0_i32_0 : i32, i32
  }
  func.func @transform_23(%arg0: i32) -> (i32, i32) {
    %c0_i32 = arith.constant 0 : i32
    %c0_i32_0 = arith.constant 0 : i32
    %c0_i32_1 = arith.constant 0 : i32
    return %c0_i32, %c0_i32_0 : i32, i32
  }
  func.func @transform_24(%arg0: i32) -> (i32, i32) {
    %c0_i32 = arith.constant 0 : i32
    %c0_i32_0 = arith.constant 0 : i32
    %c0_i32_1 = arith.constant 0 : i32
    return %c0_i32, %c0_i32_0 : i32, i32
  }
}

</mosaic_0001>

<bundles_post_ra>
// kernel: _decoder_layer_call.1
= control target key start
LH: loop header
LB: loop body
LE: loop exit
PB: predicated region body
PF: predicated region fallthrough
CT: control target
= control target key end

     0   :  { %s4049_s0 = inlined_call_operand.hbm [shape: f32[16,32], index: 0, kind: input, shape index: {}]   ;;  %s4050_s1 = inlined_call_operand.hbm [shape: f32[16,32], index: 1, kind: input, shape index: {}]   ;;  %s4051_s2 = inlined_call_operand.hbm [shape: f32[1,32], index: 2, kind: input, shape index: {}]   ;;  %s4052_s3 = inlined_call_operand.hbm [shape: f32[1,32], index: 3, kind: input, shape index: {}]   ;;  %s4053_s4 = inlined_call_operand.vmem [shape: f32[32,32], index: 4, kind: input, shape index: {}]   ;;  %s4054_s5 = inlined_call_operand.hbm [shape: f32[1,32], index: 5, kind: input, shape index: {}]   ;;  %s4055_s6 = inlined_call_operand.vmem [shape: f32[32,32], index: 6, kind: input, shape index: {}]   ;;  %s4056_s7 = inlined_call_operand.hbm [shape: f32[1,32], index: 7, kind: input, shape index: {}]   ;;  %s4057_s8 = inlined_call_operand.vmem [shape: f32[32,32], index: 8, kind: input, shape index: {}]   ;;  %s4058_s9 = inlined_call_operand.hbm [shape: f32[1,32], index: 9, kind: input, shape index: {}]   ;;  %s4059_s10 = inlined_call_operand.hbm [shape: f32[1,32], index: 10, kind: input, shape index: {}]   ;;  %s4060_s11 = inlined_call_operand.hbm [shape: f32[1,32], index: 11, kind: input, shape index: {}]   ;;  %s4061_s12 = inlined_call_operand.vmem [shape: f32[32,32], index: 12, kind: input, shape index: {}]   ;;  %s4062_s13 = inlined_call_operand.hbm [shape: f32[1,32], index: 13, kind: input, shape index: {}]   ;;  %s4063_s14 = inlined_call_operand.hbm [shape: f32[32,32], index: 14, kind: input, shape index: {}]   ;;  %s4064_s15 = inlined_call_operand.hbm [shape: f32[1,32], index: 15, kind: input, shape index: {}]   ;;  %s4065_s16 = inlined_call_operand.hbm [shape: f32[32,32], index: 16, kind: input, shape index: {}]   ;;  %s4066_s17 = inlined_call_operand.hbm [shape: f32[1,32], index: 17, kind: input, shape index: {}]   ;;  %s4067_s18 = inlined_call_operand.hbm [shape: f32[1,32], index: 18, kind: input, shape index: {}]   ;;  %s4068_s19 = inlined_call_operand.hbm [shape: f32[1,32], index: 19, kind: input, shape index: {}]   ;;  %s4069_s20 = inlined_call_operand.hbm [shape: f32[32,64], index: 20, kind: input, shape index: {}]   ;;  %s4070_s21 = inlined_call_operand.hbm [shape: f32[1,64], index: 21, kind: input, shape index: {}]   ;;  %s4071_s22 = inlined_call_operand.vmem [shape: f32[64,32], index: 22, kind: input, shape index: {}]   ;;  %s4072_s23 = inlined_call_operand.hbm [shape: f32[1,32], index: 23, kind: input, shape index: {}]   ;;  %s4073_s24 = inlined_call_operand.hbm [shape: f32[16,32], index: 24, kind: output, shape index: {}]  }
   0x1   :  { %4081 = sst [smem:[#allocation44_spill]] %s4049_s0 }
   0x2   :  { %4082 = sst [smem:[#allocation45_spill]] %s4050_s1 }
   0x3   :  { %4083 = sst [smem:[#allocation46_spill]] %s4051_s2 }
   0x4   :  { %4084 = sst [smem:[#allocation47_spill]] %s4052_s3 }
   0x5   :  { %4085 = sst [smem:[#allocation48_spill]] %s4053_s4 }
   0x6   :  { %4086 = sst [smem:[#allocation49_spill]] %s4054_s5 }
   0x7   :  { %4087 = sst [smem:[#allocation50_spill]] %s4055_s6 }
   0x8   :  { %4088 = sst [smem:[#allocation51_spill]] %s4056_s7 }
   0x9   :  { %4089 = sst [smem:[#allocation52_spill]] %s4057_s8 }
   0xa   :  { %4090 = sst [smem:[#allocation53_spill]] %s4073_s24 }
   0xb   :  { %29 = vsyncpa [#allocation3], 0 }
   0xc   :  { %30 = vsyncpa [#allocation6], 0 }
   0xd   :  { %31 = vsyncpa [#allocation9], 0 }
   0xe   :  { %32 = vsyncpa [#allocation12], 0 }
   0xf   :  { %33 = vsyncpa [#allocation15], 0 }
  0x10   :  { %34 = vsyncpa [#allocation18], 0 }
  0x11   :  { %35 = vsyncpa [#allocation21], 0 }
  0x12   :  { %36 = vsyncpa [#allocation24], 0 }
  0x13   :  { %37 = vsyncpa [#allocation27], 0 }
  0x14   :  { %38 = vsyncpa [#allocation30], 0 }
  0x15   :  { %39 = vsyncpa [#allocation4], 0  ;;  %s4091_s27 = sld [smem:[#allocation45_spill]]  ;;  %s3426_s6 = smov [#allocation5]  }
  0x16   :  { %s59_s2 = sshll.u32 %s3426_s6, 4  ;;  %s4092_s7 = sld [smem:[#allocation47_spill]]  ;;  %s60_s2 = int_to_ptr.vmem [resolvable:$true] %s59_s2 }
  0x17   :  { %s4077_s3 = smov 128   ;;  %s4079_s25 = smov 8  }
  0x18   :  { %s3429_s8 = smov [#allocation8]   ;;  %s4093_s26 = sld [smem:[#allocation51_spill]] }
  0x19   :  { %s84_s4 = sshll.u32 %s3429_s8, 4  ;;  %s132_s29 = sshll.u32 %s4059_s10, 4  ;;  %s85_s4 = int_to_ptr.vmem [resolvable:$true] %s84_s4  ;;  %s133_s29 = int_to_ptr.hbm [resolvable:$true] %s132_s29 }
  0x1a   :  { %s3430_s0 = smov [#allocation11]   ;;  %s3432_s24 = smov [#allocation17]  }
  0x1b   :  { %s57_s28 = sshll.u32 %s4091_s27, 4  ;;  %s158_s10 = sshll.u32 %s3432_s24, 4  ;;  %s58_s28 = int_to_ptr.hbm [resolvable:$true] %s57_s28  ;;  %s159_s10 = int_to_ptr.vmem [resolvable:$true] %s158_s10 }
  0x1c   :  { %s82_s30 = sshll.u32 %s4092_s7, 4  ;;  %s110_s7 = sshll.u32 %s3430_s0, 4  ;;  %s83_s30 = int_to_ptr.hbm [resolvable:$true] %s82_s30  ;;  %s111_s7 = int_to_ptr.vmem [resolvable:$true] %s110_s7 }
  0x1d   :  { %65 = dma.hbm_to_vmem [thread:$0]  %s58_s28, 256, %s60_s2, [#allocation6], %s4077_s3, %s4077_s3, %s4079_s25  }
  0x1e   :  { %s108_s27 = sshll.u32 %s4093_s26, 4  ;;  %s3431_s28 = smov [#allocation14]   ;;  %s109_s27 = int_to_ptr.hbm [resolvable:$true] %s108_s27 }
  0x1f   :  { %87 = dma.hbm_to_vmem [thread:$0]  %s83_s30, 16, %s85_s4, [#allocation9]  }
  0x20   :  { %113 = dma.hbm_to_vmem [thread:$0]  %s109_s27, 16, %s111_s7, [#allocation12]  }
  0x21   :  { %s134_s2 = sshll.u32 %s3431_s28, 4  ;;  %s156_s25 = sshll.u32 %s4062_s13, 4  ;;  %s135_s2 = int_to_ptr.vmem [resolvable:$true] %s134_s2  ;;  %s157_s25 = int_to_ptr.hbm [resolvable:$true] %s156_s25 }
  0x22   :  { %137 = dma.hbm_to_vmem [thread:$0]  %s133_s29, 16, %s135_s2, [#allocation15]  }
  0x23   :  { %s180_s4 = sshll.u32 %s4064_s15, 4  ;;  %s3433_s5 = smov [#allocation20]   ;;  %s181_s4 = int_to_ptr.hbm [resolvable:$true] %s180_s4 }
  0x24   :  { %161 = dma.hbm_to_vmem [thread:$0]  %s157_s25, 16, %s159_s10, [#allocation18]  }
  0x25   :  { %s182_s26 = sshll.u32 %s3433_s5, 4  ;;  %s204_s0 = sshll.u32 %s4066_s17, 4  ;;  %s183_s26 = int_to_ptr.vmem [resolvable:$true] %s182_s26  ;;  %s205_s0 = int_to_ptr.hbm [resolvable:$true] %s204_s0 }
  0x26   :  { %185 = dma.hbm_to_vmem [thread:$0]  %s181_s4, 16, %s183_s26, [#allocation21]  }
  0x27   :  { %s226_s29 = sshll.u32 %s4068_s19, 4  ;;  %s3434_s7 = smov [#allocation23]   ;;  %s227_s29 = int_to_ptr.hbm [resolvable:$true] %s226_s29 }
  0x28   :  { %s206_s15 = sshll.u32 %s3434_s7, 4  ;;  %s3435_s28 = smov [#allocation26]   ;;  %s207_s15 = int_to_ptr.vmem [resolvable:$true] %s206_s15 }
  0x29   :  { %209 = dma.hbm_to_vmem [thread:$0]  %s205_s0, 16, %s207_s15, [#allocation24]  }
  0x2a   :  { %s228_s25 = sshll.u32 %s3435_s28, 4  ;;  %s250_s1 = sshll.u32 %s4070_s21, 4  ;;  %s229_s25 = int_to_ptr.vmem [resolvable:$true] %s228_s25  ;;  %s251_s1 = int_to_ptr.hbm [resolvable:$true] %s250_s1 }
  0x2b   :  { %231 = dma.hbm_to_vmem [thread:$0]  %s227_s29, 16, %s229_s25, [#allocation27]  }
  0x2c   :  { %s4094_s4 = sld [smem:[#allocation44_spill]]  ;;  %s3436_s10 = smov [#allocation29]  }
  0x2d   :  { %s252_s19 = sshll.u32 %s3436_s10, 4  ;;  %s3437_s5 = smov [#allocation2]   ;;  %s253_s19 = int_to_ptr.vmem [resolvable:$true] %s252_s19 }
  0x2e   :  { %255 = dma.hbm_to_vmem [thread:$0]  %s251_s1, 16, %s253_s19, [#allocation30]  }
  0x2f   :  { %s46_s26 = sshll.u32 %s3437_s5, 4  ;;  %s4095_s0 = sld [smem:[#allocation46_spill]]  ;;  %s47_s26 = int_to_ptr.vmem [resolvable:$true] %s46_s26 }
  0x30   :  { %s4096_s21 = smov 8   ;;  %s4097_s3 = smov 128  }
  0x31   :  { %s4098_s15 = sld [smem:[#allocation49_spill]]  ;;  %s3438_s25 = smov [#allocation7]  }
  0x32   :  { %s44_s24 = sshll.u32 %s4094_s4, 4  ;;  %s73_s2 = sshll.u32 %s3438_s25, 4  ;;  %s45_s24 = int_to_ptr.hbm [resolvable:$true] %s44_s24  ;;  %s74_s2 = int_to_ptr.vmem [resolvable:$true] %s73_s2 }
  0x33   :  { %52 = dma.hbm_to_vmem [thread:$0]  %s45_s24, 256, %s47_s26, [#allocation3], %s4097_s3, %s4097_s3, %s4096_s21  }
  0x34   :  { %s3439_s8 = smov [#allocation10]   ;;  %s121_s4 = sshll.u32 %s4058_s9, 4  ;;  %s122_s4 = int_to_ptr.hbm [resolvable:$true] %s121_s4 }
  0x35   :  { %s71_s13 = sshll.u32 %s4095_s0, 4  ;;  %s97_s1 = sshll.u32 %s3439_s8, 4  ;;  %s72_s13 = int_to_ptr.hbm [resolvable:$true] %s71_s13  ;;  %s98_s1 = int_to_ptr.vmem [resolvable:$true] %s97_s1 }
  0x36   :  { %76 = dma.hbm_to_vmem [thread:$0]  %s72_s13, 16, %s74_s2, [#allocation6]  }
  0x37   :  { %s95_s28 = sshll.u32 %s4098_s15, 4  ;;  %s143_s19 = sshll.u32 %s4060_s11, 4  ;;  %s96_s28 = int_to_ptr.hbm [resolvable:$true] %s95_s28  ;;  %s144_s19 = int_to_ptr.hbm [resolvable:$true] %s143_s19 }
  0x38   :  { %100 = dma.hbm_to_vmem [thread:$0]  %s96_s28, 16, %s98_s1, [#allocation9]  }
  0x39   :  { %s3440_s5 = smov [#allocation13]   ;;  %s3441_s27 = smov [#allocation16]  }
  0x3a   :  { %s123_s26 = sshll.u32 %s3440_s5, 4  ;;  %s145_s6 = sshll.u32 %s3441_s27, 4  ;;  %s124_s26 = int_to_ptr.vmem [resolvable:$true] %s123_s26  ;;  %s146_s6 = int_to_ptr.vmem [resolvable:$true] %s145_s6 }
  0x3b   :  { %126 = dma.hbm_to_vmem [thread:$0]  %s122_s4, 16, %s124_s26, [#allocation12]  }
  0x3c   :  { %s166_s29 = sshll.u32 %s4063_s14, 4  ;;  %s190_s15 = sshll.u32 %s4065_s16, 4  ;;  %s167_s29 = int_to_ptr.hbm [resolvable:$true] %s166_s29  ;;  %s191_s15 = int_to_ptr.hbm [resolvable:$true] %s190_s15 }
  0x3d   :  { %148 = dma.hbm_to_vmem [thread:$0]  %s144_s19, 16, %s146_s6, [#allocation15]  }
  0x3e   :  { %s3442_s28 = smov [#allocation19]   ;;  %s3443_s25 = smov [#allocation22]  }
  0x3f   :  { %s168_s11 = sshll.u32 %s3442_s28, 4  ;;  %s192_s2 = sshll.u32 %s3443_s25, 4  ;;  %s169_s11 = int_to_ptr.vmem [resolvable:$true] %s168_s11  ;;  %s193_s2 = int_to_ptr.vmem [resolvable:$true] %s192_s2 }
  0x40   :  { %174 = dma.hbm_to_vmem [thread:$0]  %s167_s29, 512, %s169_s11, [#allocation18], %s4097_s3, %s4097_s3, %s4096_s21  }
  0x41   :  { %s215_s14 = sshll.u32 %s4067_s18, 4  ;;  %s236_s30 = sshll.u32 %s4069_s20, 4  ;;  %s216_s14 = int_to_ptr.hbm [resolvable:$true] %s215_s14  ;;  %s237_s30 = int_to_ptr.hbm [resolvable:$true] %s236_s30 }
  0x42   :  { %198 = dma.hbm_to_vmem [thread:$0]  %s191_s15, 512, %s193_s2, [#allocation21], %s4097_s3, %s4097_s3, %s4096_s21  }
  0x43   :  { %s3444_s4 = smov [#allocation25]   ;;  %s3445_s24 = smov [#allocation28]  }
  0x44   :  { %s217_s10 = sshll.u32 %s3444_s4, 4  ;;  %s238_s19 = sshll.u32 %s3445_s24, 4  ;;  %s218_s10 = int_to_ptr.vmem [resolvable:$true] %s217_s10  ;;  %s239_s19 = int_to_ptr.vmem [resolvable:$true] %s238_s19 }
  0x45   :  { %220 = dma.hbm_to_vmem [thread:$0]  %s216_s14, 16, %s218_s10, [#allocation24]  }
  0x46   :  { %s263_s18 = sshll.u32 %s4072_s23, 4  ;;  %s3446_s27 = smov [#allocation31]   ;;  %s264_s18 = int_to_ptr.hbm [resolvable:$true] %s263_s18 }
  0x47   :  { %244 = dma.hbm_to_vmem [thread:$0]  %s237_s30, 512, %s239_s19, [#allocation27], %s4097_s3, %s4097_s3, %s4096_s21  }
  0x48   :  { %s265_s6 = sshll.u32 %s3446_s27, 4  ;;  %s266_s6 = int_to_ptr.vmem [resolvable:$true] %s265_s6 }
  0x49   :  { %268 = dma.hbm_to_vmem [thread:$0]  %s264_s18, 16, %s266_s6, [#allocation30]  }
  0x4a   :  { %3404 = dma.done.wait [#allocation3], 256  }
  0x4b   :  { %3405 = vsyncadd [#allocation3], 4294967040 }
  0x4c   :  { %3406 = dma.done.wait [#allocation6], 272  }
  0x4d   :  { %3407 = vsyncadd [#allocation6], 4294967024 }
  0x4e   :  { %3408 = dma.done.wait [#allocation9], 32  }
  0x4f   :  { %3409 = vsyncadd [#allocation9], 4294967264 }
  0x50   :  { %3410 = dma.done.wait [#allocation12], 32  }
  0x51   :  { %3411 = vsyncadd [#allocation12], 4294967264 }
  0x52   :  { %3412 = dma.done.wait [#allocation15], 32  }
  0x53   :  { %3413 = vsyncadd [#allocation15], 4294967264 }
  0x54   :  { %3414 = dma.done.wait [#allocation18], 528  }
  0x55   :  { %3415 = vsyncadd [#allocation18], 4294966768 }
  0x56   :  { %3416 = dma.done.wait [#allocation21], 528  }
  0x57   :  { %3417 = vsyncadd [#allocation21], 4294966768 }
  0x58   :  { %3418 = dma.done.wait [#allocation24], 32  }
  0x59   :  { %3419 = vsyncadd [#allocation24], 4294967264 }
  0x5a   :  { %3420 = dma.done.wait [#allocation27], 528  }
  0x5b   :  { %3421 = vsyncadd [#allocation27], 4294966768 }
  0x5c   :  { %3422 = dma.done.wait [#allocation30], 32  }
  0x5d   :  { %3423 = vsyncadd [#allocation30], 4294967264  ;;  %vm347_vm0 = vcmask 261120   ;;  %v3649_v0 = vld [vmem:[#allocation2] sm:$0xff]  ;;  %v3447_v2 = vmov 32.0   ;;  %s4099_s0 = sld [smem:[#allocation48_spill]]  ;;  %v466_v60 = vlaneseq }
  0x5e   :  { %v348_v1 = vsel %vm347_vm0, %v3649_v0, 0.0  ;;  %2834 = vrcp.f32 %v3447_v2  ;;  %s4100_s9 = sld [smem:[#allocation50_spill]]  ;;  %v2806_v44 = vld [vmem:[#allocation7] ss:$0 sm:$0xff]  ;;  %v2807_v47 = vld [vmem:[#allocation8] ss:$0 sm:$0xff] }
  0x5f   :  { %349 = vadd.xlane.f32.xlu0 %v348_v1  ;;  %v2809_v50 = vld [vmem:[#allocation11] ss:$0 sm:$0xff]  ;;  %v2808_v52 = vld [vmem:[#allocation10] ss:$0 sm:$0xff]  ;;  %vm471_vm8 = vcmask 64512   ;;  %s3448_s4 = smov 112  }
  0x60   :  { %s3449_s10 = smov 120   ;;  %s3450_s24 = smov 104   ;;  %v467_v61 = vshrl.u32 %v466_v60, 7  ;;  %v469_v62 = vand.u32 127, %v466_v60 }
  0x61   :  { %s4103_s26 = sld [smem:[#allocation52_spill]] }
  0x62   :  { %vm3719_vm9 = vcmp.ge.s32.totalorder %v467_v61, %v469_v62  ;;  %s4104_s19 = sld [smem:[#allocation53_spill]] }
  0x63   :  { %v3661_v14 = vld [vmem:[%s4099_s0 + $0x18] sm:$0xff]  ;;  %v3671_v16 = vld [vmem:[%s4099_s0 + $0x10] sm:$0xff]  ;;  %v3683_v18 = vld [vmem:[%s4099_s0 + $0x8] sm:$0xff] }
  0x64   :  { %v2835_v3 = vpop.eup %2834  ;;  %v3666_v15 = vld [vmem:[%s4100_s9 + $0x18] sm:$0xff]  ;;  %426 = vmatpush.msra.mxu0 %v3661_v14  ;;  %v3678_v17 = vld [vmem:[%s4100_s9 + $0x10] sm:$0xff]  ;;  %v3688_v19 = vld [vmem:[%s4100_s9 + $0x8] sm:$0xff] }
  0x65   :  { %v352_v4 = vmul.f32 32.0, %v2835_v3  ;;  %vm356_vm1 = vweird.f32 %v2835_v3  ;;  %454 = vmatpush.msra.mxu1 %v3666_v15  ;;  %v3695_v20 = vld [vmem:[%s4099_s0] sm:$0xff] }
  0x66   :  { %427 = vmatpush.msra.mxu0 %v3671_v16  ;;  %v3700_v21 = vld [vmem:[%s4100_s9] sm:$0xff] }
  0x67   :  { %v353_v5 = vsub.f32 1.0, %v352_v4  ;;  %455 = vmatpush.msra.mxu1 %v3678_v17 }
  0x68   :  { %428 = vmatpush.msra.mxu0 %v3683_v18  ;;  %s2682_s5 = sshll.u32 %s4104_s19, 4  ;;  %s2683_s5 = int_to_ptr.hbm [resolvable:$true] %s2682_s5 }
  0x69   :  { %v354_v6 = vmul.f32 %v2835_v3, %v353_v5  ;;  %456 = vmatpush.msra.mxu1 %v3688_v19 }
  0x6a   :  { %429 = vmatpush.msra.mxu0 %v3695_v20 }
  0x6b   :  { %v355_v7 = vadd.f32 %v2835_v3, %v354_v6  ;;  %457 = vmatpush.msra.mxu1 %v3700_v21 }
  0x6d   :  { %v3653_v8 = vsel %vm356_vm1, %v2835_v3, %v355_v7 }
  0xd2   :  { %v350_v9 = vpop.xlane.xlu0 %349 }
  0xd3   :  { %v358_v10 = vmul.f32 %v3653_v8, %v350_v9 }
  0xd5   :  { %v359_v11 = vsub.f32 %v3649_v0, %v358_v10 }
  0xd7   :  { %v360_v12 = vmul.f32 %v359_v11, %v359_v11 }
  0xd9   :  { %v361_v13 = vsel %vm347_vm0, %v360_v12, 0.0 }
  0xda   :  { %362 = vadd.xlane.f32.xlu0 %v361_v13 }
 0x14d   :  { %v363_v22 = vpop.xlane.xlu0 %362 }
 0x14e   :  { %v364_v23 = vmul.f32 0.032258064, %v363_v22 }
 0x150   :  { %2836 = vrsqrt.f32 %v364_v23  ;;  %vm372_vm2 = vcmp.eq.f32.partialorder %v364_v23, inf  ;;  %v375_v31 = vand.u32 2147483648, %v364_v23  ;;  %vm374_vm3 = vcmp.eq.f32.partialorder %v364_v23, 0.0 }
 0x156   :  { %v2837_v24 = vpop.eup %2836 }
 0x157   :  { %v366_v25 = vmul.f32 %v2837_v24, %v364_v23 }
 0x159   :  { %v367_v26 = vmul.f32 %v2837_v24, %v366_v25 }
 0x15b   :  { %v368_v27 = vmul.f32 0.5, %v367_v26 }
 0x15d   :  { %v369_v28 = vsub.f32 1.5, %v368_v27 }
 0x15f   :  { %v370_v29 = vmul.f32 %v2837_v24, %v369_v28 }
 0x161   :  { %v371_v30 = vmul.f32 %v370_v29, %v364_v23 }
 0x163   :  { %v373_v32 = vsel %vm372_vm2, %v364_v23, %v371_v30 }
 0x164   :  { %v376_v33 = vsel %vm374_vm3, %v375_v31, %v373_v32 }
 0x165   :  { %v378_v34 = vadd.f32 1e-06, %v376_v33  ;;  %v462_v33 = vld [vmem:[%s4103_s26] sm:$0xff] }
 0x166   :  { %666 = vmatpush.msrb.mxu1 %v462_v33 }
 0x167   :  { %2838 = vrcp.f32 %v378_v34  ;;  %v390_v38 = vand.u32 2147483648, %v378_v34  ;;  %v388_v40 = vand.u32 2147483647, %v378_v34  ;;  %vm384_vm5 = vweird.f32 %v378_v34 }
 0x169   :  { %v391_v42 = vor.u32 1.1754944e-38, %v390_v38  ;;  %vm389_vm7 = vcmp.eq.f32.partialorder %v388_v40, 8.507059e+37 }
 0x16d   :  { %v2839_v35 = vpop.eup %2838 }
 0x16e   :  { %v380_v36 = vmul.f32 %v2839_v35, %v378_v34  ;;  %vm385_vm4 = vweird.f32 %v2839_v35 }
 0x16f   :  { %vm386_vm6 = vmor %vm384_vm5, %vm385_vm4 }
 0x170   :  { %v381_v37 = vsub.f32 1.0, %v380_v36 }
 0x172   :  { %v382_v39 = vmul.f32 %v2839_v35, %v381_v37 }
 0x174   :  { %v383_v41 = vadd.f32 %v2839_v35, %v382_v39 }
 0x176   :  { %v387_v43 = vsel %vm386_vm6, %v2839_v35, %v383_v41 }
 0x177   :  { %v392_v45 = vsel %vm389_vm7, %v391_v42, %v387_v43 }
 0x178   :  { %v393_v46 = vmul.f32 %v392_v45, %v359_v11 }
 0x17a   :  { %v397_v48 = vmul.f32 %v2806_v44, %v393_v46 }
 0x17c   :  { %v402_v49 = vadd.f32 %v2807_v47, %v397_v48 }
 0x17e   :  { %2704 = vmatmul.msk.f32.vlgmr.msra.gmra.mxu0 %vm347_vm0, %v402_v49  ;;  %2705 = vmatmul.msk.f32.vlgmr.msra.gmra.mxu1 %vm347_vm0, %v402_v49 }
 0x1fb   :  { %v459_v51 = vpop.f32.mrf.mxu1  ;;  %v431_v54 = vpop.f32.mrf.mxu0 }
 0x1fc   :  { %v460_v53 = vadd.f32 %v2809_v50, %v459_v51  ;;  %v432_v55 = vadd.f32 %v2808_v52, %v431_v54 }
 0x1fe   :  { %673 = vrot.lane.b32.xlu0 %v460_v53, %s3448_s4  ;;  %549 = vrot.lane.b32.xlu2 %v460_v53, %s3449_s10 }
 0x1ff   :  { %2706 = vmatpush.xpose.msk.msra.mxu2 %vm471_vm8, %v460_v53 }
 0x202   :  { %2707 = vmatmul.msk.f32.vlgmr.msra.gmra.mxu2 %vm471_vm8, %v432_v55 }
 0x203   :  { %542 = vmatpush.msrb.mxu2 %v460_v53 }
 0x206   :  { %547 = vrot.lane.b32.xlu2 %v432_v55, %s3449_s10 }
 0x20e   :  { %671 = vrot.lane.b32.xlu2 %v432_v55, %s3448_s4 }
 0x216   :  { %773 = vrot.lane.b32.xlu2 %v432_v55, %s3450_s24 }
 0x258   :  { %v550_v56 = vpop.permute.xlu2 %549 }
 0x259   :  { %2709 = vmatpush.xpose.msk.msra.mxu3 %vm471_vm8, %v550_v56  ;;  %620 = vmatpush.msra.mxu2 %v550_v56 }
 0x260   :  { %v548_v57 = vpop.permute.xlu2 %547 }
 0x261   :  { %2710 = vmatmul.msk.f32.vlgmr.msra.gmra.mxu3 %vm471_vm8, %v548_v57 }
 0x268   :  { %v672_v59 = vpop.permute.xlu2 %671 }
 0x270   :  { %v674_v58 = vpop.permute.xlu0 %673  ;;  %v774_v27 = vpop.permute.xlu2 %773 }
 0x271   :  { %2714 = vmatpush.xpose.msk.msrb.mxu3 %vm471_vm8, %v674_v58 }
 0x274   :  { %2715 = vmatmul.msk.f32.vlgmr.msrb.gmra.mxu3 %vm471_vm8, %v672_v59 }
 0x285   :  { %v495_v63 = vpop.f32.mrf.mxu2 }
 0x286   :  { %v498_v2 = vmul.f32 0.35355338, %v495_v63 }
 0x288   :  { %v499_v3 = vsel %vm3719_vm9, %v498_v2, -1e+30 }
 0x289   :  { %v500_v4 = vsel %vm471_vm8, %v499_v3, -inf }
 0x28a   :  { %501 = vmax.xlane.f32.xlu1 %v500_v4 }
 0x2e4   :  { %v572_v5 = vpop.f32.mrf.mxu3 }
 0x2e5   :  { %v575_v6 = vmul.f32 0.35355338, %v572_v5 }
 0x2e7   :  { %v576_v7 = vsel %vm3719_vm9, %v575_v6, -1e+30 }
 0x2e8   :  { %v577_v9 = vsel %vm471_vm8, %v576_v7, -inf }
 0x2e9   :  { %578 = vmax.xlane.f32.xlu2 %v577_v9 }
 0x2f7   :  { %v696_v23 = vpop.f32.mrf.mxu3 }
 0x2f8   :  { %v699_v24 = vmul.f32 0.35355338, %v696_v23 }
 0x2fa   :  { %v700_v25 = vsel %vm3719_vm9, %v699_v24, -1e+30  ;;  %v463_v24 = vld [vmem:[%s4103_s26 + $0x8] sm:$0xff] }
 0x2fb   :  { %v701_v26 = vsel %vm471_vm8, %v700_v25, -inf  ;;  %643 = vmatpush.msrb.mxu0 %v463_v24 }
 0x2fd   :  { %v502_v10 = vpop.xlane.xlu1 %501 }
 0x2fe   :  { %v503_v11 = vsub.f32 %v499_v3, %v502_v10 }
 0x300   :  { %v504_v12 = vmul.f32 1.442695, %v503_v11 }
 0x302   :  { %2840 = vpow2.f32 %v504_v12 }
 0x308   :  { %v2841_v13 = vpop.eup %2840 }
 0x309   :  { %v506_v22 = vsel %vm471_vm8, %v2841_v13, 0.0 }
 0x30a   :  { %507 = vadd.xlane.f32.xlu1 %v506_v22 }
 0x323   :  { %775 = vrot.lane.b32.xlu1 %v460_v53, %s3450_s24 }
 0x34d   :  { %702 = vmax.xlane.f32.xlu1 %v701_v26 }
 0x35c   :  { %v579_v28 = vpop.xlane.xlu2 %578 }
 0x35d   :  { %v580_v29 = vsub.f32 %v576_v7, %v579_v28 }
 0x35f   :  { %v581_v30 = vmul.f32 1.442695, %v580_v29 }
 0x361   :  { %2842 = vpow2.f32 %v581_v30 }
 0x367   :  { %v2843_v31 = vpop.eup %2842 }
 0x368   :  { %v583_v32 = vsel %vm471_vm8, %v2843_v31, 0.0 }
 0x369   :  { %584 = vadd.xlane.f32.xlu2 %v583_v32 }
 0x37d   :  { %v508_v34 = vpop.xlane.xlu1 %507 }
 0x37e   :  { %2844 = vrcp.f32 %v508_v34  ;;  %v520_v38 = vand.u32 2147483648, %v508_v34  ;;  %v518_v40 = vand.u32 2147483647, %v508_v34  ;;  %vm514_vm11 = vweird.f32 %v508_v34 }
 0x380   :  { %v521_v42 = vor.u32 1.1754944e-38, %v520_v38  ;;  %vm519_vm13 = vcmp.eq.f32.partialorder %v518_v40, 8.507059e+37  ;;  %v465_v38 = vld [vmem:[%s4103_s26 + $0x18] sm:$0xff] }
 0x384   :  { %v2845_v35 = vpop.eup %2844 }
 0x385   :  { %v510_v36 = vmul.f32 %v2845_v35, %v508_v34  ;;  %vm515_vm10 = vweird.f32 %v2845_v35 }
 0x386   :  { %vm516_vm12 = vmor %vm514_vm11, %vm515_vm10 }
 0x387   :  { %v511_v37 = vsub.f32 1.0, %v510_v36 }
 0x389   :  { %v512_v39 = vmul.f32 %v2845_v35, %v511_v37 }
 0x38b   :  { %v513_v41 = vadd.f32 %v2845_v35, %v512_v39 }
 0x38d   :  { %v517_v43 = vsel %vm516_vm12, %v2845_v35, %v513_v41 }
 0x38e   :  { %v522_v44 = vsel %vm519_vm13, %v521_v42, %v517_v43 }
 0x38f   :  { %v523_v45 = vmul.f32 %v2841_v13, %v522_v44 }
 0x391   :  { %2708 = vmatmul.msk.f32.vlgmr.msrb.gmra.mxu2 %vm471_vm8, %v523_v45 }
 0x392   :  { %744 = vmatpush.msrb.mxu2 %v674_v58 }
 0x395   :  { %v776_v46 = vpop.permute.xlu1 %775 }
 0x396   :  { %2718 = vmatpush.xpose.msk.msra.mxu1 %vm471_vm8, %v776_v46  ;;  %846 = vmatpush.msra.mxu3 %v776_v46 }
 0x3c0   :  { %v703_v47 = vpop.xlane.xlu1 %702 }
 0x3c1   :  { %v704_v48 = vsub.f32 %v700_v25, %v703_v47 }
 0x3c3   :  { %v705_v49 = vmul.f32 1.442695, %v704_v48 }
 0x3c5   :  { %2846 = vpow2.f32 %v705_v49 }
 0x3cb   :  { %v2847_v50 = vpop.eup %2846 }
 0x3cc   :  { %v707_v51 = vsel %vm471_vm8, %v2847_v50, 0.0 }
 0x3cd   :  { %708 = vadd.xlane.f32.xlu2 %v707_v51 }
 0x3dc   :  { %v585_v52 = vpop.xlane.xlu2 %584 }
 0x3dd   :  { %2848 = vrcp.f32 %v585_v52  ;;  %v597_v56 = vand.u32 2147483648, %v585_v52  ;;  %v595_v58 = vand.u32 2147483647, %v585_v52  ;;  %vm591_vm15 = vweird.f32 %v585_v52 }
 0x3df   :  { %v598_v60 = vor.u32 1.1754944e-38, %v597_v56  ;;  %vm596_vm2 = vcmp.eq.f32.partialorder %v595_v58, 8.507059e+37  ;;  %v2810_v56 = vld [vmem:[#allocation13] ss:$0 sm:$0xff] }
 0x3e3   :  { %v2849_v53 = vpop.eup %2848 }
 0x3e4   :  { %v587_v54 = vmul.f32 %v2849_v53, %v585_v52  ;;  %vm592_vm14 = vweird.f32 %v2849_v53 }
 0x3e5   :  { %vm593_vm1 = vmor %vm591_vm15, %vm592_vm14 }
 0x3e6   :  { %v588_v55 = vsub.f32 1.0, %v587_v54 }
 0x3e8   :  { %v589_v57 = vmul.f32 %v2849_v53, %v588_v55 }
 0x3ea   :  { %v590_v59 = vadd.f32 %v2849_v53, %v589_v57 }
 0x3ec   :  { %v594_v61 = vsel %vm593_vm1, %v2849_v53, %v590_v59 }
 0x3ed   :  { %v599_v62 = vsel %vm596_vm2, %v598_v60, %v594_v61 }
 0x3ee   :  { %v600_v63 = vmul.f32 %v2843_v31, %v599_v62  ;;  %v464_v31 = vld [vmem:[%s4103_s26 + $0x10] sm:$0xff] }
 0x3ef   :  { %767 = vmatpush.msra.mxu0 %v464_v31 }
 0x3f0   :  { %2711 = vmatmul.msk.f32.vlgmr.msra.gmra.mxu2 %vm471_vm8, %v600_v63 }
 0x3f1   :  { %869 = vmatpush.msra.mxu2 %v465_v38 }
 0x414   :  { %v544_v2 = vpop.f32.mrf.mxu2 }
 0x415   :  { %2713 = vmatmul.msk.f32.vlgmr.msrb.gmra.mxu1 %vm471_vm8, %v544_v2 }
 0x41d   :  { %2719 = vmatmul.msk.f32.vlgmr.msra.gmra.mxu1 %vm471_vm8, %v774_v27 }
 0x440   :  { %v709_v3 = vpop.xlane.xlu2 %708 }
 0x441   :  { %2850 = vrcp.f32 %v709_v3  ;;  %v721_v7 = vand.u32 2147483648, %v709_v3  ;;  %v719_v10 = vand.u32 2147483647, %v709_v3  ;;  %vm715_vm4 = vweird.f32 %v709_v3 }
 0x443   :  { %v722_v12 = vor.u32 1.1754944e-38, %v721_v7  ;;  %vm720_vm6 = vcmp.eq.f32.partialorder %v719_v10, 8.507059e+37  ;;  %v961_v7 = vld [vmem:[#allocation19 + $0x8] sm:$0xff]  ;;  %v930_v10 = vld [vmem:[%s4061_s12 + $0x8] sm:$0xff] }
 0x447   :  { %v2851_v4 = vpop.eup %2850 }
 0x448   :  { %v711_v5 = vmul.f32 %v2851_v4, %v709_v3  ;;  %vm716_vm3 = vweird.f32 %v2851_v4 }
 0x449   :  { %vm717_vm5 = vmor %vm715_vm4, %vm716_vm3 }
 0x44a   :  { %v712_v6 = vsub.f32 1.0, %v711_v5  ;;  %v963_v5 = vld [vmem:[#allocation19 + $0x18] sm:$0xff] }
 0x44b   :  { %983 = vmatpush.msrb.mxu1 %v963_v5  ;;  %v991_v5 = vld [vmem:[#allocation22] sm:$0xff] }
 0x44c   :  { %v713_v9 = vmul.f32 %v2851_v4, %v712_v6  ;;  %v962_v6 = vld [vmem:[#allocation19 + $0x10] sm:$0xff] }
 0x44d   :  { %984 = vmatpush.msrb.mxu1 %v962_v6 }
 0x44e   :  { %v714_v11 = vadd.f32 %v2851_v4, %v713_v9  ;;  %v931_v9 = vld [vmem:[%s4061_s12 + $0x10] sm:$0xff] }
 0x44f   :  { %985 = vmatpush.msrb.mxu1 %v961_v7 }
 0x450   :  { %v718_v13 = vsel %vm717_vm5, %v2851_v4, %v714_v11  ;;  %v960_v11 = vld [vmem:[#allocation19] sm:$0xff] }
 0x451   :  { %v723_v22 = vsel %vm720_vm6, %v722_v12, %v718_v13  ;;  %v346_v12 = vld [vmem:[#allocation5] sm:$0xff]  ;;  %v929_v13 = vld [vmem:[%s4061_s12] sm:$0xff]  ;;  %986 = vmatpush.msrb.mxu1 %v960_v11 }
 0x452   :  { %v724_v23 = vmul.f32 %v2847_v50, %v723_v22  ;;  %2723 = vmatmul.msk.f32.vlgmr.msrb.gmra.mxu1 %vm347_vm0, %v346_v12 }
 0x454   :  { %2716 = vmatmul.msk.f32.vlgmr.msrb.gmra.mxu2 %vm471_vm8, %v724_v23 }
 0x473   :  { %v622_v25 = vpop.f32.mrf.mxu2 }
 0x474   :  { %2712 = vmatmul.msk.f32.vlgmr.msrb.gmra.mxu0 %vm471_vm8, %v622_v25 }
 0x492   :  { %v668_v26 = vpop.f32.mrf.mxu1 }
 0x49a   :  { %v798_v27 = vpop.f32.mrf.mxu1 }
 0x49b   :  { %v801_v28 = vmul.f32 0.35355338, %v798_v27 }
 0x49d   :  { %v802_v29 = vsel %vm3719_vm9, %v801_v28, -1e+30 }
 0x49e   :  { %v803_v30 = vsel %vm471_vm8, %v802_v29, -inf }
 0x49f   :  { %804 = vmax.xlane.f32.xlu0 %v803_v30 }
 0x4d7   :  { %v746_v32 = vpop.f32.mrf.mxu2 }
 0x4d8   :  { %2717 = vmatmul.msk.f32.vlgmr.msra.gmra.mxu0 %vm471_vm8, %v746_v32 }
 0x4f1   :  { %v645_v52 = vpop.f32.mrf.mxu0 }
 0x4f2   :  { %v669_v54 = vadd.f32 %v668_v26, %v645_v52 }
 0x512   :  { %v805_v33 = vpop.xlane.xlu0 %804 }
 0x513   :  { %v806_v34 = vsub.f32 %v802_v29, %v805_v33 }
 0x515   :  { %v807_v35 = vmul.f32 1.442695, %v806_v34 }
 0x517   :  { %2852 = vpow2.f32 %v807_v35 }
 0x51d   :  { %v2853_v36 = vpop.eup %2852 }
 0x51e   :  { %v809_v37 = vsel %vm471_vm8, %v2853_v36, 0.0 }
 0x51f   :  { %810 = vadd.xlane.f32.xlu0 %v809_v37 }
 0x555   :  { %v769_v53 = vpop.f32.mrf.mxu0 }
 0x556   :  { %v772_v55 = vadd.f32 %v769_v53, %v669_v54  ;;  %v2814_v53 = vld [vmem:[#allocation17] ss:$0 sm:$0xff] }
 0x592   :  { %v811_v39 = vpop.xlane.xlu0 %810 }
 0x593   :  { %2854 = vrcp.f32 %v811_v39  ;;  %v823_v43 = vand.u32 2147483648, %v811_v39  ;;  %v821_v45 = vand.u32 2147483647, %v811_v39  ;;  %vm817_vm10 = vweird.f32 %v811_v39 }
 0x595   :  { %v824_v47 = vor.u32 1.1754944e-38, %v823_v43  ;;  %vm822_vm12 = vcmp.eq.f32.partialorder %v821_v45, 8.507059e+37 }
 0x599   :  { %v2855_v40 = vpop.eup %2854 }
 0x59a   :  { %v813_v41 = vmul.f32 %v2855_v40, %v811_v39  ;;  %vm818_vm7 = vweird.f32 %v2855_v40 }
 0x59b   :  { %vm819_vm11 = vmor %vm817_vm10, %vm818_vm7 }
 0x59c   :  { %v814_v42 = vsub.f32 1.0, %v813_v41 }
 0x59e   :  { %v815_v44 = vmul.f32 %v2855_v40, %v814_v42 }
 0x5a0   :  { %v816_v46 = vadd.f32 %v2855_v40, %v815_v44  ;;  %v2811_v44 = vld [vmem:[#allocation14] ss:$0 sm:$0xff] }
 0x5a2   :  { %v820_v48 = vsel %vm819_vm11, %v2855_v40, %v816_v46 }
 0x5a3   :  { %v825_v49 = vsel %vm822_vm12, %v824_v47, %v820_v48  ;;  %v2812_v47 = vld [vmem:[#allocation16] ss:$0 sm:$0xff] }
 0x5a4   :  { %v826_v50 = vmul.f32 %v2853_v36, %v825_v49 }
 0x5a6   :  { %2720 = vmatmul.msk.f32.vlgmr.msra.gmra.mxu3 %vm471_vm8, %v826_v50  ;;  %v2813_v50 = vld [vmem:[#allocation20] ss:$0 sm:$0xff] }
 0x629   :  { %v848_v51 = vpop.f32.mrf.mxu3 }
 0x62a   :  { %2721 = vmatmul.msk.f32.vlgmr.msra.gmra.mxu2 %vm471_vm8, %v848_v51  ;;  %v988_v51 = vpop.f32.mrf.mxu1 }
 0x62b   :  { %v989_v52 = vadd.f32 %v2813_v50, %v988_v51 }
 0x62d   :  { %2724 = vmatpush.xpose.msk.msrb.mxu3 %vm471_vm8, %v989_v52  ;;  %1064 = vmatpush.msrb.mxu2 %v989_v52 }
 0x62f   :  { %1187 = vmatpush.msra.mxu2 %v991_v5 }
 0x6ad   :  { %v871_v57 = vpop.f32.mrf.mxu2 }
 0x6ae   :  { %v874_v58 = vadd.f32 %v871_v57, %v772_v55 }
 0x6b0   :  { %v879_v59 = vadd.f32 %v2810_v56, %v874_v58 }
 0x6b2   :  { %v3763_v60 = vadd.f32 %v879_v59, %v3649_v0  ;;  %v932_v0 = vld [vmem:[%s4061_s12 + $0x18] sm:$0xff] }
 0x6b3   :  { %952 = vmatpush.msrb.mxu0 %v932_v0 }
 0x6b4   :  { %v881_v61 = vsel %vm347_vm0, %v3763_v60, 0.0 }
 0x6b5   :  { %882 = vadd.xlane.f32.xlu1 %v881_v61  ;;  %953 = vmatpush.msrb.mxu0 %v931_v9 }
 0x6b7   :  { %954 = vmatpush.msrb.mxu0 %v930_v10 }
 0x6b9   :  { %955 = vmatpush.msrb.mxu0 %v929_v13 }
 0x728   :  { %v883_v62 = vpop.xlane.xlu1 %882 }
 0x729   :  { %v884_v63 = vmul.f32 %v883_v62, %v3653_v8 }
 0x72b   :  { %v885_v2 = vsub.f32 %v3763_v60, %v884_v63 }
 0x72d   :  { %v886_v3 = vmul.f32 %v885_v2, %v885_v2 }
 0x72f   :  { %v887_v4 = vsel %vm347_vm0, %v886_v3, 0.0 }
 0x730   :  { %888 = vadd.xlane.f32.xlu0 %v887_v4 }
 0x744   :  { %1071 = vrot.lane.b32.xlu0 %v989_v52, %s3449_s10 }
 0x74c   :  { %1295 = vrot.lane.b32.xlu0 %v989_v52, %s3450_s24 }
 0x7a3   :  { %v889_v22 = vpop.xlane.xlu0 %888 }
 0x7a4   :  { %v890_v23 = vmul.f32 0.032258064, %v889_v22 }
 0x7a6   :  { %2856 = vrsqrt.f32 %v890_v23  ;;  %vm898_vm13 = vcmp.eq.f32.partialorder %v890_v23, inf  ;;  %v901_v31 = vand.u32 2147483648, %v890_v23  ;;  %vm900_vm14 = vcmp.eq.f32.partialorder %v890_v23, 0.0 }
 0x7ac   :  { %v2857_v24 = vpop.eup %2856 }
 0x7ad   :  { %v892_v25 = vmul.f32 %v2857_v24, %v890_v23 }
 0x7af   :  { %v893_v26 = vmul.f32 %v2857_v24, %v892_v25 }
 0x7b1   :  { %v894_v27 = vmul.f32 0.5, %v893_v26 }
 0x7b3   :  { %v895_v28 = vsub.f32 1.5, %v894_v27 }
 0x7b5   :  { %v896_v29 = vmul.f32 %v2857_v24, %v895_v28 }
 0x7b6   :  { %v1072_v56 = vpop.permute.xlu0 %1071 }
 0x7b7   :  { %v897_v30 = vmul.f32 %v896_v29, %v890_v23  ;;  %2727 = vmatpush.xpose.msk.msra.mxu0 %vm471_vm8, %v1072_v56  ;;  %1141 = vmatpush.msra.mxu1 %v1072_v56 }
 0x7b9   :  { %v899_v32 = vsel %vm898_vm13, %v890_v23, %v897_v30 }
 0x7ba   :  { %v902_v33 = vsel %vm900_vm14, %v901_v31, %v899_v32 }
 0x7bb   :  { %v904_v34 = vadd.f32 1e-06, %v902_v33 }
 0x7bd   :  { %2858 = vrcp.f32 %v904_v34  ;;  %v916_v38 = vand.u32 2147483648, %v904_v34  ;;  %v914_v40 = vand.u32 2147483647, %v904_v34  ;;  %vm910_vm1 = vweird.f32 %v904_v34 }
 0x7be   :  { %v1296_v29 = vpop.permute.xlu0 %1295 }
 0x7bf   :  { %v917_v42 = vor.u32 1.1754944e-38, %v916_v38  ;;  %vm915_vm3 = vcmp.eq.f32.partialorder %v914_v40, 8.507059e+37 }
 0x7c3   :  { %v2859_v35 = vpop.eup %2858 }
 0x7c4   :  { %v906_v36 = vmul.f32 %v2859_v35, %v904_v34  ;;  %vm911_vm15 = vweird.f32 %v2859_v35 }
 0x7c5   :  { %vm912_vm2 = vmor %vm910_vm1, %vm911_vm15 }
 0x7c6   :  { %v907_v37 = vsub.f32 1.0, %v906_v36 }
 0x7c8   :  { %v908_v39 = vmul.f32 %v2859_v35, %v907_v37 }
 0x7ca   :  { %v909_v41 = vadd.f32 %v2859_v35, %v908_v39 }
 0x7cc   :  { %v913_v43 = vsel %vm912_vm2, %v2859_v35, %v909_v41 }
 0x7cd   :  { %v918_v45 = vsel %vm915_vm3, %v917_v42, %v913_v43 }
 0x7ce   :  { %v919_v46 = vmul.f32 %v918_v45, %v885_v2 }
 0x7d0   :  { %v923_v48 = vmul.f32 %v2811_v44, %v919_v46 }
 0x7d2   :  { %v928_v49 = vadd.f32 %v2812_v47, %v923_v48 }
 0x7d4   :  { %2722 = vmatmul.msk.f32.vlgmr.msrb.gmra.mxu0 %vm347_vm0, %v928_v49 }
 0x851   :  { %v957_v54 = vpop.f32.mrf.mxu0 }
 0x852   :  { %v958_v55 = vadd.f32 %v2814_v53, %v957_v54 }
 0x854   :  { %1293 = vrot.lane.b32.xlu0 %v958_v55, %s3450_s24  ;;  %2725 = vmatmul.msk.f32.vlgmr.msrb.gmra.mxu3 %vm471_vm8, %v958_v55 }
 0x8d7   :  { %v1018_v57 = vpop.f32.mrf.mxu3 }
 0x8d8   :  { %v1021_v58 = vmul.f32 0.35355338, %v1018_v57 }
 0x8da   :  { %v1022_v59 = vsel %vm471_vm8, %v1021_v58, -inf }
 0x8db   :  { %1023 = vmax.xlane.f32.xlu2 %v1022_v59  ;;  %v992_v59 = vld [vmem:[#allocation22 + $0x8] sm:$0xff] }
 0x8dc   :  { %1164 = vmatpush.msra.mxu3 %v992_v59 }
 0x8f3   :  { %1069 = vrot.lane.b32.xlu2 %v958_v55, %s3449_s10 }
 0x8fb   :  { %1192 = vrot.lane.b32.xlu2 %v958_v55, %s3448_s4 }
 0x94e   :  { %v1024_v61 = vpop.xlane.xlu2 %1023 }
 0x94f   :  { %v1025_v62 = vsub.f32 %v1021_v58, %v1024_v61  ;;  %v3814_v61 = vld [vmem:[#allocation2 + $0x8] sm:$0xff] }
 0x951   :  { %v1026_v63 = vmul.f32 1.442695, %v1025_v62  ;;  %v1520_v62 = vsel %vm347_vm0, %v3814_v61, 0.0 }
 0x953   :  { %2860 = vpow2.f32 %v1026_v63 }
 0x956   :  { %v1070_v2 = vpop.permute.xlu2 %1069 }
 0x957   :  { %2728 = vmatmul.msk.f32.vlgmr.msra.gmra.mxu0 %vm471_vm8, %v1070_v2 }
 0x959   :  { %v2861_v3 = vpop.eup %2860 }
 0x95a   :  { %v1028_v4 = vsel %vm471_vm8, %v2861_v3, 0.0 }
 0x95b   :  { %1029 = vadd.xlane.f32.xlu1 %v1028_v4 }
 0x95e   :  { %v1193_v31 = vpop.permute.xlu2 %1192 }
 0x974   :  { %1194 = vrot.lane.b32.xlu1 %v989_v52, %s3448_s4 }
 0x9ce   :  { %v1030_v6 = vpop.xlane.xlu1 %1029 }
 0x9cf   :  { %2862 = vrcp.f32 %v1030_v6  ;;  %v1042_v13 = vand.u32 2147483648, %v1030_v6  ;;  %v1040_v23 = vand.u32 2147483647, %v1030_v6  ;;  %vm1036_vm5 = vweird.f32 %v1030_v6 }
 0x9d1   :  { %v1043_v25 = vor.u32 1.1754944e-38, %v1042_v13  ;;  %vm1041_vm7 = vcmp.eq.f32.partialorder %v1040_v23, 8.507059e+37 }
 0x9d4   :  { %v1094_v0 = vpop.f32.mrf.mxu0 }
 0x9d5   :  { %v2863_v7 = vpop.eup %2862  ;;  %v1097_v9 = vmul.f32 0.35355338, %v1094_v0 }
 0x9d6   :  { %v1032_v10 = vmul.f32 %v2863_v7, %v1030_v6  ;;  %vm1037_vm4 = vweird.f32 %v2863_v7 }
 0x9d7   :  { %v1098_v11 = vsel %vm471_vm8, %v1097_v9, -inf  ;;  %vm1038_vm6 = vmor %vm1036_vm5, %vm1037_vm4 }
 0x9d8   :  { %v1033_v12 = vsub.f32 1.0, %v1032_v10  ;;  %1099 = vmax.xlane.f32.xlu1 %v1098_v11 }
 0x9da   :  { %v1034_v22 = vmul.f32 %v2863_v7, %v1033_v12 }
 0x9dc   :  { %v1035_v24 = vadd.f32 %v2863_v7, %v1034_v22 }
 0x9de   :  { %v1039_v26 = vsel %vm1038_vm6, %v2863_v7, %v1035_v24 }
 0x9df   :  { %v1044_v27 = vsel %vm1041_vm7, %v1043_v25, %v1039_v26 }
 0x9e0   :  { %v1045_v28 = vmul.f32 %v2861_v3, %v1044_v27  ;;  %v993_v27 = vld [vmem:[#allocation22 + $0x10] sm:$0xff] }
 0x9e1   :  { %1287 = vmatpush.msrb.mxu3 %v993_v27  ;;  %v3839_v27 = vld [vmem:[#allocation28 + $0x18] sm:$0xff] }
 0x9e2   :  { %2726 = vmatmul.msk.f32.vlgmr.msrb.gmra.mxu2 %vm471_vm8, %v1045_v28 }
 0x9e3   :  { %2736 = vmatpush.xpose.msk.msrb.mxu2 %vm471_vm8, %v1296_v29 }
 0x9e6   :  { %v1195_v30 = vpop.permute.xlu1 %1194 }
 0x9e7   :  { %2732 = vmatpush.xpose.msk.msrb.mxu0 %vm471_vm8, %v1195_v30  ;;  %1264 = vmatpush.msrb.mxu1 %v1195_v30 }
 0x9ea   :  { %2733 = vmatmul.msk.f32.vlgmr.msrb.gmra.mxu0 %vm471_vm8, %v1193_v31 }
 0x9eb   :  { %1365 = vmatpush.msra.mxu0 %v1296_v29  ;;  %v994_v29 = vld [vmem:[#allocation22 + $0x18] sm:$0xff] }
 0x9ed   :  { %1591 = vmatpush.msrb.mxu0 %v3661_v14 }
 0x9ef   :  { %1592 = vmatpush.msrb.mxu0 %v3671_v16  ;;  %v1294_v16 = vpop.permute.xlu0 %1293 }
 0x9f1   :  { %1593 = vmatpush.msrb.mxu0 %v3683_v18 }
 0x9f3   :  { %1594 = vmatpush.msrb.mxu0 %v3695_v20 }
 0xa4b   :  { %v1100_v32 = vpop.xlane.xlu1 %1099 }
 0xa4c   :  { %v1101_v33 = vsub.f32 %v1097_v9, %v1100_v32 }
 0xa4e   :  { %v1102_v34 = vmul.f32 1.442695, %v1101_v33 }
 0xa50   :  { %2864 = vpow2.f32 %v1102_v34 }
 0xa56   :  { %v2865_v35 = vpop.eup %2864 }
 0xa57   :  { %v1104_v36 = vsel %vm471_vm8, %v2865_v35, 0.0 }
 0xa58   :  { %1105 = vadd.xlane.f32.xlu1 %v1104_v36 }
 0xa60   :  { %1521 = vadd.xlane.f32.xlu1 %v1520_v62 }
 0xa65   :  { %v1066_v37 = vpop.f32.mrf.mxu2 }
 0xa66   :  { %2731 = vmatmul.msk.f32.vlgmr.msra.gmra.mxu2 %vm471_vm8, %v1066_v37 }
 0xa67   :  { %v1217_v38 = vpop.f32.mrf.mxu0 }
 0xa68   :  { %v1220_v39 = vmul.f32 0.35355338, %v1217_v38 }
 0xa6a   :  { %v1221_v14 = vsel %vm471_vm8, %v1220_v39, -inf }
 0xa6b   :  { %1222 = vmax.xlane.f32.xlu2 %v1221_v14 }
 0xa6e   :  { %2737 = vmatmul.msk.f32.vlgmr.msrb.gmra.mxu2 %vm471_vm8, %v1294_v16 }
 0xacb   :  { %v1106_v18 = vpop.xlane.xlu1 %1105 }
 0xacc   :  { %2866 = vrcp.f32 %v1106_v18  ;;  %v1118_v42 = vand.u32 2147483648, %v1106_v18  ;;  %v1116_v44 = vand.u32 2147483647, %v1106_v18  ;;  %vm1112_vm11 = vweird.f32 %v1106_v18 }
 0xace   :  { %v1119_v46 = vor.u32 1.1754944e-38, %v1118_v42  ;;  %vm1117_vm13 = vcmp.eq.f32.partialorder %v1116_v44, 8.507059e+37 }
 0xad2   :  { %v2867_v20 = vpop.eup %2866 }
 0xad3   :  { %v1108_v40 = vmul.f32 %v2867_v20, %v1106_v18  ;;  %vm1113_vm10 = vweird.f32 %v2867_v20  ;;  %v1522_v28 = vpop.xlane.xlu1 %1521 }
 0xad4   :  { %vm1114_vm12 = vmor %vm1112_vm11, %vm1113_vm10  ;;  %v1523_v30 = vmul.f32 %v1522_v28, %v3653_v8  ;;  %v3841_v28 = vld [vmem:[#allocation28 + $0x10] sm:$0xff] }
 0xad5   :  { %v1109_v41 = vsub.f32 1.0, %v1108_v40 }
 0xad6   :  { %v1524_v31 = vsub.f32 %v3814_v61, %v1523_v30 }
 0xad7   :  { %v1110_v43 = vmul.f32 %v2867_v20, %v1109_v41 }
 0xad8   :  { %v1525_v32 = vmul.f32 %v1524_v31, %v1524_v31 }
 0xad9   :  { %v1111_v45 = vadd.f32 %v2867_v20, %v1110_v43 }
 0xada   :  { %v1526_v33 = vsel %vm347_vm0, %v1525_v32, 0.0 }
 0xadb   :  { %v1115_v47 = vsel %vm1114_vm12, %v2867_v20, %v1111_v45 }
 0xadc   :  { %v1120_v48 = vsel %vm1117_vm13, %v1119_v46, %v1115_v47 }
 0xadd   :  { %v1121_v49 = vmul.f32 %v2865_v35, %v1120_v48 }
 0xade   :  { %v1223_v50 = vpop.xlane.xlu2 %1222 }
 0xadf   :  { %v1224_v51 = vsub.f32 %v1220_v39, %v1223_v50  ;;  %2729 = vmatmul.msk.f32.vlgmr.msra.gmra.mxu1 %vm471_vm8, %v1121_v49 }
 0xae0   :  { %1388 = vmatpush.msra.mxu1 %v994_v29  ;;  %v3844_v29 = vld [vmem:[#allocation28 + $0x8] sm:$0xff] }
 0xae1   :  { %v1225_v52 = vmul.f32 1.442695, %v1224_v51 }
 0xae3   :  { %2868 = vpow2.f32 %v1225_v52 }
 0xae9   :  { %v2869_v53 = vpop.eup %2868  ;;  %v3810_v54 = vpop.f32.mrf.mxu2 }
 0xaea   :  { %v1227_v55 = vsel %vm471_vm8, %v2869_v53, 0.0 }
 0xaeb   :  { %1228 = vadd.xlane.f32.xlu2 %v1227_v55 }
 0xaf1   :  { %v1318_v56 = vpop.f32.mrf.mxu2 }
 0xaf2   :  { %v1321_v57 = vmul.f32 0.35355338, %v1318_v56 }
 0xaf3   :  { %1527 = vadd.xlane.f32.xlu2 %v1526_v33 }
 0xaf4   :  { %v1322_v58 = vsel %vm471_vm8, %v1321_v57, -inf }
 0xaf5   :  { %1323 = vmax.xlane.f32.xlu0 %v1322_v58 }
 0xb5c   :  { %v1143_v63 = vpop.f32.mrf.mxu1 }
 0xb5d   :  { %2730 = vmatmul.msk.f32.vlgmr.msra.gmra.mxu3 %vm471_vm8, %v1143_v63 }
 0xb5e   :  { %v1229_v2 = vpop.xlane.xlu2 %1228  ;;  %1471 = vmatpush.msra.mxu3 %v3839_v27 }
 0xb5f   :  { %2870 = vrcp.f32 %v1229_v2  ;;  %v1241_v0 = vand.u32 2147483648, %v1229_v2  ;;  %v1239_v10 = vand.u32 2147483647, %v1229_v2  ;;  %vm1235_vm15 = vweird.f32 %v1229_v2 }
 0xb60   :  { %1472 = vmatpush.msra.mxu3 %v3841_v28 }
 0xb61   :  { %v1242_v13 = vor.u32 1.1754944e-38, %v1241_v0  ;;  %vm1240_vm2 = vcmp.eq.f32.partialorder %v1239_v10, 8.507059e+37 }
 0xb62   :  { %1473 = vmatpush.msra.mxu3 %v3844_v29 }
 0xb65   :  { %v2871_v3 = vpop.eup %2870 }
 0xb66   :  { %v1231_v4 = vmul.f32 %v2871_v3, %v1229_v2  ;;  %vm1236_vm14 = vweird.f32 %v2871_v3  ;;  %v1528_v40 = vpop.xlane.xlu2 %1527 }
 0xb67   :  { %vm1237_vm1 = vmor %vm1235_vm15, %vm1236_vm14  ;;  %v1529_v41 = vmul.f32 0.032258064, %v1528_v40 }
 0xb68   :  { %v1232_v5 = vsub.f32 1.0, %v1231_v4  ;;  %v1324_v6 = vpop.xlane.xlu0 %1323  ;;  %v2816_v4 = vld [vmem:[#allocation7] ss:$0 sm:$0xff] }
 0xb69   :  { %v1325_v7 = vsub.f32 %v1321_v57, %v1324_v6  ;;  %vm1537_vm7 = vcmp.eq.f32.partialorder %v1529_v41, inf  ;;  %v1540_v49 = vand.u32 2147483648, %v1529_v41  ;;  %vm1539_vm10 = vcmp.eq.f32.partialorder %v1529_v41, 0.0  ;;  %v2817_v6 = vld [vmem:[#allocation8] ss:$0 sm:$0xff] }
 0xb6a   :  { %v1233_v9 = vmul.f32 %v2871_v3, %v1232_v5 }
 0xb6b   :  { %v1326_v11 = vmul.f32 1.442695, %v1325_v7 }
 0xb6c   :  { %v1234_v12 = vadd.f32 %v2871_v3, %v1233_v9 }
 0xb6d   :  { %2872 = vpow2.f32 %v1326_v11 }
 0xb6e   :  { %v1238_v22 = vsel %vm1237_vm1, %v2871_v3, %v1234_v12 }
 0xb6f   :  { %v1243_v23 = vsel %vm1240_vm2, %v1242_v13, %v1238_v22  ;;  %v2815_v13 = vld [vmem:[#allocation23] ss:$0 sm:$0xff] }
 0xb70   :  { %v1244_v24 = vmul.f32 %v2869_v53, %v1243_v23 }
 0xb72   :  { %2734 = vmatmul.msk.f32.vlgmr.msrb.gmra.mxu1 %vm471_vm8, %v1244_v24 }
 0xb73   :  { %v2873_v25 = vpop.eup %2872  ;;  %1619 = vmatpush.msrb.mxu1 %v3666_v15 }
 0xb74   :  { %v1328_v26 = vsel %vm471_vm8, %v2873_v25, 0.0 }
 0xb75   :  { %1329 = vadd.xlane.f32.xlu0 %v1328_v26  ;;  %1620 = vmatpush.msrb.mxu1 %v3678_v17 }
 0xb77   :  { %1621 = vmatpush.msrb.mxu1 %v3688_v19 }
 0xb79   :  { %1622 = vmatpush.msrb.mxu1 %v3700_v21 }
 0xbe0   :  { %v1166_v9 = vpop.f32.mrf.mxu3 }
 0xbe1   :  { %v1190_v11 = vadd.f32 %v3810_v54, %v1166_v9  ;;  %v3848_v54 = vld [vmem:[#allocation28] sm:$0xff]  ;;  %v3914_v9 = vld [vmem:[%s4071_s22] sm:$0xff] }
 0xbe2   :  { %1474 = vmatpush.msra.mxu3 %v3848_v54 }
 0xbe8   :  { %v1330_v34 = vpop.xlane.xlu0 %1329 }
 0xbe9   :  { %2874 = vrcp.f32 %v1330_v34  ;;  %v1342_v38 = vand.u32 2147483648, %v1330_v34  ;;  %v1340_v17 = vand.u32 2147483647, %v1330_v34  ;;  %vm1336_vm4 = vweird.f32 %v1330_v34 }
 0xbea   :  { %2876 = vrsqrt.f32 %v1529_v41 }
 0xbeb   :  { %v1343_v19 = vor.u32 1.1754944e-38, %v1342_v38  ;;  %vm1341_vm6 = vcmp.eq.f32.partialorder %v1340_v17, 8.507059e+37 }
 0xbef   :  { %v2875_v35 = vpop.eup %2874  ;;  %v1266_v36 = vpop.f32.mrf.mxu1 }
 0xbf0   :  { %v1332_v37 = vmul.f32 %v2875_v35, %v1330_v34  ;;  %2735 = vmatmul.msk.f32.vlgmr.msrb.gmra.mxu3 %vm471_vm8, %v1266_v36  ;;  %vm1337_vm3 = vweird.f32 %v2875_v35  ;;  %v2877_v42 = vpop.eup %2876 }
 0xbf1   :  { %vm1338_vm5 = vmor %vm1336_vm4, %vm1337_vm3  ;;  %v1531_v43 = vmul.f32 %v2877_v42, %v1529_v41 }
 0xbf2   :  { %v1333_v15 = vsub.f32 1.0, %v1332_v37  ;;  %v2818_v37 = vld [vmem:[#allocation10] ss:$0 sm:$0xff] }
 0xbf3   :  { %v1532_v44 = vmul.f32 %v2877_v42, %v1531_v43 }
 0xbf4   :  { %v1334_v39 = vmul.f32 %v2875_v35, %v1333_v15 }
 0xbf5   :  { %v1533_v45 = vmul.f32 0.5, %v1532_v44 }
 0xbf6   :  { %v1335_v14 = vadd.f32 %v2875_v35, %v1334_v39 }
 0xbf7   :  { %v1534_v46 = vsub.f32 1.5, %v1533_v45 }
 0xbf8   :  { %v1339_v16 = vsel %vm1338_vm5, %v2875_v35, %v1335_v14 }
 0xbf9   :  { %v1344_v18 = vsel %vm1341_vm6, %v1343_v19, %v1339_v16  ;;  %v1535_v47 = vmul.f32 %v2877_v42, %v1534_v46  ;;  %v3869_v46 = vld [vmem:[%s4071_s22 + $0x38] sm:$0xff]  ;;  %vm1492_vm6 = vcmask 523264  }
 0xbfa   :  { %v1345_v21 = vmul.f32 %v2873_v25, %v1344_v18  ;;  %1504 = vmatpush.msra.mxu2 %v3869_v46 }
 0xbfb   :  { %v1536_v48 = vmul.f32 %v1535_v47, %v1529_v41  ;;  %v3874_v47 = vld [vmem:[%s4071_s22 + $0x30] sm:$0xff] }
 0xbfc   :  { %2738 = vmatmul.msk.f32.vlgmr.msra.gmra.mxu0 %vm471_vm8, %v1345_v21  ;;  %1505 = vmatpush.msra.mxu2 %v3874_v47 }
 0xbfd   :  { %v1538_v50 = vsel %vm1537_vm7, %v1529_v41, %v1536_v48  ;;  %v3880_v48 = vld [vmem:[%s4071_s22 + $0x28] sm:$0xff] }
 0xbfe   :  { %v1541_v51 = vsel %vm1539_vm10, %v1540_v49, %v1538_v50  ;;  %v3886_v49 = vld [vmem:[%s4071_s22 + $0x20] sm:$0xff]  ;;  %1506 = vmatpush.msra.mxu2 %v3880_v48  ;;  %v3892_v50 = vld [vmem:[%s4071_s22 + $0x18] sm:$0xff] }
 0xbff   :  { %v1543_v52 = vadd.f32 1e-06, %v1541_v51 }
 0xc00   :  { %1507 = vmatpush.msra.mxu2 %v3886_v49 }
 0xc01   :  { %2878 = vrcp.f32 %v1543_v52  ;;  %v1555_v58 = vand.u32 2147483648, %v1543_v52  ;;  %vm1549_vm11 = vweird.f32 %v1543_v52  ;;  %v1553_v62 = vand.u32 2147483647, %v1543_v52 }
 0xc02   :  { %1508 = vmatpush.msra.mxu2 %v3892_v50 }
 0xc03   :  { %v1556_v63 = vor.u32 1.1754944e-38, %v1555_v58  ;;  %vm1554_vm14 = vcmp.eq.f32.partialorder %v1553_v62, 8.507059e+37 }
 0xc07   :  { %v2879_v53 = vpop.eup %2878 }
 0xc08   :  { %v1545_v55 = vmul.f32 %v2879_v53, %v1543_v52  ;;  %vm1550_vm12 = vweird.f32 %v2879_v53 }
 0xc09   :  { %vm1551_vm13 = vmor %vm1549_vm11, %vm1550_vm12 }
 0xc0a   :  { %v1546_v56 = vsub.f32 1.0, %v1545_v55 }
 0xc0c   :  { %v1547_v57 = vmul.f32 %v2879_v53, %v1546_v56 }
 0xc0e   :  { %v1548_v59 = vadd.f32 %v2879_v53, %v1547_v57 }
 0xc10   :  { %v1552_v2 = vsel %vm1551_vm13, %v2879_v53, %v1548_v59 }
 0xc11   :  { %v1557_v3 = vsel %vm1554_vm14, %v1556_v63, %v1552_v2  ;;  %v2820_v63 = vld [vmem:[#allocation25] ss:$0 sm:$0xff] }
 0xc12   :  { %v1558_v5 = vmul.f32 %v1557_v3, %v1524_v31 }
 0xc14   :  { %v1562_v0 = vmul.f32 %v2816_v4, %v1558_v5  ;;  %v2821_v4 = vld [vmem:[#allocation26] ss:$0 sm:$0xff] }
 0xc16   :  { %v1567_v7 = vadd.f32 %v2817_v6, %v1562_v0  ;;  %v3902_v0 = vld [vmem:[%s4071_s22 + $0x10] sm:$0xff] }
 0xc17   :  { %1509 = vmatpush.msra.mxu2 %v3902_v0 }
 0xc18   :  { %2742 = vmatmul.msk.f32.vlgmr.msrb.gmra.mxu0 %vm347_vm0, %v1567_v7 }
 0xc73   :  { %v1289_v10 = vpop.f32.mrf.mxu3 }
 0xc74   :  { %v1292_v12 = vadd.f32 %v1289_v10, %v1190_v11  ;;  %v2822_v10 = vld [vmem:[#allocation29] ss:$0 sm:$0xff] }
 0xc79   :  { %v1367_v20 = vpop.f32.mrf.mxu0 }
 0xc7a   :  { %2739 = vmatmul.msk.f32.vlgmr.msra.gmra.mxu1 %vm471_vm8, %v1367_v20 }
 0xc82   :  { %2743 = vmatmul.msk.f32.vlgmr.msrb.gmra.mxu1 %vm347_vm0, %v1567_v7  ;;  %v3908_v7 = vld [vmem:[%s4071_s22 + $0x8] sm:$0xff] }
 0xc83   :  { %1510 = vmatpush.msra.mxu2 %v3908_v7 }
 0xc85   :  { %1511 = vmatpush.msra.mxu2 %v3914_v9 }
 0xc95   :  { %v1596_v15 = vpop.f32.mrf.mxu0 }
 0xc96   :  { %v3861_v38 = vadd.f32 %v2818_v37, %v1596_v15 }
 0xcf7   :  { %v1390_v22 = vpop.f32.mrf.mxu1 }
 0xcf8   :  { %v1393_v23 = vadd.f32 %v1390_v22, %v1292_v12 }
 0xcfa   :  { %v1398_v24 = vadd.f32 %v2815_v13, %v1393_v23 }
 0xcfc   :  { %v3835_v25 = vadd.f32 %v1398_v24, %v3763_v60  ;;  %v2819_v60 = vld [vmem:[#allocation11] ss:$0 sm:$0xff] }
 0xcfe   :  { %v1400_v26 = vsel %vm347_vm0, %v3835_v25, 0.0 }
 0xcff   :  { %1401 = vadd.xlane.f32.xlu0 %v1400_v26  ;;  %v1624_v30 = vpop.f32.mrf.mxu1 }
 0xd00   :  { %v3851_v31 = vadd.f32 %v2819_v60, %v1624_v30 }
 0xd02   :  { %2744 = vmatpush.xpose.msk.msrb.mxu3 %vm471_vm8, %v3851_v31  ;;  %1701 = vmatpush.msra.mxu0 %v3851_v31 }
 0xd72   :  { %v1402_v32 = vpop.xlane.xlu0 %1401 }
 0xd73   :  { %v1403_v33 = vmul.f32 %v1402_v32, %v3653_v8 }
 0xd75   :  { %v1404_v34 = vsub.f32 %v3835_v25, %v1403_v33  ;;  %v2823_v33 = vld [vmem:[#allocation31] ss:$0 sm:$0xff] }
 0xd77   :  { %v1405_v35 = vmul.f32 %v1404_v34, %v1404_v34 }
 0xd79   :  { %v1406_v36 = vsel %vm347_vm0, %v1405_v35, 0.0 }
 0xd7a   :  { %1407 = vadd.xlane.f32.xlu1 %v1406_v36 }
 0xd93   :  { %1708 = vrot.lane.b32.xlu1 %v3851_v31, %s3449_s10 }
 0xd9b   :  { %1830 = vrot.lane.b32.xlu1 %v3861_v38, %s3448_s4 }
 0xded   :  { %v1408_v39 = vpop.xlane.xlu1 %1407 }
 0xdee   :  { %v1409_v17 = vmul.f32 0.032258064, %v1408_v39 }
 0xdf0   :  { %2880 = vrsqrt.f32 %v1409_v17  ;;  %vm1417_vm15 = vcmp.eq.f32.partialorder %v1409_v17, inf  ;;  %v1420_v41 = vand.u32 2147483648, %v1409_v17  ;;  %vm1419_vm1 = vcmp.eq.f32.partialorder %v1409_v17, 0.0 }
 0xdf6   :  { %v2881_v14 = vpop.eup %2880 }
 0xdf7   :  { %v1411_v19 = vmul.f32 %v2881_v14, %v1409_v17 }
 0xdf9   :  { %v1412_v16 = vmul.f32 %v2881_v14, %v1411_v19 }
 0xdfb   :  { %v1413_v18 = vmul.f32 0.5, %v1412_v16 }
 0xdfd   :  { %v1414_v21 = vsub.f32 1.5, %v1413_v18 }
 0xdff   :  { %v1415_v20 = vmul.f32 %v2881_v14, %v1414_v21 }
 0xe01   :  { %v1416_v40 = vmul.f32 %v1415_v20, %v1409_v17 }
 0xe03   :  { %v1418_v42 = vsel %vm1417_vm15, %v1409_v17, %v1416_v40 }
 0xe04   :  { %v1421_v43 = vsel %vm1419_vm1, %v1420_v41, %v1418_v42 }
 0xe05   :  { %v1423_v44 = vadd.f32 1e-06, %v1421_v43  ;;  %v1709_v45 = vpop.permute.xlu1 %1708 }
 0xe06   :  { %2747 = vmatpush.xpose.msk.msra.mxu1 %vm471_vm8, %v1709_v45 }
 0xe07   :  { %2882 = vrcp.f32 %v1423_v44  ;;  %v1435_v55 = vand.u32 2147483648, %v1423_v44  ;;  %v1433_v57 = vand.u32 2147483647, %v1423_v44  ;;  %vm1429_vm3 = vweird.f32 %v1423_v44 }
 0xe09   :  { %v1436_v59 = vor.u32 1.1754944e-38, %v1435_v55  ;;  %vm1434_vm5 = vcmp.eq.f32.partialorder %v1433_v57, 8.507059e+37 }
 0xe0d   :  { %v2883_v51 = vpop.eup %2882 }
 0xe0e   :  { %v1425_v52 = vmul.f32 %v2883_v51, %v1423_v44  ;;  %vm1430_vm2 = vweird.f32 %v2883_v51 }
 0xe0f   :  { %vm1431_vm4 = vmor %vm1429_vm3, %vm1430_vm2 }
 0xe10   :  { %v1426_v53 = vsub.f32 1.0, %v1425_v52 }
 0xe12   :  { %v1427_v56 = vmul.f32 %v2883_v51, %v1426_v53  ;;  %v1831_v53 = vpop.permute.xlu1 %1830 }
 0xe14   :  { %v1428_v58 = vadd.f32 %v2883_v51, %v1427_v56 }
 0xe16   :  { %v1432_v62 = vsel %vm1431_vm4, %v2883_v51, %v1428_v58 }
 0xe17   :  { %v1437_v2 = vsel %vm1434_vm5, %v1436_v59, %v1432_v62 }
 0xe18   :  { %v1438_v3 = vmul.f32 %v1437_v2, %v1404_v34 }
 0xe1a   :  { %v1442_v5 = vmul.f32 %v2820_v63, %v1438_v3 }
 0xe1c   :  { %v1447_v6 = vadd.f32 %v2821_v4, %v1442_v5 }
 0xe1e   :  { %2740 = vmatmul.msk.f32.vlgmr.msra.gmra.mxu3 %vm347_vm0, %v1447_v6 }
 0xe1f   :  { %1779 = vmatpush.msra.mxu3 %v1709_v45 }
 0xe26   :  { %2745 = vmatmul.msk.f32.vlgmr.msrb.gmra.mxu3 %vm471_vm8, %v3861_v38 }
 0xea1   :  { %v1476_v11 = vpop.f32.mrf.mxu3 }
 0xea2   :  { %v1477_v12 = vadd.f32 %v2822_v10, %v1476_v11 }
 0xea4   :  { %v1479_v13 = vmax.f32 %v1477_v12, 0.0 }
 0xea6   :  { %2741 = vmatmul.msk.f32.vlgmr.msra.gmra.mxu2 %vm1492_vm6, %v1479_v13 }
 0xea9   :  { %v1654_v22 = vpop.f32.mrf.mxu3 }
 0xeaa   :  { %v1657_v23 = vmul.f32 0.35355338, %v1654_v22 }
 0xeac   :  { %v1658_v24 = vsel %vm3719_vm9, %v1657_v23, -1e+30 }
 0xead   :  { %v1659_v26 = vsel %vm471_vm8, %v1658_v24, -inf }
 0xeae   :  { %1660 = vmax.xlane.f32.xlu2 %v1659_v26 }
 0xec6   :  { %1706 = vrot.lane.b32.xlu2 %v3861_v38, %s3449_s10 }
 0xece   :  { %1932 = vrot.lane.b32.xlu2 %v3861_v38, %s3450_s24  ;;  %v1627_v38 = vld [vmem:[%s4103_s26] sm:$0xff] }
 0xecf   :  { %1825 = vmatpush.msrb.mxu0 %v1627_v38 }
 0xf21   :  { %v1661_v60 = vpop.xlane.xlu2 %1660 }
 0xf22   :  { %v1662_v30 = vsub.f32 %v1658_v24, %v1661_v60 }
 0xf24   :  { %v1663_v32 = vmul.f32 1.442695, %v1662_v30 }
 0xf26   :  { %2884 = vpow2.f32 %v1663_v32 }
 0xf29   :  { %v1707_v34 = vpop.permute.xlu2 %1706  ;;  %v1513_v35 = vpop.f32.mrf.mxu2 }
 0xf2a   :  { %v1514_v36 = vadd.f32 %v2823_v33, %v1513_v35  ;;  %2748 = vmatmul.msk.f32.vlgmr.msra.gmra.mxu1 %vm471_vm8, %v1707_v34 }
 0xf2c   :  { %v2885_v37 = vpop.eup %2884  ;;  %v1516_v15 = vadd.f32 %v1514_v36, %v3835_v25 }
 0xf2d   :  { %v1665_v39 = vsel %vm471_vm8, %v2885_v37, 0.0 }
 0xf2e   :  { %1517 = vst.msk [vmem:[#allocation32] sm:$0xff] %vm347_vm0, %v1516_v15  ;;  %1666 = vadd.xlane.f32.xlu0 %v1665_v39 }
 0xf31   :  { %v1933_v6 = vpop.permute.xlu2 %1932 }
 0xf42   :  { %1832 = vrot.lane.b32.xlu0 %v3851_v31, %s3448_s4 }
 0xf4a   :  { %1934 = vrot.lane.b32.xlu0 %v3851_v31, %s3450_s24 }
 0xfa1   :  { %v1667_v17 = vpop.xlane.xlu0 %1666 }
 0xfa2   :  { %2886 = vrcp.f32 %v1667_v17  ;;  %v1679_v40 = vand.u32 2147483648, %v1667_v17  ;;  %v1677_v41 = vand.u32 2147483647, %v1667_v17  ;;  %vm1673_vm10 = vweird.f32 %v1667_v17 }
 0xfa4   :  { %v1680_v43 = vor.u32 1.1754944e-38, %v1679_v40  ;;  %vm1678_vm12 = vcmp.eq.f32.partialorder %v1677_v41, 8.507059e+37 }
 0xfa7   :  { %v1731_v14 = vpop.f32.mrf.mxu1 }
 0xfa8   :  { %v2887_v25 = vpop.eup %2886  ;;  %v1734_v19 = vmul.f32 0.35355338, %v1731_v14 }
 0xfa9   :  { %v1669_v16 = vmul.f32 %v2887_v25, %v1667_v17  ;;  %vm1674_vm7 = vweird.f32 %v2887_v25 }
 0xfaa   :  { %v1735_v18 = vsel %vm3719_vm9, %v1734_v19, -1e+30  ;;  %vm1675_vm11 = vmor %vm1673_vm10, %vm1674_vm7  ;;  %v1628_v19 = vld [vmem:[%s4103_s26 + $0x8] sm:$0xff] }
 0xfab   :  { %v1670_v21 = vsub.f32 1.0, %v1669_v16  ;;  %v1736_v20 = vsel %vm471_vm8, %v1735_v18, -inf  ;;  %1802 = vmatpush.msrb.mxu2 %v1628_v19  ;;  %v2122_v19 = vld [vmem:[#allocation19 + $0x18] sm:$0xff] }
 0xfac   :  { %1737 = vmax.xlane.f32.xlu1 %v1736_v20 }
 0xfad   :  { %v1671_v31 = vmul.f32 %v2887_v25, %v1670_v21 }
 0xfaf   :  { %v1672_v42 = vadd.f32 %v2887_v25, %v1671_v31 }
 0xfb1   :  { %v1676_v44 = vsel %vm1675_vm11, %v2887_v25, %v1672_v42 }
 0xfb2   :  { %v1681_v45 = vsel %vm1678_vm12, %v1680_v43, %v1676_v44 }
 0xfb3   :  { %v1682_v51 = vmul.f32 %v2885_v37, %v1681_v45 }
 0xfb4   :  { %v1833_v52 = vpop.permute.xlu0 %1832 }
 0xfb5   :  { %2746 = vmatmul.msk.f32.vlgmr.msra.gmra.mxu0 %vm471_vm8, %v1682_v51  ;;  %2752 = vmatpush.xpose.msk.msrb.mxu1 %vm471_vm8, %v1833_v52 }
 0xfb6   :  { %1903 = vmatpush.msrb.mxu3 %v1833_v52 }
 0xfb8   :  { %2753 = vmatmul.msk.f32.vlgmr.msrb.gmra.mxu1 %vm471_vm8, %v1831_v53 }
 0xfbc   :  { %v1935_v55 = vpop.permute.xlu0 %1934 }
 0xfbd   :  { %2756 = vmatpush.xpose.msk.msra.mxu0 %vm471_vm8, %v1935_v55  ;;  %2005 = vmatpush.msra.mxu1 %v1935_v55 }
0x101f   :  { %v1738_v56 = vpop.xlane.xlu1 %1737 }
0x1020   :  { %v1739_v57 = vsub.f32 %v1735_v18, %v1738_v56 }
0x1022   :  { %v1740_v58 = vmul.f32 1.442695, %v1739_v57 }
0x1024   :  { %2888 = vpow2.f32 %v1740_v58  ;;  %v1629_v58 = vld [vmem:[%s4103_s26 + $0x10] sm:$0xff] }
0x1025   :  { %1926 = vmatpush.msra.mxu2 %v1629_v58 }
0x102a   :  { %v2889_v59 = vpop.eup %2888 }
0x102b   :  { %v1742_v62 = vsel %vm471_vm8, %v2889_v59, 0.0 }
0x102c   :  { %1743 = vadd.xlane.f32.xlu1 %v1742_v62 }
0x1032   :  { %v1703_v63 = vpop.f32.mrf.mxu0 }
0x1033   :  { %2751 = vmatmul.msk.f32.vlgmr.msrb.gmra.mxu0 %vm471_vm8, %v1703_v63 }
0x1034   :  { %2142 = vmatpush.msrb.mxu0 %v2122_v19 }
0x1035   :  { %v1855_v2 = vpop.f32.mrf.mxu1 }
0x1036   :  { %v1858_v3 = vmul.f32 0.35355338, %v1855_v2 }
0x1038   :  { %v1859_v4 = vsel %vm3719_vm9, %v1858_v3, -1e+30 }
0x1039   :  { %v1860_v5 = vsel %vm471_vm8, %v1859_v4, -inf }
0x103a   :  { %1861 = vmax.xlane.f32.xlu0 %v1860_v5 }
0x103b   :  { %2757 = vmatmul.msk.f32.vlgmr.msra.gmra.mxu0 %vm471_vm8, %v1933_v6 }
0x109f   :  { %v1744_v10 = vpop.xlane.xlu1 %1743 }
0x10a0   :  { %2890 = vrcp.f32 %v1744_v10  ;;  %v1756_v22 = vand.u32 2147483648, %v1744_v10  ;;  %v1754_v24 = vand.u32 2147483647, %v1744_v10  ;;  %vm1750_vm14 = vweird.f32 %v1744_v10 }
0x10a2   :  { %v1757_v30 = vor.u32 1.1754944e-38, %v1756_v22  ;;  %vm1755_vm1 = vcmp.eq.f32.partialorder %v1754_v24, 8.507059e+37 }
0x10a6   :  { %v2891_v11 = vpop.eup %2890 }
0x10a7   :  { %v1746_v12 = vmul.f32 %v2891_v11, %v1744_v10  ;;  %vm1751_vm13 = vweird.f32 %v2891_v11 }
0x10a8   :  { %vm1752_vm15 = vmor %vm1750_vm14, %vm1751_vm13 }
0x10a9   :  { %v1747_v13 = vsub.f32 1.0, %v1746_v12 }
0x10ab   :  { %v1748_v23 = vmul.f32 %v2891_v11, %v1747_v13 }
0x10ad   :  { %v1749_v26 = vadd.f32 %v2891_v11, %v1748_v23  ;;  %v1862_v60 = vpop.xlane.xlu0 %1861 }
0x10ae   :  { %v1863_v32 = vsub.f32 %v1859_v4, %v1862_v60 }
0x10af   :  { %v1753_v33 = vsel %vm1752_vm15, %v2891_v11, %v1749_v26 }
0x10b0   :  { %v1758_v34 = vsel %vm1755_vm1, %v1757_v30, %v1753_v33  ;;  %v1864_v35 = vmul.f32 1.442695, %v1863_v32  ;;  %v3949_v36 = vpop.f32.mrf.mxu0  ;;  %v2824_v33 = vld [vmem:[#allocation13] ss:$0 sm:$0xff] }
0x10b1   :  { %v1759_v37 = vmul.f32 %v2889_v59, %v1758_v34  ;;  %v1630_v59 = vld [vmem:[%s4103_s26 + $0x18] sm:$0xff] }
0x10b2   :  { %2892 = vpow2.f32 %v1864_v35 }
0x10b3   :  { %2749 = vmatmul.msk.f32.vlgmr.msra.gmra.mxu3 %vm471_vm8, %v1759_v37 }
0x10b4   :  { %2028 = vmatpush.msra.mxu3 %v1630_v59 }
0x10b8   :  { %v2893_v15 = vpop.eup %2892  ;;  %v1957_v39 = vpop.f32.mrf.mxu0 }
0x10b9   :  { %v1960_v38 = vmul.f32 0.35355338, %v1957_v39  ;;  %v1866_v17 = vsel %vm471_vm8, %v2893_v15, 0.0 }
0x10ba   :  { %1867 = vadd.xlane.f32.xlu0 %v1866_v17 }
0x10bb   :  { %v1961_v14 = vsel %vm3719_vm9, %v1960_v38, -1e+30 }
0x10bc   :  { %v1962_v25 = vsel %vm471_vm8, %v1961_v14, -inf }
0x10bd   :  { %1963 = vmax.xlane.f32.xlu2 %v1962_v25 }
0x112d   :  { %v1868_v16 = vpop.xlane.xlu0 %1867 }
0x112e   :  { %2894 = vrcp.f32 %v1868_v16  ;;  %v1880_v1 = vand.u32 2147483648, %v1868_v16  ;;  %v1878_v44 = vand.u32 2147483647, %v1868_v16  ;;  %vm1874_vm2 = vweird.f32 %v1868_v16 }
0x1130   :  { %v1964_v18 = vpop.xlane.xlu2 %1963  ;;  %v1881_v52 = vor.u32 1.1754944e-38, %v1880_v1  ;;  %vm1879_vm4 = vcmp.eq.f32.partialorder %v1878_v44, 8.507059e+37 }
0x1131   :  { %v1965_v21 = vsub.f32 %v1961_v14, %v1964_v18  ;;  %v2090_v18 = vld [vmem:[%s4061_s12 + $0x10] sm:$0xff] }
0x1133   :  { %v1966_v20 = vmul.f32 1.442695, %v1965_v21  ;;  %v2120_v21 = vld [vmem:[#allocation19 + $0x8] sm:$0xff] }
0x1134   :  { %v2895_v40 = vpop.eup %2894 }
0x1135   :  { %v1870_v31 = vmul.f32 %v2895_v40, %v1868_v16  ;;  %2896 = vpow2.f32 %v1966_v20  ;;  %vm1875_vm9 = vweird.f32 %v2895_v40  ;;  %v2091_v16 = vld [vmem:[%s4061_s12 + $0x18] sm:$0xff]  ;;  %v2089_v20 = vld [vmem:[%s4061_s12 + $0x8] sm:$0xff] }
0x1136   :  { %v1781_v41 = vpop.f32.mrf.mxu3  ;;  %vm1876_vm3 = vmor %vm1874_vm2, %vm1875_vm9 }
0x1137   :  { %v1871_v42 = vsub.f32 1.0, %v1870_v31  ;;  %2750 = vmatmul.msk.f32.vlgmr.msrb.gmra.mxu2 %vm471_vm8, %v1781_v41  ;;  %v2088_v31 = vld [vmem:[%s4061_s12] sm:$0xff]  ;;  %v1519_v41 = vld [vmem:[#allocation5 + $0x8] sm:$0xff]  ;;  %s3451_s12 = smov [#allocation32]  }
0x1138   :  { %2111 = vmatpush.msrb.mxu2 %v2091_v16 }
0x1139   :  { %v1872_v43 = vmul.f32 %v2895_v40, %v1871_v42 }
0x113a   :  { %2112 = vmatpush.msrb.mxu2 %v2090_v18 }
0x113b   :  { %v2897_v45 = vpop.eup %2896  ;;  %v1873_v51 = vadd.f32 %v2895_v40, %v1872_v43 }
0x113c   :  { %v1968_v53 = vsel %vm471_vm8, %v2897_v45, 0.0  ;;  %2113 = vmatpush.msrb.mxu2 %v2089_v20 }
0x113d   :  { %v1877_v55 = vsel %vm1876_vm3, %v2895_v40, %v1873_v51  ;;  %1969 = vadd.xlane.f32.xlu2 %v1968_v53  ;;  %v2119_v40 = vld [vmem:[#allocation19] sm:$0xff] }
0x113e   :  { %v1882_v56 = vsel %vm1879_vm4, %v1881_v52, %v1877_v55  ;;  %2114 = vmatpush.msrb.mxu2 %v2088_v31 }
0x113f   :  { %v1883_v57 = vmul.f32 %v2893_v15, %v1882_v56 }
0x1141   :  { %2754 = vmatmul.msk.f32.vlgmr.msrb.gmra.mxu3 %vm471_vm8, %v1883_v57 }
0x11b0   :  { %v1970_v62 = vpop.xlane.xlu2 %1969 }
0x11b1   :  { %2898 = vrcp.f32 %v1970_v62  ;;  %v1982_v4 = vand.u32 2147483648, %v1970_v62  ;;  %v1980_v6 = vand.u32 2147483647, %v1970_v62  ;;  %vm1976_vm7 = vweird.f32 %v1970_v62 }
0x11b3   :  { %v1983_v11 = vor.u32 1.1754944e-38, %v1982_v4  ;;  %vm1981_vm11 = vcmp.eq.f32.partialorder %v1980_v6, 8.507059e+37 }
0x11b7   :  { %v2899_v63 = vpop.eup %2898 }
0x11b8   :  { %v1972_v2 = vmul.f32 %v2899_v63, %v1970_v62  ;;  %vm1977_vm5 = vweird.f32 %v2899_v63 }
0x11b9   :  { %vm1978_vm10 = vmor %vm1976_vm7, %vm1977_vm5 }
0x11ba   :  { %v1973_v3 = vsub.f32 1.0, %v1972_v2  ;;  %v1804_v26 = vpop.f32.mrf.mxu2 }
0x11bb   :  { %v1828_v30 = vadd.f32 %v3949_v36, %v1804_v26 }
0x11bc   :  { %v1974_v5 = vmul.f32 %v2899_v63, %v1973_v3 }
0x11be   :  { %v1975_v10 = vadd.f32 %v2899_v63, %v1974_v5 }
0x11c0   :  { %v1979_v12 = vsel %vm1978_vm10, %v2899_v63, %v1975_v10 }
0x11c1   :  { %v1984_v13 = vsel %vm1981_vm11, %v1983_v11, %v1979_v12  ;;  %v2825_v12 = vld [vmem:[#allocation14] ss:$0 sm:$0xff] }
0x11c2   :  { %v1985_v22 = vmul.f32 %v2897_v45, %v1984_v13 }
0x11c4   :  { %v1905_v23 = vpop.f32.mrf.mxu3  ;;  %2758 = vmatmul.msk.f32.vlgmr.msra.gmra.mxu1 %vm471_vm8, %v1985_v22 }
0x11c5   :  { %2755 = vmatmul.msk.f32.vlgmr.msra.gmra.mxu2 %vm471_vm8, %v1905_v23  ;;  %v2826_v23 = vld [vmem:[#allocation16] ss:$0 sm:$0xff] }
0x1241   :  { %v2007_v24 = vpop.f32.mrf.mxu1 }
0x1242   :  { %2759 = vmatmul.msk.f32.vlgmr.msra.gmra.mxu3 %vm471_vm8, %v2007_v24 }
0x1248   :  { %v1928_v60 = vpop.f32.mrf.mxu2 }
0x1249   :  { %v1931_v32 = vadd.f32 %v1928_v60, %v1828_v30  ;;  %v2827_v60 = vld [vmem:[#allocation20] ss:$0 sm:$0xff] }
0x12c5   :  { %v2030_v34 = vpop.f32.mrf.mxu3 }
0x12c6   :  { %v2033_v35 = vadd.f32 %v2030_v34, %v1931_v32 }
0x12c8   :  { %v2038_v37 = vadd.f32 %v2824_v33, %v2033_v35  ;;  %v2828_v33 = vld [vmem:[#allocation17] ss:$0 sm:$0xff] }
0x12ca   :  { %v3973_v15 = vadd.f32 %v2038_v37, %v3814_v61  ;;  %v2121_v61 = vld [vmem:[#allocation19 + $0x10] sm:$0xff] }
0x12cb   :  { %2143 = vmatpush.msrb.mxu0 %v2121_v61 }
0x12cc   :  { %v2040_v39 = vsel %vm347_vm0, %v3973_v15, 0.0 }
0x12cd   :  { %2041 = vadd.xlane.f32.xlu1 %v2040_v39  ;;  %2144 = vmatpush.msrb.mxu0 %v2120_v21 }
0x12cf   :  { %2145 = vmatpush.msrb.mxu0 %v2119_v40  ;;  %v2150_v40 = vld [vmem:[#allocation22] sm:$0xff] }
0x12d0   :  { %2761 = vmatmul.msk.f32.vlgmr.msrb.gmra.mxu0 %vm347_vm0, %v1519_v41 }
0x1340   :  { %v2042_v38 = vpop.xlane.xlu1 %2041 }
0x1341   :  { %v2043_v17 = vmul.f32 %v2042_v38, %v3653_v8 }
0x1343   :  { %v2044_v14 = vsub.f32 %v3973_v15, %v2043_v17 }
0x1345   :  { %v2045_v25 = vmul.f32 %v2044_v14, %v2044_v14 }
0x1347   :  { %v2046_v36 = vsel %vm347_vm0, %v2045_v25, 0.0 }
0x1348   :  { %2047 = vadd.xlane.f32.xlu0 %v2046_v36 }
0x134d   :  { %v2147_v30 = vpop.f32.mrf.mxu0 }
0x134e   :  { %v2148_v32 = vadd.f32 %v2827_v60, %v2147_v30 }
0x1350   :  { %2762 = vmatpush.xpose.msk.msrb.mxu1 %vm471_vm8, %v2148_v32  ;;  %2223 = vmatpush.msrb.mxu3 %v2148_v32 }
0x1352   :  { %2346 = vmatpush.msra.mxu3 %v2150_v40 }
0x135c   :  { %2230 = vrot.lane.b32.xlu0 %v2148_v32, %s3449_s10 }
0x13bb   :  { %v2048_v42 = vpop.xlane.xlu0 %2047 }
0x13bc   :  { %v2049_v1 = vmul.f32 0.032258064, %v2048_v42 }
0x13be   :  { %2900 = vrsqrt.f32 %v2049_v1  ;;  %vm2057_vm12 = vcmp.eq.f32.partialorder %v2049_v1, inf  ;;  %v2060_v56 = vand.u32 2147483648, %v2049_v1  ;;  %vm2059_vm13 = vcmp.eq.f32.partialorder %v2049_v1, 0.0 }
0x13c4   :  { %v2901_v43 = vpop.eup %2900 }
0x13c5   :  { %v2051_v44 = vmul.f32 %v2901_v43, %v2049_v1 }
0x13c7   :  { %v2052_v45 = vmul.f32 %v2901_v43, %v2051_v44 }
0x13c9   :  { %v2053_v51 = vmul.f32 0.5, %v2052_v45 }
0x13cb   :  { %v2054_v52 = vsub.f32 1.5, %v2053_v51 }
0x13cd   :  { %v2055_v53 = vmul.f32 %v2901_v43, %v2054_v52 }
0x13ce   :  { %v2231_v37 = vpop.permute.xlu0 %2230 }
0x13cf   :  { %v2056_v55 = vmul.f32 %v2055_v53, %v2049_v1  ;;  %2765 = vmatpush.xpose.msk.msra.mxu2 %vm471_vm8, %v2231_v37  ;;  %2300 = vmatpush.msra.mxu0 %v2231_v37 }
0x13d1   :  { %v2058_v57 = vsel %vm2057_vm12, %v2049_v1, %v2056_v55 }
0x13d2   :  { %v2061_v58 = vsel %vm2059_vm13, %v2060_v56, %v2058_v57 }
0x13d3   :  { %v2063_v59 = vadd.f32 1e-06, %v2061_v58 }
0x13d5   :  { %2902 = vrcp.f32 %v2063_v59  ;;  %v2075_v3 = vand.u32 2147483648, %v2063_v59  ;;  %v2073_v5 = vand.u32 2147483647, %v2063_v59  ;;  %vm2069_vm15 = vweird.f32 %v2063_v59 }
0x13d7   :  { %v2076_v10 = vor.u32 1.1754944e-38, %v2075_v3  ;;  %vm2074_vm9 = vcmp.eq.f32.partialorder %v2073_v5, 8.507059e+37 }
0x13db   :  { %v2903_v62 = vpop.eup %2902 }
0x13dc   :  { %v2065_v63 = vmul.f32 %v2903_v62, %v2063_v59  ;;  %vm2070_vm14 = vweird.f32 %v2903_v62 }
0x13dd   :  { %vm2071_vm1 = vmor %vm2069_vm15, %vm2070_vm14 }
0x13de   :  { %v2066_v2 = vsub.f32 1.0, %v2065_v63 }
0x13e0   :  { %v2067_v4 = vmul.f32 %v2903_v62, %v2066_v2 }
0x13e2   :  { %v2068_v6 = vadd.f32 %v2903_v62, %v2067_v4 }
0x13e4   :  { %v2072_v11 = vsel %vm2071_vm1, %v2903_v62, %v2068_v6 }
0x13e5   :  { %v2077_v13 = vsel %vm2074_vm9, %v2076_v10, %v2072_v11 }
0x13e6   :  { %v2078_v22 = vmul.f32 %v2077_v13, %v2044_v14 }
0x13e8   :  { %v2082_v24 = vmul.f32 %v2825_v12, %v2078_v22 }
0x13ea   :  { %v2087_v26 = vadd.f32 %v2826_v23, %v2082_v24 }
0x13ec   :  { %2760 = vmatmul.msk.f32.vlgmr.msrb.gmra.mxu2 %vm347_vm0, %v2087_v26 }
0x146f   :  { %v2116_v34 = vpop.f32.mrf.mxu2 }
0x1470   :  { %v2117_v35 = vadd.f32 %v2828_v33, %v2116_v34 }
0x1472   :  { %2452 = vrot.lane.b32.xlu0 %v2117_v35, %s3450_s24  ;;  %2763 = vmatmul.msk.f32.vlgmr.msrb.gmra.mxu1 %vm471_vm8, %v2117_v35 }
0x147a   :  { %2351 = vrot.lane.b32.xlu0 %v2117_v35, %s3448_s4 }
0x14e4   :  { %v2453_v16 = vpop.permute.xlu0 %2452 }
0x14ec   :  { %v2352_v20 = vpop.permute.xlu0 %2351 }
0x14ef   :  { %v2177_v39 = vpop.f32.mrf.mxu1 }
0x14f0   :  { %v2180_v38 = vmul.f32 0.35355338, %v2177_v39 }
0x14f2   :  { %v2181_v17 = vsel %vm471_vm8, %v2180_v38, -inf }
0x14f3   :  { %2182 = vmax.xlane.f32.xlu2 %v2181_v17 }
0x150b   :  { %2228 = vrot.lane.b32.xlu2 %v2117_v35, %s3449_s10 }
0x1513   :  { %2353 = vrot.lane.b32.xlu2 %v2148_v32, %s3448_s4  ;;  %s2680_s4 = sshll.u32 %s3451_s12, 4  ;;  %s2681_s4 = int_to_ptr.vmem [resolvable:$true] %s2680_s4 }
0x1566   :  { %v2183_v14 = vpop.xlane.xlu2 %2182 }
0x1567   :  { %v2184_v25 = vsub.f32 %v2180_v38, %v2183_v14 }
0x1569   :  { %v2185_v36 = vmul.f32 1.442695, %v2184_v25 }
0x156b   :  { %2904 = vpow2.f32 %v2185_v36 }
0x156e   :  { %v2229_v19 = vpop.permute.xlu2 %2228 }
0x156f   :  { %2766 = vmatmul.msk.f32.vlgmr.msra.gmra.mxu2 %vm471_vm8, %v2229_v19 }
0x1571   :  { %v2905_v61 = vpop.eup %2904 }
0x1572   :  { %v2187_v18 = vsel %vm471_vm8, %v2905_v61, 0.0 }
0x1573   :  { %2188 = vadd.xlane.f32.xlu1 %v2187_v18 }
0x1576   :  { %v2354_v21 = vpop.permute.xlu2 %2353 }
0x1577   :  { %2770 = vmatpush.xpose.msk.msrb.mxu2 %vm471_vm8, %v2354_v21  ;;  %2423 = vmatpush.msrb.mxu0 %v2354_v21 }
0x157a   :  { %2771 = vmatmul.msk.f32.vlgmr.msrb.gmra.mxu2 %vm471_vm8, %v2352_v20 }
0x158c   :  { %2454 = vrot.lane.b32.xlu1 %v2148_v32, %s3450_s24 }
0x15e6   :  { %v2189_v31 = vpop.xlane.xlu1 %2188 }
0x15e7   :  { %2906 = vrcp.f32 %v2189_v31  ;;  %v2201_v43 = vand.u32 2147483648, %v2189_v31  ;;  %v2199_v45 = vand.u32 2147483647, %v2189_v31  ;;  %vm2195_vm3 = vweird.f32 %v2189_v31 }
0x15e9   :  { %v2202_v55 = vor.u32 1.1754944e-38, %v2201_v43  ;;  %vm2200_vm5 = vcmp.eq.f32.partialorder %v2199_v45, 8.507059e+37 }
0x15ed   :  { %v2907_v41 = vpop.eup %2906 }
0x15ee   :  { %v2191_v42 = vmul.f32 %v2907_v41, %v2189_v31  ;;  %vm2196_vm2 = vweird.f32 %v2907_v41  ;;  %v2151_v31 = vld [vmem:[#allocation22 + $0x8] sm:$0xff] }
0x15ef   :  { %vm2197_vm4 = vmor %vm2195_vm3, %vm2196_vm2  ;;  %2323 = vmatpush.msra.mxu1 %v2151_v31 }
0x15f0   :  { %v2192_v1 = vsub.f32 1.0, %v2191_v42 }
0x15f2   :  { %v2193_v44 = vmul.f32 %v2907_v41, %v2192_v1  ;;  %v2253_v51 = vpop.f32.mrf.mxu2 }
0x15f3   :  { %v2256_v52 = vmul.f32 0.35355338, %v2253_v51 }
0x15f4   :  { %v2194_v53 = vadd.f32 %v2907_v41, %v2193_v44 }
0x15f5   :  { %v2257_v56 = vsel %vm471_vm8, %v2256_v52, -inf }
0x15f6   :  { %v2198_v57 = vsel %vm2197_vm4, %v2907_v41, %v2194_v53  ;;  %2258 = vmax.xlane.f32.xlu1 %v2257_v56  ;;  %v2152_v41 = vld [vmem:[#allocation22 + $0x10] sm:$0xff]  ;;  %v2153_v53 = vld [vmem:[#allocation22 + $0x18] sm:$0xff] }
0x15f7   :  { %v2203_v58 = vsel %vm2200_vm5, %v2202_v55, %v2198_v57  ;;  %2446 = vmatpush.msrb.mxu1 %v2152_v41 }
0x15f8   :  { %v2204_v59 = vmul.f32 %v2905_v61, %v2203_v58 }
0x15fa   :  { %2764 = vmatmul.msk.f32.vlgmr.msrb.gmra.mxu3 %vm471_vm8, %v2204_v59 }
0x15fd   :  { %v2376_v62 = vpop.f32.mrf.mxu2 }
0x15fe   :  { %v2379_v63 = vmul.f32 0.35355338, %v2376_v62  ;;  %v2455_v2 = vpop.permute.xlu1 %2454 }
0x15ff   :  { %2774 = vmatpush.xpose.msk.msrb.mxu3 %vm471_vm8, %v2455_v2  ;;  %2524 = vmatpush.msra.mxu2 %v2455_v2 }
0x1600   :  { %v2380_v3 = vsel %vm471_vm8, %v2379_v63, -inf }
0x1601   :  { %2381 = vmax.xlane.f32.xlu0 %v2380_v3 }
0x1669   :  { %v2259_v4 = vpop.xlane.xlu1 %2258 }
0x166a   :  { %v2260_v5 = vsub.f32 %v2256_v52, %v2259_v4 }
0x166c   :  { %v2261_v6 = vmul.f32 1.442695, %v2260_v5 }
0x166e   :  { %2908 = vpow2.f32 %v2261_v6 }
0x1674   :  { %v2909_v10 = vpop.eup %2908  ;;  %v2382_v11 = vpop.xlane.xlu0 %2381 }
0x1675   :  { %v2383_v12 = vsub.f32 %v2379_v63, %v2382_v11  ;;  %v2263_v13 = vsel %vm471_vm8, %v2909_v10, 0.0  ;;  %v2829_v11 = vld [vmem:[#allocation23] ss:$0 sm:$0xff] }
0x1676   :  { %2264 = vadd.xlane.f32.xlu1 %v2263_v13 }
0x1677   :  { %v2384_v22 = vmul.f32 1.442695, %v2383_v12 }
0x1679   :  { %2910 = vpow2.f32 %v2384_v22 }
0x167d   :  { %v2225_v23 = vpop.f32.mrf.mxu3 }
0x167e   :  { %2769 = vmatmul.msk.f32.vlgmr.msra.gmra.mxu3 %vm471_vm8, %v2225_v23 }
0x167f   :  { %v2911_v24 = vpop.eup %2910  ;;  %2662 = vmatpush.msra.mxu3 %v3869_v46 }
0x1680   :  { %v2386_v26 = vsel %vm471_vm8, %v2911_v24, 0.0 }
0x1681   :  { %2387 = vadd.xlane.f32.xlu0 %v2386_v26  ;;  %2663 = vmatpush.msra.mxu3 %v3874_v47 }
0x1683   :  { %2664 = vmatpush.msra.mxu3 %v3880_v48 }
0x1685   :  { %2665 = vmatpush.msra.mxu3 %v3886_v49 }
0x1686   :  { %2775 = vmatmul.msk.f32.vlgmr.msrb.gmra.mxu3 %vm471_vm8, %v2453_v16 }
0x1687   :  { %2666 = vmatpush.msra.mxu3 %v3892_v50 }
0x1689   :  { %2667 = vmatpush.msra.mxu3 %v3902_v0 }
0x168b   :  { %2668 = vmatpush.msra.mxu3 %v3908_v7 }
0x168d   :  { %2669 = vmatpush.msra.mxu3 %v3914_v9 }
0x16e9   :  { %v2265_v46 = vpop.xlane.xlu1 %2264 }
0x16ea   :  { %2912 = vrcp.f32 %v2265_v46  ;;  %v2277_v47 = vand.u32 2147483648, %v2265_v46  ;;  %v2275_v49 = vand.u32 2147483647, %v2265_v46  ;;  %vm2271_vm10 = vweird.f32 %v2265_v46 }
0x16ec   :  { %v2278_v50 = vor.u32 1.1754944e-38, %v2277_v47  ;;  %vm2276_vm12 = vcmp.eq.f32.partialorder %v2275_v49, 8.507059e+37 }
0x16f0   :  { %v2913_v60 = vpop.eup %2912 }
0x16f1   :  { %v2267_v30 = vmul.f32 %v2913_v60, %v2265_v46  ;;  %vm2272_vm7 = vweird.f32 %v2913_v60 }
0x16f2   :  { %vm2273_vm11 = vmor %vm2271_vm10, %vm2272_vm7 }
0x16f3   :  { %v2268_v32 = vsub.f32 1.0, %v2267_v30 }
0x16f4   :  { %v2388_v33 = vpop.xlane.xlu0 %2387 }
0x16f5   :  { %v2269_v48 = vmul.f32 %v2913_v60, %v2268_v32  ;;  %2914 = vrcp.f32 %v2388_v33  ;;  %v2400_v38 = vand.u32 2147483648, %v2388_v33  ;;  %v2398_v14 = vand.u32 2147483647, %v2388_v33 }
0x16f6   :  { %vm2394_vm14 = vweird.f32 %v2388_v33 }
0x16f7   :  { %v2270_v34 = vadd.f32 %v2913_v60, %v2269_v48  ;;  %v2401_v19 = vor.u32 1.1754944e-38, %v2400_v38  ;;  %vm2399_vm1 = vcmp.eq.f32.partialorder %v2398_v14, 8.507059e+37 }
0x16f9   :  { %v2274_v0 = vsel %vm2273_vm11, %v2913_v60, %v2270_v34 }
0x16fa   :  { %v2279_v7 = vsel %vm2276_vm12, %v2278_v50, %v2274_v0 }
0x16fb   :  { %v2915_v35 = vpop.eup %2914  ;;  %v2280_v9 = vmul.f32 %v2909_v10, %v2279_v7 }
0x16fc   :  { %v2390_v37 = vmul.f32 %v2915_v35, %v2388_v33  ;;  %vm2395_vm13 = vweird.f32 %v2915_v35 }
0x16fd   :  { %2767 = vmatmul.msk.f32.vlgmr.msra.gmra.mxu0 %vm471_vm8, %v2280_v9  ;;  %vm2396_vm15 = vmor %vm2394_vm14, %vm2395_vm13 }
0x16fe   :  { %v2391_v39 = vsub.f32 1.0, %v2390_v37  ;;  %2547 = vmatpush.msra.mxu0 %v2153_v53 }
0x1700   :  { %v2392_v17 = vmul.f32 %v2915_v35, %v2391_v39 }
0x1701   :  { %v2348_v25 = vpop.f32.mrf.mxu3 }
0x1702   :  { %v2393_v36 = vadd.f32 %v2915_v35, %v2392_v17 }
0x1704   :  { %v2397_v16 = vsel %vm2396_vm15, %v2915_v35, %v2393_v36 }
0x1705   :  { %v2402_v61 = vsel %vm2399_vm1, %v2401_v19, %v2397_v16 }
0x1706   :  { %v2403_v18 = vmul.f32 %v2911_v24, %v2402_v61 }
0x1708   :  { %2772 = vmatmul.msk.f32.vlgmr.msrb.gmra.mxu0 %vm471_vm8, %v2403_v18  ;;  %v2830_v18 = vld [vmem:[#allocation25] ss:$0 sm:$0xff] }
0x1709   :  { %v2477_v21 = vpop.f32.mrf.mxu3 }
0x170a   :  { %v2480_v20 = vmul.f32 0.35355338, %v2477_v21 }
0x170c   :  { %v2481_v40 = vsel %vm471_vm8, %v2480_v20, -inf }
0x170d   :  { %2482 = vmax.xlane.f32.xlu2 %v2481_v40  ;;  %v2831_v40 = vld [vmem:[#allocation26] ss:$0 sm:$0xff] }
0x177a   :  { %v2302_v42 = vpop.f32.mrf.mxu0 }
0x177b   :  { %2768 = vmatmul.msk.f32.vlgmr.msra.gmra.mxu1 %vm471_vm8, %v2302_v42  ;;  %v2832_v42 = vld [vmem:[#allocation29] ss:$0 sm:$0xff] }
0x177c   :  { %2630 = vmatpush.msra.mxu1 %v3839_v27 }
0x177e   :  { %2631 = vmatpush.msra.mxu1 %v3841_v28 }
0x1780   :  { %v2483_v1 = vpop.xlane.xlu2 %2482  ;;  %2632 = vmatpush.msra.mxu1 %v3844_v29 }
0x1781   :  { %v2484_v43 = vsub.f32 %v2480_v20, %v2483_v1 }
0x1782   :  { %2633 = vmatpush.msra.mxu1 %v3848_v54 }
0x1783   :  { %v2485_v44 = vmul.f32 1.442695, %v2484_v43 }
0x1785   :  { %2916 = vpow2.f32 %v2485_v44  ;;  %v2425_v45 = vpop.f32.mrf.mxu0 }
0x1786   :  { %2773 = vmatmul.msk.f32.vlgmr.msrb.gmra.mxu1 %vm471_vm8, %v2425_v45  ;;  %v2833_v45 = vld [vmem:[#allocation31] ss:$0 sm:$0xff] }
0x178b   :  { %v2917_v51 = vpop.eup %2916 }
0x178c   :  { %v2487_v52 = vsel %vm471_vm8, %v2917_v51, 0.0 }
0x178d   :  { %2488 = vadd.xlane.f32.xlu2 %v2487_v52 }
0x17f8   :  { %v2325_v4 = vpop.f32.mrf.mxu1 }
0x17f9   :  { %v2349_v6 = vadd.f32 %v2348_v25, %v2325_v4 }
0x1800   :  { %v2489_v27 = vpop.xlane.xlu2 %2488 }
0x1801   :  { %2918 = vrcp.f32 %v2489_v27  ;;  %v2501_v29 = vand.u32 2147483648, %v2489_v27  ;;  %v2499_v54 = vand.u32 2147483647, %v2489_v27  ;;  %vm2495_vm2 = vweird.f32 %v2489_v27 }
0x1803   :  { %v2502_v59 = vor.u32 1.1754944e-38, %v2501_v29  ;;  %vm2500_vm4 = vcmp.eq.f32.partialorder %v2499_v54, 8.507059e+37  ;;  %v2448_v5 = vpop.f32.mrf.mxu1 }
0x1804   :  { %v2451_v10 = vadd.f32 %v2448_v5, %v2349_v6 }
0x1807   :  { %v2919_v28 = vpop.eup %2918 }
0x1808   :  { %v2491_v55 = vmul.f32 %v2919_v28, %v2489_v27  ;;  %vm2496_vm9 = vweird.f32 %v2919_v28 }
0x1809   :  { %vm2497_vm3 = vmor %vm2495_vm2, %vm2496_vm9 }
0x180a   :  { %v2492_v56 = vsub.f32 1.0, %v2491_v55 }
0x180c   :  { %v2493_v57 = vmul.f32 %v2919_v28, %v2492_v56 }
0x180e   :  { %v2494_v58 = vadd.f32 %v2919_v28, %v2493_v57 }
0x1810   :  { %v2498_v62 = vsel %vm2497_vm3, %v2919_v28, %v2494_v58 }
0x1811   :  { %v2503_v63 = vsel %vm2500_vm4, %v2502_v59, %v2498_v62 }
0x1812   :  { %v2504_v2 = vmul.f32 %v2917_v51, %v2503_v63 }
0x1814   :  { %2776 = vmatmul.msk.f32.vlgmr.msra.gmra.mxu2 %vm471_vm8, %v2504_v2 }
0x1897   :  { %v2526_v3 = vpop.f32.mrf.mxu2 }
0x1898   :  { %2777 = vmatmul.msk.f32.vlgmr.msra.gmra.mxu0 %vm471_vm8, %v2526_v3 }
0x1915   :  { %v2549_v12 = vpop.f32.mrf.mxu0 }
0x1916   :  { %v2552_v13 = vadd.f32 %v2549_v12, %v2451_v10 }
0x1918   :  { %v2557_v22 = vadd.f32 %v2829_v11, %v2552_v13 }
0x191a   :  { %v2558_v23 = vadd.f32 %v2557_v22, %v3973_v15 }
0x191c   :  { %v2559_v24 = vsel %vm347_vm0, %v2558_v23, 0.0 }
0x191d   :  { %2560 = vadd.xlane.f32.xlu1 %v2559_v24 }
0x1990   :  { %v2561_v26 = vpop.xlane.xlu1 %2560 }
0x1991   :  { %v2562_v46 = vmul.f32 %v2561_v26, %v3653_v8 }
0x1993   :  { %v2563_v60 = vsub.f32 %v2558_v23, %v2562_v46 }
0x1995   :  { %v2564_v30 = vmul.f32 %v2563_v60, %v2563_v60 }
0x1997   :  { %v2565_v32 = vsel %vm347_vm0, %v2564_v30, 0.0 }
0x1998   :  { %2566 = vadd.xlane.f32.xlu2 %v2565_v32 }
0x1a0b   :  { %v2567_v47 = vpop.xlane.xlu2 %2566 }
0x1a0c   :  { %v2568_v33 = vmul.f32 0.032258064, %v2567_v47 }
0x1a0e   :  { %2920 = vrsqrt.f32 %v2568_v33  ;;  %vm2576_vm8 = vcmp.eq.f32.partialorder %v2568_v33, inf  ;;  %v2579_v35 = vand.u32 2147483648, %v2568_v33  ;;  %vm2578_vm5 = vcmp.eq.f32.partialorder %v2568_v33, 0.0 }
0x1a14   :  { %v2921_v48 = vpop.eup %2920 }
0x1a15   :  { %v2570_v49 = vmul.f32 %v2921_v48, %v2568_v33 }
0x1a17   :  { %v2571_v34 = vmul.f32 %v2921_v48, %v2570_v49 }
0x1a19   :  { %v2572_v50 = vmul.f32 0.5, %v2571_v34 }
0x1a1b   :  { %v2573_v0 = vsub.f32 1.5, %v2572_v50 }
0x1a1d   :  { %v2574_v15 = vmul.f32 %v2921_v48, %v2573_v0 }
0x1a1f   :  { %v2575_v7 = vmul.f32 %v2574_v15, %v2568_v33 }
0x1a21   :  { %v2577_v9 = vsel %vm2576_vm8, %v2568_v33, %v2575_v7 }
0x1a22   :  { %v2580_v8 = vsel %vm2578_vm5, %v2579_v35, %v2577_v9 }
0x1a23   :  { %v2582_v37 = vadd.f32 1e-06, %v2580_v8 }
0x1a25   :  { %2922 = vrcp.f32 %v2582_v37  ;;  %v2594_v14 = vand.u32 2147483648, %v2582_v37  ;;  %v2592_v36 = vand.u32 2147483647, %v2582_v37  ;;  %vm2588_vm10 = vweird.f32 %v2582_v37 }
0x1a27   :  { %v2595_v16 = vor.u32 1.1754944e-38, %v2594_v14  ;;  %vm2593_vm12 = vcmp.eq.f32.partialorder %v2592_v36, 8.507059e+37 }
0x1a2b   :  { %v2923_v39 = vpop.eup %2922 }
0x1a2c   :  { %v2584_v38 = vmul.f32 %v2923_v39, %v2582_v37  ;;  %vm2589_vm7 = vweird.f32 %v2923_v39 }
0x1a2d   :  { %vm2590_vm11 = vmor %vm2588_vm10, %vm2589_vm7 }
0x1a2e   :  { %v2585_v17 = vsub.f32 1.0, %v2584_v38 }
0x1a30   :  { %v2586_v25 = vmul.f32 %v2923_v39, %v2585_v17 }
0x1a32   :  { %v2587_v19 = vadd.f32 %v2923_v39, %v2586_v25 }
0x1a34   :  { %v2591_v61 = vsel %vm2590_vm11, %v2923_v39, %v2587_v19 }
0x1a35   :  { %v2596_v21 = vsel %vm2593_vm12, %v2595_v16, %v2591_v61 }
0x1a36   :  { %v2597_v20 = vmul.f32 %v2596_v21, %v2563_v60 }
0x1a38   :  { %v2601_v31 = vmul.f32 %v2830_v18, %v2597_v20 }
0x1a3a   :  { %v2606_v41 = vadd.f32 %v2831_v40, %v2601_v31 }
0x1a3c   :  { %2778 = vmatmul.msk.f32.vlgmr.msra.gmra.mxu1 %vm347_vm0, %v2606_v41 }
0x1ab9   :  { %v2635_v1 = vpop.f32.mrf.mxu1 }
0x1aba   :  { %v2636_v43 = vadd.f32 %v2832_v42, %v2635_v1 }
0x1abc   :  { %v2638_v44 = vmax.f32 %v2636_v43, 0.0 }
0x1abe   :  { %2779 = vmatmul.msk.f32.vlgmr.msra.gmra.mxu3 %vm1492_vm6, %v2638_v44 }
0x1b41   :  { %v2671_v51 = vpop.f32.mrf.mxu3 }
0x1b42   :  { %v2672_v52 = vadd.f32 %v2833_v45, %v2671_v51 }
0x1b44   :  { %v2674_v53 = vadd.f32 %v2672_v52, %v2558_v23 }
0x1b46   :  { %2675 = vst.msk [vmem:[#allocation32 + $0x8] sm:$0xff] %vm347_vm0, %v2674_v53 }
0x1b47   :  { %2688 = dma.vmem_to_hbm [thread:$0]  %s2681_s4, 256, %s2683_s5, [#allocation4], %s4097_s3, %s4097_s3, %s4096_s21  }
0x1b48   :  { %3424 = dma.done.wait [#allocation4], 256  }
0x1b49   :  { %3425 = vsyncadd [#allocation4], 4294967040 }
0x1b4a   :  { %2693 = vsyncpa [#allocation3], 1 }
0x1b4b   :  { %2694 = vsyncpa [#allocation6], 1 }
0x1b4c   :  { %2695 = vsyncpa [#allocation9], 1 }
0x1b4d   :  { %2696 = vsyncpa [#allocation12], 1 }
0x1b4e   :  { %2697 = vsyncpa [#allocation15], 1 }
0x1b4f   :  { %2698 = vsyncpa [#allocation18], 1 }
0x1b50   :  { %2699 = vsyncpa [#allocation21], 1 }
0x1b51   :  { %2700 = vsyncpa [#allocation24], 1 }
0x1b52   :  { %2701 = vsyncpa [#allocation27], 1 }
0x1b53   :  { %2702 = vsyncpa [#allocation30], 1 }
0x1b54   :  { %2703 = vsyncpa [#allocation4], 1 }

</bundles_post_ra>
